<compile_context>
chip_gen: v7x
topology: tpu7x:2x2x1
jax: 0.10.0
libtpu: 0.0.40
codegen_flags: <defaults>
</compile_context>

<pallas_src>
import jax
import jax.numpy as jnp
from jax.experimental import pallas as pl
from jax.experimental.pallas import tpu as pltpu


def _pick_tile(dim, mult, cap):
    """Largest tile <= cap that divides dim and is a multiple of `mult`.

    If dim <= cap the full dim is used (full-extent blocks are always legal)."""
    if dim <= cap:
        return dim
    t = (cap // mult) * mult
    while t >= mult:
        if dim % t == 0:
            return t
        t -= mult
    return (cap // mult) * mult


# ----------------------------------------------------------------------------
# Conv matmul kernel: single K block (K = pack*9*Cin fits in one tile),
# bf16 x bf16 -> f32 accumulate on the MXU, bias + ReLU fused in the store.
# ----------------------------------------------------------------------------
def _conv_mm_kernel(x_ref, w_ref, b_ref, o_ref):
    y = jnp.dot(x_ref[...].astype(jnp.bfloat16), w_ref[...],
                preferred_element_type=jnp.float32)
    o_ref[...] = jnp.maximum(y + b_ref[...], 0.0)


def conv3x3_pallas(x_nhwc, w_packed, b_packed):
    """3x3 conv, pad=1, + bias + ReLU via im2col + block-diagonal-packed matmul.

    w_packed: (pack*9*Cin, pack*Cout) block-diagonal bf16; output rows cover
    `pack` consecutive raster pixels -> 128-lane dense stores."""
    N, H, W, Cin = x_nhwc.shape
    Kp, Np = w_packed.shape
    pack = Kp // (9 * Cin)
    Cout = Np // pack

    xb = x_nhwc.astype(jnp.bfloat16)
    xp = jnp.pad(xb, ((0, 0), (1, 1), (1, 1), (0, 0)))
    # im2col: tap (dy, dx) outer, input-channel inner (matches packed weight rows)
    cols = jnp.concatenate(
        [xp[:, dy:dy + H, dx:dx + W, :] for dy in range(3) for dx in range(3)],
        axis=-1,
    )
    M = N * H * W
    assert M % pack == 0
    Mp = M // pack
    cols = cols.reshape(Mp, Kp)          # contiguous: packs `pack` pixels per row

    tm = _pick_tile(Mp, 8, 1024)         # divisor of Mp; >= 2 tiles here (megacore)
    out = pl.pallas_call(
        _conv_mm_kernel,
        out_shape=jax.ShapeDtypeStruct((Mp, Np), jnp.float32),
        grid_spec=pltpu.PrefetchScalarGridSpec(
            num_scalar_prefetch=0,
            grid=(Mp // tm,),
            in_specs=[
                pl.BlockSpec((tm, Kp), lambda i: (i, 0)),
                pl.BlockSpec((Kp, Np), lambda i: (0, 0)),
                pl.BlockSpec((1, Np), lambda i: (0, 0)),
            ],
            out_specs=pl.BlockSpec((tm, Np), lambda i: (i, 0)),
        ),
        compiler_params=pltpu.CompilerParams(
            dimension_semantics=("parallel",)),
    )(cols, w_packed, b_packed.reshape(1, Np))
    # (Mp, pack*Cout) is exactly (M, Cout) in raster order -> free reshape.
    return out.reshape(N, H, W, Cout)


# ----------------------------------------------------------------------------
# Fused fc1 + ReLU + (dropout=identity) + fc2 kernel.
# Output block resident across the K grid -> accumulate fc1 in o_ref (f32);
# last K step applies bias+ReLU and the (128x128) fc2 matmul in the epilogue.
# ----------------------------------------------------------------------------
def _fc_fused_kernel(x_ref, w1_ref, b1_ref, w2_ref, b2_ref, o_ref):
    k = pl.program_id(0)

    @pl.when(k == 0)
    def _():
        o_ref[...] = jnp.zeros_like(o_ref)

    o_ref[...] += jnp.dot(x_ref[...].astype(jnp.bfloat16), w1_ref[...],
                          preferred_element_type=jnp.float32)

    @pl.when(k == pl.num_programs(0) - 1)
    def _():
        f1 = jnp.maximum(o_ref[...] + b1_ref[...], 0.0)
        # TODO(synk): dropout(p=0.5) is identity here (inference / eval mode).
        o_ref[...] = (jnp.dot(f1.astype(jnp.bfloat16), w2_ref[...],
                              preferred_element_type=jnp.float32)
                      + b2_ref[...])


def fc_fused_pallas(flat, w1, b1, w2, b2):
    """relu(flat @ w1 + b1) @ w2 + b2 in one pallas_call (fc2 in the epilogue)."""
    M, K = flat.shape
    N1 = w1.shape[1]
    N2 = w2.shape[1]
    assert w1.shape[0] == K and w2.shape[0] == N1
    tk = _pick_tile(K, 128, 3456)        # 20736 -> 3456 (exact divisor, no padding)
    assert K % tk == 0

    return pl.pallas_call(
        _fc_fused_kernel,
        out_shape=jax.ShapeDtypeStruct((M, N2), jnp.float32),
        grid_spec=pltpu.PrefetchScalarGridSpec(
            num_scalar_prefetch=0,
            grid=(K // tk,),
            in_specs=[
                pl.BlockSpec((M, tk), lambda k: (0, k)),
                pl.BlockSpec((tk, N1), lambda k: (k, 0)),
                pl.BlockSpec((1, N1), lambda k: (0, 0)),
                pl.BlockSpec((N1, N2), lambda k: (0, 0)),
                pl.BlockSpec((1, N2), lambda k: (0, 0)),
            ],
            out_specs=pl.BlockSpec((M, N2), lambda k: (0, 0)),
        ),
        compiler_params=pltpu.CompilerParams(
            dimension_semantics=("arbitrary",)),
    )(flat, w1, b1.reshape(1, N1), w2, b2.reshape(1, N2))


# ----------------------------------------------------------------------------
# 2x2 max-pool (stride 2): elementwise max of the 4 window taps on a
# lane-dense (N*Ho, Wo*C) layout (Wo*C = 1152 here, multiple of 128).
# ----------------------------------------------------------------------------
def _max4_kernel(a_ref, b_ref, c_ref, d_ref, o_ref):
    o_ref[...] = jnp.maximum(
        jnp.maximum(a_ref[...], b_ref[...]),
        jnp.maximum(c_ref[...], d_ref[...]),
    )


def maxpool2x2_pallas(x_nhwc):
    N, H, W, C = x_nhwc.shape
    Ho, Wo = H // 2, W // 2
    taps = [
        x_nhwc[:, 0::2, 0::2, :],
        x_nhwc[:, 0::2, 1::2, :],
        x_nhwc[:, 1::2, 0::2, :],
        x_nhwc[:, 1::2, 1::2, :],
    ]
    R, L = N * Ho, Wo * C
    taps2d = [t.reshape(R, L) for t in taps]
    # Tile over rows only when the batch makes R large; single block at N=2.
    tr = R if R <= 1024 else _pick_tile(R, 8, 512)
    if R % tr != 0:
        tr = R
    spec = pl.BlockSpec((tr, L), lambda i: (i, 0))
    out = pl.pallas_call(
        _max4_kernel,
        out_shape=jax.ShapeDtypeStruct((R, L), jnp.float32),
        grid=(R // tr,),
        in_specs=[spec, spec, spec, spec],
        out_specs=spec,
        compiler_params=pltpu.CompilerParams(
            dimension_semantics=("parallel",)),
    )(*taps2d)
    return out.reshape(N, Ho, Wo, C)


# ----------------------------------------------------------------------------
# Parameters
# ----------------------------------------------------------------------------
def init_params(num_classes, key):
    ks = jax.random.split(key, 8)
    s = 0.05
    return {
        "conv1_w": jax.random.normal(ks[0], (32, 3, 3, 3), jnp.float32) * s,
        "conv1_b": jax.random.normal(ks[1], (32,), jnp.float32) * s,
        "conv2_w": jax.random.normal(ks[2], (64, 32, 3, 3), jnp.float32) * s,
        "conv2_b": jax.random.normal(ks[3], (64,), jnp.float32) * s,
        "fc1_w": jax.random.normal(ks[4], (128, 20736), jnp.float32) * s,
        "fc1_b": jax.random.normal(ks[5], (128,), jnp.float32) * s,
        "fc2_w": jax.random.normal(ks[6], (num_classes, 128), jnp.float32) * s,
        "fc2_b": jax.random.normal(ks[7], (num_classes,), jnp.float32) * s,
    }


def prepare_params(params):
    """One-time weight preparation (hoisted out of the forward pass):
    conv OIHW -> block-diagonal (pack*9*Cin, 128) bf16; fc1 rows permuted to
    NHWC flatten order, bf16; fc2 transposed + N padded to 128, bf16."""
    num_classes = params["fc2_w"].shape[0]

    def conv_prep(w_oihw, b, pack):
        cout, cin = w_oihw.shape[0], w_oihw.shape[1]
        k = 9 * cin
        # (Cout, Cin, kh, kw) -> (kh, kw, Cin, Cout) -> (9*Cin, Cout)
        w2 = jnp.transpose(w_oihw, (2, 3, 1, 0)).reshape(k, cout).astype(jnp.float32)
        wp = jnp.zeros((pack * k, pack * cout), jnp.float32)
        for j in range(pack):
            wp = wp.at[j * k:(j + 1) * k, j * cout:(j + 1) * cout].set(w2)
        bp = jnp.tile(b.astype(jnp.float32), pack)
        return wp.astype(jnp.bfloat16), bp

    c1w, c1b = conv_prep(params["conv1_w"], params["conv1_b"], pack=4)  # (108, 128)
    c2w, c2b = conv_prep(params["conv2_w"], params["conv2_b"], pack=2)  # (576, 128)

    # fc1: torch (out, C*H*W) -> (H*W*C, out) so NHWC flatten needs no transpose.
    n_fc1, k_fc1 = params["fc1_w"].shape
    c2 = params["conv2_w"].shape[0]
    side = int(round((k_fc1 // c2) ** 0.5))
    fc1 = params["fc1_w"].reshape(n_fc1, c2, side, side)
    fc1 = jnp.transpose(fc1, (2, 3, 1, 0)).reshape(k_fc1, n_fc1)

    npad = 128
    fc2_w = (
        jnp.zeros((n_fc1, npad), jnp.float32)
        .at[:, :num_classes]
        .set(params["fc2_w"].T.astype(jnp.float32))
    )
    fc2_b = (
        jnp.zeros((npad,), jnp.float32)
        .at[:num_classes]
        .set(params["fc2_b"].astype(jnp.float32))
    )

    return {
        "conv1_w": c1w, "conv1_b": c1b,
        "conv2_w": c2w, "conv2_b": c2b,
        "fc1_w": fc1.astype(jnp.bfloat16),            # (20736, 128) bf16, NHWC rows
        "fc1_b": params["fc1_b"].astype(jnp.float32),
        "fc2_w": fc2_w.astype(jnp.bfloat16),          # (128, 128) bf16, padded
        "fc2_b": fc2_b,                                # (128,) f32, padded
    }


# ----------------------------------------------------------------------------
# Full CNN forward
# ----------------------------------------------------------------------------
def cnn_forward(prep, x_nchw, num_classes):
    # NCHW (torch) -> NHWC (kernel layout), once.
    x = jnp.transpose(x_nchw, (0, 2, 3, 1)).astype(jnp.float32)
    h = conv3x3_pallas(x, prep["conv1_w"], prep["conv1_b"])      # (N, 72, 72, 32)
    h = maxpool2x2_pallas(h)                                     # (N, 36, 36, 32)
    h = conv3x3_pallas(h, prep["conv2_w"], prep["conv2_b"])      # (N, 36, 36, 64)
    h = maxpool2x2_pallas(h)                                     # (N, 18, 18, 64)
    # NHWC flatten (fc1_w rows were pre-permuted to match) -> no transpose here.
    flat = h.reshape(h.shape[0], -1)
    out = fc_fused_pallas(flat, prep["fc1_w"], prep["fc1_b"],
                          prep["fc2_w"], prep["fc2_b"])
    return out[:, :num_classes]


# Pure-JAX f32 reference for validation (matches the PyTorch module semantics).
def cnn_reference(params, x_nchw):
    x = x_nchw.astype(jnp.float32)

    def conv(x, w, b):
        y = jax.lax.conv_general_dilated(
            x, w, (1, 1), ((1, 1), (1, 1)),
            dimension_numbers=("NCHW", "OIHW", "NCHW"))
        return jax.nn.relu(y + b[None, :, None, None])

    def pool(x):
        return jax.lax.reduce_window(
            x, -jnp.inf, jax.lax.max, (1, 1, 2, 2), (1, 1, 2, 2), "VALID")

    h = pool(conv(x, params["conv1_w"], params["conv1_b"]))
    h = pool(conv(h, params["conv2_w"], params["conv2_b"]))
    flat = h.reshape(h.shape[0], -1)
    f1 = jax.nn.relu(flat @ params["fc1_w"].T + params["fc1_b"])
    return f1 @ params["fc2_w"].T + params["fc2_b"]


if __name__ == "__main__":
    num_classes = 6
    key = jax.random.PRNGKey(0)
    pkey, xkey = jax.random.split(key)
    params = init_params(num_classes, pkey)
    prep = prepare_params(params)          # one-time weight prep (hoisted)
    # fc1 expects 20736 = 64 * 18 * 18 features -> input spatial must be 72x72
    x = jax.random.normal(xkey, (2, 3, 72, 72), jnp.float32)

    forward = jax.jit(cnn_forward, static_argnums=(2,))
    out = jax.block_until_ready(forward(prep, x, num_classes))
    ref = jax.block_until_ready(cnn_reference(params, x))

    assert out.shape == (2, num_classes), out.shape
    # bf16 weights/activation casts with f32 accumulation -> looser tolerance vs f32 ref.
    max_err = float(jnp.max(jnp.abs(out - ref)))
    assert jnp.allclose(out, ref, rtol=5e-2, atol=5e-2), max_err
    print("KERNEL_OK")
</pallas_src>

<mosaic_0001>
module attributes {stable_mosaic.version = 11 : i64} {
  func.func @_conv_mm_kernel(%arg0: i32, %arg1: memref<864x108xbf16, #tpu.memory_space<vmem>>, %arg2: memref<108x128xbf16, #tpu.memory_space<vmem>>, %arg3: memref<1x128xf32, #tpu.memory_space<vmem>>, %arg4: memref<864x128xf32, #tpu.memory_space<vmem>>) attributes {dimension_semantics = [#tpu.dimension_semantics<parallel>], iteration_bounds = array<i64: 3>, scalar_prefetch = 0 : i64, scratch_operands = 0 : i64, tpu.core_type = #tpu.core_type<tc>, window_params = [{transform_indices = @transform_0, window_bounds = array<i64: 864, 108>}, {pipeline_mode = #tpu.pipeline_mode<synchronous>, transform_indices = @transform_1, window_bounds = array<i64: 108, 128>}, {pipeline_mode = #tpu.pipeline_mode<synchronous>, transform_indices = @transform_2, window_bounds = array<i64: 1, 128>}, {transform_indices = @transform_3, window_bounds = array<i64: 864, 128>}]} {
    %c0 = arith.constant 0 : index
    %c0_0 = arith.constant 0 : index
    %0 = vector.load %arg1[%c0, %c0_0] : memref<864x108xbf16, #tpu.memory_space<vmem>>, vector<864x108xbf16>
    %c0_1 = arith.constant 0 : index
    %c0_2 = arith.constant 0 : index
    %1 = vector.load %arg2[%c0_1, %c0_2] : memref<108x128xbf16, #tpu.memory_space<vmem>>, vector<108x128xbf16>
    %cst = arith.constant dense<0.000000e+00> : vector<864x128xf32>
    %2 = tpu.matmul %0, %1, %cst {dimension_numbers = #tpu.dot_dimension_numbers<[1], [0], [0], [1], [0, 0, 1, 1], [], []>} : vector<864x108xbf16>, vector<108x128xbf16>, vector<864x128xf32> -> vector<864x128xf32>
    %c0_3 = arith.constant 0 : index
    %c0_4 = arith.constant 0 : index
    %3 = vector.load %arg3[%c0_3, %c0_4] : memref<1x128xf32, #tpu.memory_space<vmem>>, vector<1x128xf32>
    %4 = vector.broadcast %3 : vector<1x128xf32> to vector<864x128xf32>
    %5 = arith.addf %2, %4 : vector<864x128xf32>
    %cst_5 = arith.constant 0.000000e+00 : f32
    %6 = vector.broadcast %cst_5 : f32 to vector<864x128xf32>
    %7 = arith.maximumf %5, %6 : vector<864x128xf32>
    %c0_6 = arith.constant 0 : index
    %c0_7 = arith.constant 0 : index
    %8 = vector.load %arg4[%c0_6, %c0_7] : memref<864x128xf32, #tpu.memory_space<vmem>>, vector<864x128xf32>
    tpu.vector_store %arg4[%c0_6, %c0_7], %7 {strides = array<i32>} : memref<864x128xf32, #tpu.memory_space<vmem>>, vector<864x128xf32>,
    return
  }
  func.func @transform_0(%arg0: i32) -> (i32, i32) {
    %c0_i32 = arith.constant 0 : i32
    %c0_i32_0 = arith.constant 0 : i32
    return %arg0, %c0_i32 : i32, i32
  }
  func.func @transform_1(%arg0: i32) -> (i32, i32) {
    %c0_i32 = arith.constant 0 : i32
    %c0_i32_0 = arith.constant 0 : i32
    %c0_i32_1 = arith.constant 0 : i32
    return %c0_i32, %c0_i32_0 : i32, i32
  }
  func.func @transform_2(%arg0: i32) -> (i32, i32) {
    %c0_i32 = arith.constant 0 : i32
    %c0_i32_0 = arith.constant 0 : i32
    %c0_i32_1 = arith.constant 0 : i32
    return %c0_i32, %c0_i32_0 : i32, i32
  }
  func.func @transform_3(%arg0: i32) -> (i32, i32) {
    %c0_i32 = arith.constant 0 : i32
    %c0_i32_0 = arith.constant 0 : i32
    return %arg0, %c0_i32 : i32, i32
  }
}

module attributes {stable_mosaic.version = 11 : i64} {
  func.func @_max4_kernel(%arg0: i32, %arg1: memref<72x1152xf32, #tpu.memory_space<vmem>>, %arg2: memref<72x1152xf32, #tpu.memory_space<vmem>>, %arg3: memref<72x1152xf32, #tpu.memory_space<vmem>>, %arg4: memref<72x1152xf32, #tpu.memory_space<vmem>>, %arg5: memref<72x1152xf32, #tpu.memory_space<vmem>>) attributes {dimension_semantics = [#tpu.dimension_semantics<parallel>], iteration_bounds = array<i64: 1>, scalar_prefetch = 0 : i64, scratch_operands = 0 : i64, tpu.core_type = #tpu.core_type<tc>, window_params = [{transform_indices = @transform_0, window_bounds = array<i64: 72, 1152>}, {transform_indices = @transform_1, window_bounds = array<i64: 72, 1152>}, {transform_indices = @transform_2, window_bounds = array<i64: 72, 1152>}, {transform_indices = @transform_3, window_bounds = array<i64: 72, 1152>}, {transform_indices = @transform_4, window_bounds = array<i64: 72, 1152>}]} {
    %c0 = arith.constant 0 : index
    %c0_0 = arith.constant 0 : index
    %0 = vector.load %arg1[%c0, %c0_0] : memref<72x1152xf32, #tpu.memory_space<vmem>>, vector<72x1152xf32>
    %c0_1 = arith.constant 0 : index
    %c0_2 = arith.constant 0 : index
    %1 = vector.load %arg2[%c0_1, %c0_2] : memref<72x1152xf32, #tpu.memory_space<vmem>>, vector<72x1152xf32>
    %2 = arith.maximumf %0, %1 : vector<72x1152xf32>
    %c0_3 = arith.constant 0 : index
    %c0_4 = arith.constant 0 : index
    %3 = vector.load %arg3[%c0_3, %c0_4] : memref<72x1152xf32, #tpu.memory_space<vmem>>, vector<72x1152xf32>
    %c0_5 = arith.constant 0 : index
    %c0_6 = arith.constant 0 : index
    %4 = vector.load %arg4[%c0_5, %c0_6] : memref<72x1152xf32, #tpu.memory_space<vmem>>, vector<72x1152xf32>
    %5 = arith.maximumf %3, %4 : vector<72x1152xf32>
    %6 = arith.maximumf %2, %5 : vector<72x1152xf32>
    %c0_7 = arith.constant 0 : index
    %c0_8 = arith.constant 0 : index
    %7 = vector.load %arg5[%c0_7, %c0_8] : memref<72x1152xf32, #tpu.memory_space<vmem>>, vector<72x1152xf32>
    tpu.vector_store %arg5[%c0_7, %c0_8], %6 {strides = array<i32>} : memref<72x1152xf32, #tpu.memory_space<vmem>>, vector<72x1152xf32>,
    return
  }
  func.func @transform_0(%arg0: i32) -> (i32, i32) {
    %c0_i32 = arith.constant 0 : i32
    %c0_i32_0 = arith.constant 0 : i32
    return %arg0, %c0_i32 : i32, i32
  }
  func.func @transform_1(%arg0: i32) -> (i32, i32) {
    %c0_i32 = arith.constant 0 : i32
    %c0_i32_0 = arith.constant 0 : i32
    return %arg0, %c0_i32 : i32, i32
  }
  func.func @transform_2(%arg0: i32) -> (i32, i32) {
    %c0_i32 = arith.constant 0 : i32
    %c0_i32_0 = arith.constant 0 : i32
    return %arg0, %c0_i32 : i32, i32
  }
  func.func @transform_3(%arg0: i32) -> (i32, i32) {
    %c0_i32 = arith.constant 0 : i32
    %c0_i32_0 = arith.constant 0 : i32
    return %arg0, %c0_i32 : i32, i32
  }
  func.func @transform_4(%arg0: i32) -> (i32, i32) {
    %c0_i32 = arith.constant 0 : i32
    %c0_i32_0 = arith.constant 0 : i32
    return %arg0, %c0_i32 : i32, i32
  }
}

module attributes {stable_mosaic.version = 11 : i64} {
  func.func @_conv_mm_kernel(%arg0: i32, %arg1: memref<648x576xbf16, #tpu.memory_space<vmem>>, %arg2: memref<576x128xbf16, #tpu.memory_space<vmem>>, %arg3: memref<1x128xf32, #tpu.memory_space<vmem>>, %arg4: memref<648x128xf32, #tpu.memory_space<vmem>>) attributes {dimension_semantics = [#tpu.dimension_semantics<parallel>], iteration_bounds = array<i64: 2>, scalar_prefetch = 0 : i64, scratch_operands = 0 : i64, tpu.core_type = #tpu.core_type<tc>, window_params = [{transform_indices = @transform_0, window_bounds = array<i64: 648, 576>}, {pipeline_mode = #tpu.pipeline_mode<synchronous>, transform_indices = @transform_1, window_bounds = array<i64: 576, 128>}, {pipeline_mode = #tpu.pipeline_mode<synchronous>, transform_indices = @transform_2, window_bounds = array<i64: 1, 128>}, {transform_indices = @transform_3, window_bounds = array<i64: 648, 128>}]} {
    %c0 = arith.constant 0 : index
    %c0_0 = arith.constant 0 : index
    %0 = vector.load %arg1[%c0, %c0_0] : memref<648x576xbf16, #tpu.memory_space<vmem>>, vector<648x576xbf16>
    %c0_1 = arith.constant 0 : index
    %c0_2 = arith.constant 0 : index
    %1 = vector.load %arg2[%c0_1, %c0_2] : memref<576x128xbf16, #tpu.memory_space<vmem>>, vector<576x128xbf16>
    %cst = arith.constant dense<0.000000e+00> : vector<648x128xf32>
    %2 = tpu.matmul %0, %1, %cst {dimension_numbers = #tpu.dot_dimension_numbers<[1], [0], [0], [1], [0, 0, 1, 1], [], []>} : vector<648x576xbf16>, vector<576x128xbf16>, vector<648x128xf32> -> vector<648x128xf32>
    %c0_3 = arith.constant 0 : index
    %c0_4 = arith.constant 0 : index
    %3 = vector.load %arg3[%c0_3, %c0_4] : memref<1x128xf32, #tpu.memory_space<vmem>>, vector<1x128xf32>
    %4 = vector.broadcast %3 : vector<1x128xf32> to vector<648x128xf32>
    %5 = arith.addf %2, %4 : vector<648x128xf32>
    %cst_5 = arith.constant 0.000000e+00 : f32
    %6 = vector.broadcast %cst_5 : f32 to vector<648x128xf32>
    %7 = arith.maximumf %5, %6 : vector<648x128xf32>
    %c0_6 = arith.constant 0 : index
    %c0_7 = arith.constant 0 : index
    %8 = vector.load %arg4[%c0_6, %c0_7] : memref<648x128xf32, #tpu.memory_space<vmem>>, vector<648x128xf32>
    tpu.vector_store %arg4[%c0_6, %c0_7], %7 {strides = array<i32>} : memref<648x128xf32, #tpu.memory_space<vmem>>, vector<648x128xf32>,
    return
  }
  func.func @transform_0(%arg0: i32) -> (i32, i32) {
    %c0_i32 = arith.constant 0 : i32
    %c0_i32_0 = arith.constant 0 : i32
    return %arg0, %c0_i32 : i32, i32
  }
  func.func @transform_1(%arg0: i32) -> (i32, i32) {
    %c0_i32 = arith.constant 0 : i32
    %c0_i32_0 = arith.constant 0 : i32
    %c0_i32_1 = arith.constant 0 : i32
    return %c0_i32, %c0_i32_0 : i32, i32
  }
  func.func @transform_2(%arg0: i32) -> (i32, i32) {
    %c0_i32 = arith.constant 0 : i32
    %c0_i32_0 = arith.constant 0 : i32
    %c0_i32_1 = arith.constant 0 : i32
    return %c0_i32, %c0_i32_0 : i32, i32
  }
  func.func @transform_3(%arg0: i32) -> (i32, i32) {
    %c0_i32 = arith.constant 0 : i32
    %c0_i32_0 = arith.constant 0 : i32
    return %arg0, %c0_i32 : i32, i32
  }
}

module attributes {stable_mosaic.version = 11 : i64} {
  func.func @_max4_kernel(%arg0: i32, %arg1: memref<36x1152xf32, #tpu.memory_space<vmem>>, %arg2: memref<36x1152xf32, #tpu.memory_space<vmem>>, %arg3: memref<36x1152xf32, #tpu.memory_space<vmem>>, %arg4: memref<36x1152xf32, #tpu.memory_space<vmem>>, %arg5: memref<36x1152xf32, #tpu.memory_space<vmem>>) attributes {dimension_semantics = [#tpu.dimension_semantics<parallel>], iteration_bounds = array<i64: 1>, scalar_prefetch = 0 : i64, scratch_operands = 0 : i64, tpu.core_type = #tpu.core_type<tc>, window_params = [{transform_indices = @transform_0, window_bounds = array<i64: 36, 1152>}, {transform_indices = @transform_1, window_bounds = array<i64: 36, 1152>}, {transform_indices = @transform_2, window_bounds = array<i64: 36, 1152>}, {transform_indices = @transform_3, window_bounds = array<i64: 36, 1152>}, {transform_indices = @transform_4, window_bounds = array<i64: 36, 1152>}]} {
    %c0 = arith.constant 0 : index
    %c0_0 = arith.constant 0 : index
    %0 = vector.load %arg1[%c0, %c0_0] : memref<36x1152xf32, #tpu.memory_space<vmem>>, vector<36x1152xf32>
    %c0_1 = arith.constant 0 : index
    %c0_2 = arith.constant 0 : index
    %1 = vector.load %arg2[%c0_1, %c0_2] : memref<36x1152xf32, #tpu.memory_space<vmem>>, vector<36x1152xf32>
    %2 = arith.maximumf %0, %1 : vector<36x1152xf32>
    %c0_3 = arith.constant 0 : index
    %c0_4 = arith.constant 0 : index
    %3 = vector.load %arg3[%c0_3, %c0_4] : memref<36x1152xf32, #tpu.memory_space<vmem>>, vector<36x1152xf32>
    %c0_5 = arith.constant 0 : index
    %c0_6 = arith.constant 0 : index
    %4 = vector.load %arg4[%c0_5, %c0_6] : memref<36x1152xf32, #tpu.memory_space<vmem>>, vector<36x1152xf32>
    %5 = arith.maximumf %3, %4 : vector<36x1152xf32>
    %6 = arith.maximumf %2, %5 : vector<36x1152xf32>
    %c0_7 = arith.constant 0 : index
    %c0_8 = arith.constant 0 : index
    %7 = vector.load %arg5[%c0_7, %c0_8] : memref<36x1152xf32, #tpu.memory_space<vmem>>, vector<36x1152xf32>
    tpu.vector_store %arg5[%c0_7, %c0_8], %6 {strides = array<i32>} : memref<36x1152xf32, #tpu.memory_space<vmem>>, vector<36x1152xf32>,
    return
  }
  func.func @transform_0(%arg0: i32) -> (i32, i32) {
    %c0_i32 = arith.constant 0 : i32
    %c0_i32_0 = arith.constant 0 : i32
    return %arg0, %c0_i32 : i32, i32
  }
  func.func @transform_1(%arg0: i32) -> (i32, i32) {
    %c0_i32 = arith.constant 0 : i32
    %c0_i32_0 = arith.constant 0 : i32
    return %arg0, %c0_i32 : i32, i32
  }
  func.func @transform_2(%arg0: i32) -> (i32, i32) {
    %c0_i32 = arith.constant 0 : i32
    %c0_i32_0 = arith.constant 0 : i32
    return %arg0, %c0_i32 : i32, i32
  }
  func.func @transform_3(%arg0: i32) -> (i32, i32) {
    %c0_i32 = arith.constant 0 : i32
    %c0_i32_0 = arith.constant 0 : i32
    return %arg0, %c0_i32 : i32, i32
  }
  func.func @transform_4(%arg0: i32) -> (i32, i32) {
    %c0_i32 = arith.constant 0 : i32
    %c0_i32_0 = arith.constant 0 : i32
    return %arg0, %c0_i32 : i32, i32
  }
}

module attributes {stable_mosaic.version = 11 : i64} {
  func.func @_fc_fused_kernel(%arg0: i32, %arg1: memref<2x3456xf32, #tpu.memory_space<vmem>>, %arg2: memref<3456x128xbf16, #tpu.memory_space<vmem>>, %arg3: memref<1x128xf32, #tpu.memory_space<vmem>>, %arg4: memref<128x128xbf16, #tpu.memory_space<vmem>>, %arg5: memref<1x128xf32, #tpu.memory_space<vmem>>, %arg6: memref<2x128xf32, #tpu.memory_space<vmem>>) attributes {dimension_semantics = [#tpu.dimension_semantics<arbitrary>], iteration_bounds = array<i64: 6>, scalar_prefetch = 0 : i64, scratch_operands = 0 : i64, tpu.core_type = #tpu.core_type<tc>, window_params = [{transform_indices = @transform_0, window_bounds = array<i64: 2, 3456>}, {transform_indices = @transform_1, window_bounds = array<i64: 3456, 128>}, {pipeline_mode = #tpu.pipeline_mode<synchronous>, transform_indices = @transform_2, window_bounds = array<i64: 1, 128>}, {pipeline_mode = #tpu.pipeline_mode<synchronous>, transform_indices = @transform_3, window_bounds = array<i64: 128, 128>}, {pipeline_mode = #tpu.pipeline_mode<synchronous>, transform_indices = @transform_4, window_bounds = array<i64: 1, 128>}, {pipeline_mode = #tpu.pipeline_mode<synchronous>, transform_indices = @transform_5, window_bounds = array<i64: 2, 128>}]} {
    %c0_i32 = arith.constant 0 : i32
    %0 = arith.cmpi eq, %arg0, %c0_i32 : i32
    %1 = arith.extui %0 : i1 to i32
    %c0_i32_0 = arith.constant 0 : i32
    %2 = arith.cmpi ne, %1, %c0_i32_0 : i32
    scf.if %2 {
      %cst_9 = arith.constant 0.000000e+00 : f32
      %13 = vector.broadcast %cst_9 : f32 to vector<2x128xf32>
      %c0_10 = arith.constant 0 : index
      %c0_11 = arith.constant 0 : index
      %14 = vector.load %arg6[%c0_10, %c0_11] : memref<2x128xf32, #tpu.memory_space<vmem>>, vector<2x128xf32>
      tpu.vector_store %arg6[%c0_10, %c0_11], %13 {strides = array<i32>} : memref<2x128xf32, #tpu.memory_space<vmem>>, vector<2x128xf32>,
    } else {
    }
    %c0 = arith.constant 0 : index
    %c0_1 = arith.constant 0 : index
    %3 = vector.load %arg6[%c0, %c0_1] : memref<2x128xf32, #tpu.memory_space<vmem>>, vector<2x128xf32>
    %c0_2 = arith.constant 0 : index
    %c0_3 = arith.constant 0 : index
    %4 = vector.load %arg1[%c0_2, %c0_3] : memref<2x3456xf32, #tpu.memory_space<vmem>>, vector<2x3456xf32>
    %5 = arith.truncf %4 : vector<2x3456xf32> to vector<2x3456xbf16>
    %c0_4 = arith.constant 0 : index
    %c0_5 = arith.constant 0 : index
    %6 = vector.load %arg2[%c0_4, %c0_5] : memref<3456x128xbf16, #tpu.memory_space<vmem>>, vector<3456x128xbf16>
    %cst = arith.constant dense<0.000000e+00> : vector<2x128xf32>
    %7 = tpu.matmul %5, %6, %cst {dimension_numbers = #tpu.dot_dimension_numbers<[1], [0], [0], [1], [0, 0, 1, 1], [], []>} : vector<2x3456xbf16>, vector<3456x128xbf16>, vector<2x128xf32> -> vector<2x128xf32>
    %8 = arith.addf %3, %7 : vector<2x128xf32>
    %c0_6 = arith.constant 0 : index
    %c0_7 = arith.constant 0 : index
    %9 = vector.load %arg6[%c0_6, %c0_7] : memref<2x128xf32, #tpu.memory_space<vmem>>, vector<2x128xf32>
    tpu.vector_store %arg6[%c0_6, %c0_7], %8 {strides = array<i32>} : memref<2x128xf32, #tpu.memory_space<vmem>>, vector<2x128xf32>,
    %c5_i32 = arith.constant 5 : i32
    %10 = arith.cmpi eq, %arg0, %c5_i32 : i32
    %11 = arith.extui %10 : i1 to i32
    %c0_i32_8 = arith.constant 0 : i32
    %12 = arith.cmpi ne, %11, %c0_i32_8 : i32
    scf.if %12 {
      %c0_9 = arith.constant 0 : index
      %c0_10 = arith.constant 0 : index
      %13 = vector.load %arg6[%c0_9, %c0_10] : memref<2x128xf32, #tpu.memory_space<vmem>>, vector<2x128xf32>
      %c0_11 = arith.constant 0 : index
      %c0_12 = arith.constant 0 : index
      %14 = vector.load %arg3[%c0_11, %c0_12] : memref<1x128xf32, #tpu.memory_space<vmem>>, vector<1x128xf32>
      %15 = vector.broadcast %14 : vector<1x128xf32> to vector<2x128xf32>
      %16 = arith.addf %13, %15 : vector<2x128xf32>
      %cst_13 = arith.constant 0.000000e+00 : f32
      %17 = vector.broadcast %cst_13 : f32 to vector<2x128xf32>
      %18 = arith.maximumf %16, %17 : vector<2x128xf32>
      %19 = arith.truncf %18 : vector<2x128xf32> to vector<2x128xbf16>
      %c0_14 = arith.constant 0 : index
      %c0_15 = arith.constant 0 : index
      %20 = vector.load %arg4[%c0_14, %c0_15] : memref<128x128xbf16, #tpu.memory_space<vmem>>, vector<128x128xbf16>
      %cst_16 = arith.constant dense<0.000000e+00> : vector<2x128xf32>
      %21 = tpu.matmul %19, %20, %cst_16 {dimension_numbers = #tpu.dot_dimension_numbers<[1], [0], [0], [1], [0, 0, 1, 1], [], []>} : vector<2x128xbf16>, vector<128x128xbf16>, vector<2x128xf32> -> vector<2x128xf32>
      %c0_17 = arith.constant 0 : index
      %c0_18 = arith.constant 0 : index
      %22 = vector.load %arg5[%c0_17, %c0_18] : memref<1x128xf32, #tpu.memory_space<vmem>>, vector<1x128xf32>
      %23 = vector.broadcast %22 : vector<1x128xf32> to vector<2x128xf32>
      %24 = arith.addf %21, %23 : vector<2x128xf32>
      %c0_19 = arith.constant 0 : index
      %c0_20 = arith.constant 0 : index
      %25 = vector.load %arg6[%c0_19, %c0_20] : memref<2x128xf32, #tpu.memory_space<vmem>>, vector<2x128xf32>
      tpu.vector_store %arg6[%c0_19, %c0_20], %24 {strides = array<i32>} : memref<2x128xf32, #tpu.memory_space<vmem>>, vector<2x128xf32>,
    } else {
    }
    return
  }
  func.func @transform_0(%arg0: i32) -> (i32, i32) {
    %c0_i32 = arith.constant 0 : i32
    %c0_i32_0 = arith.constant 0 : i32
    return %c0_i32, %arg0 : i32, i32
  }
  func.func @transform_1(%arg0: i32) -> (i32, i32) {
    %c0_i32 = arith.constant 0 : i32
    %c0_i32_0 = arith.constant 0 : i32
    return %arg0, %c0_i32 : i32, i32
  }
  func.func @transform_2(%arg0: i32) -> (i32, i32) {
    %c0_i32 = arith.constant 0 : i32
    %c0_i32_0 = arith.constant 0 : i32
    %c0_i32_1 = arith.constant 0 : i32
    return %c0_i32, %c0_i32_0 : i32, i32
  }
  func.func @transform_3(%arg0: i32) -> (i32, i32) {
    %c0_i32 = arith.constant 0 : i32
    %c0_i32_0 = arith.constant 0 : i32
    %c0_i32_1 = arith.constant 0 : i32
    return %c0_i32, %c0_i32_0 : i32, i32
  }
  func.func @transform_4(%arg0: i32) -> (i32, i32) {
    %c0_i32 = arith.constant 0 : i32
    %c0_i32_0 = arith.constant 0 : i32
    %c0_i32_1 = arith.constant 0 : i32
    return %c0_i32, %c0_i32_0 : i32, i32
  }
  func.func @transform_5(%arg0: i32) -> (i32, i32) {
    %c0_i32 = arith.constant 0 : i32
    %c0_i32_0 = arith.constant 0 : i32
    %c0_i32_1 = arith.constant 0 : i32
    return %c0_i32, %c0_i32_0 : i32, i32
  }
}

</mosaic_0001>

<bundles_post_ra>
// kernel: cnn_forward.5
= control target key start
LH: loop header
LB: loop body
LE: loop exit
PB: predicated region body
PF: predicated region fallthrough
CT: control target
= control target key end

     0   :  { %s1940_s12 = smov 0   ;;  %s2315_s0 = inlined_call_operand.vmem [shape: bf16[2592,108], index: 0, kind: input, shape index: {}]   ;;  %s2316_s1 = inlined_call_operand.vmem [shape: bf16[108,128], index: 1, kind: input, shape index: {}]   ;;  %s2317_s2 = inlined_call_operand.vmem [shape: f32[1,128], index: 2, kind: input, shape index: {}]   ;;  %s2318_s3 = inlined_call_operand.vmem [shape: f32[2592,128], index: 3, kind: output, shape index: {}]  }
   0x1 LB: > { %s1519_s13 = sadd.s32 4294967295, %s1918_s12   ;;  %p1523_p0 = scmp.ge.s32.totalorder %s1918_s12, 1  ;;  %s1918_s12 = sphi %s1940_s12, %s13_s12  }
   0x2   : > { %p138_p1 = scmp.lt.s32.totalorder %s1918_s12, 4 }
   0x4   : > { %p139_p2 = pnand %p1523_p0, %p138_p1 }
   0x5   : > { %v1851_v0 = vld [vmem:[%s2316_s1] sm:$0xff] (!%p139_p2)   ;;  %v1852_v1 = vld [vmem:[%s2316_s1 + $0x8] sm:$0xff] (!%p139_p2)   ;;  %s162_s18 = smul.u32 (!%p139_p2), 108, %s1519_s13  ;;  %v1853_v2 = vld [vmem:[%s2316_s1 + $0x10] sm:$0xff] (!%p139_p2)   ;;  %vm615_vm0 = vcmask (!%p139_p2), 883712   ;;  %vm778_vm1 = vcmask (!%p139_p2), 1045504  }
   0x6   : > { %142 = sbr.rel (%p139_p2) target bundleno = 358 (0x166), region = 32  ;;  %1705 = vmatprep.subr.bf16.mxu0 (!%p139_p2), %v1851_v0  ;;  %1827 = vmatprep.subr.bf16.mxu1 (!%p139_p2), %v1851_v0  ;;  %v1854_v3 = vld [vmem:[%s2316_s1 + $0x18] sm:$0xff] (!%p139_p2)   ;;  %v1855_v6 = vld [vmem:[%s2316_s1 + $0x20] sm:$0xff] (!%p139_p2)   ;;  %v1856_v7 = vld [vmem:[%s2316_s1 + $0x28] sm:$0xff] (!%p139_p2)  }
   0x7   : > { %1706 = vmatpush3.bf16.msra.mxu0 (!%p139_p2), %v1851_v0  ;;  %1834 = vmatpush3.bf16.msra.mxu1 (!%p139_p2), %v1851_v0  ;;  %p163_p3 = scmp.lt.s32.totalorder (!%p139_p2), %s162_s18, 323  ;;  %v1857_v8 = vld [vmem:[%s2316_s1 + $0x30] sm:$0x3f] (!%p139_p2)   ;;  %v2088_v62 = vld [vmem:[%s2317_s2] ss:$0 sm:$0xff] (!%p139_p2) }
   0x8   : > { %1707 = vmatprep.subr.bf16.mxu0 (!%p139_p2), %v1852_v1  ;;  %1828 = vmatprep.subr.bf16.mxu1 (!%p139_p2), %v1852_v1  ;;  %v780_v9 = vsel (!%p139_p2), %vm778_vm1, %v1857_v8, 0 }
   0xb   : > { %1708 = vmatpush3.bf16.msra.mxu0 (!%p139_p2), %v1852_v1  ;;  %1835 = vmatpush3.bf16.msra.mxu1 (!%p139_p2), %v1852_v1 }
   0xc   : > { %1709 = vmatprep.subr.bf16.mxu0 (!%p139_p2), %v1853_v2  ;;  %1829 = vmatprep.subr.bf16.mxu1 (!%p139_p2), %v1853_v2 }
   0xd   : > { %s2320_s18 = smov (!%p163_p3, %s162_s18), 323 }
   0xe   : > { %s1524_s21 = sshll.u32 %s2320_s18, 2  ;;  %s1525_s8 = sshll.u32 %s2320_s18, 3 }
   0xf   : > { %s1966_s26 = scalar_lea.vmem %s2315_s0, %s1524_s21  ;;  %1710 = vmatpush3.bf16.msra.mxu0 %v1853_v2  ;;  %1836 = vmatpush3.bf16.msra.mxu1 %v1853_v2  ;;  %s2096_s11 = scalar_lea.vmem %s2318_s3, %s1525_s8 }
  0x10   : > { %v1858_v4 = vld [vmem:[%s1966_s26] sm:$0xff]   ;;  %1711 = vmatprep.subr.bf16.mxu0 %v1854_v3  ;;  %1830 = vmatprep.subr.bf16.mxu1 %v1854_v3  ;;  %v1859_v10 = vld [vmem:[%s1966_s26 + $0x8] sm:$0xff]   ;;  %v1862_v12 = vld [vmem:[%s1966_s26 + $0x10] sm:$0xff]  }
  0x11   : > { %v1860_v5 = vld [vmem:[%s1966_s26 + $0xe0] sm:$0xff]   ;;  %1719 = vmatprep.mubr.msk.bf16.mxu0 %vm615_vm0, %v1858_v4  ;;  %v1861_v11 = vld [vmem:[%s1966_s26 + $0xe8] sm:$0xff]   ;;  %v1864_v13 = vld [vmem:[%s1966_s26 + $0xf0] sm:$0xff]  }
  0x12   : > { %1775 = vmatprep.mubr.msk.bf16.mxu1 %vm615_vm0, %v1860_v5  ;;  %v1863_v14 = vld [vmem:[%s1966_s26 + $0x18] sm:$0xff]   ;;  %v1866_v16 = vld [vmem:[%s1966_s26 + $0x20] sm:$0xff]   ;;  %v1867_v18 = vld [vmem:[%s1966_s26 + $0x28] sm:$0xff]  }
  0x13   : > { %1712 = vmatpush3.bf16.msra.mxu0 %v1854_v3  ;;  %1837 = vmatpush3.bf16.msra.mxu1 %v1854_v3  ;;  %v1865_v15 = vld [vmem:[%s1966_s26 + $0xf8] sm:$0xff]   ;;  %v1868_v17 = vld [vmem:[%s1966_s26 + $0x100] sm:$0xff]   ;;  %v1869_v19 = vld [vmem:[%s1966_s26 + $0x108] sm:$0xff]  }
  0x14   : > { %1713 = vmatprep.subr.bf16.mxu0 %v1855_v6  ;;  %1831 = vmatprep.subr.bf16.mxu1 %v1855_v6  ;;  %v1870_v20 = vld [vmem:[%s1966_s26 + $0x30] sm:$0xff]   ;;  %v1871_v22 = vld [vmem:[%s1966_s26 + $0x38] sm:$0xff]   ;;  %v1874_v24 = vld [vmem:[%s1966_s26 + $0x40] sm:$0xff]  }
  0x15   : > { %v1872_v21 = vld [vmem:[%s1966_s26 + $0x110] sm:$0xff]   ;;  %v1873_v23 = vld [vmem:[%s1966_s26 + $0x118] sm:$0xff]   ;;  %v1876_v25 = vld [vmem:[%s1966_s26 + $0x120] sm:$0xff]  }
  0x16   : > { %v1875_v26 = vld [vmem:[%s1966_s26 + $0x48] sm:$0xff]   ;;  %v1878_v28 = vld [vmem:[%s1966_s26 + $0x50] sm:$0xff]   ;;  %v1879_v30 = vld [vmem:[%s1966_s26 + $0x58] sm:$0xff]  }
  0x17   : > { %1714 = vmatpush3.bf16.msra.mxu0 %v1855_v6  ;;  %1838 = vmatpush3.bf16.msra.mxu1 %v1855_v6  ;;  %v1877_v27 = vld [vmem:[%s1966_s26 + $0x128] sm:$0xff]   ;;  %v1880_v29 = vld [vmem:[%s1966_s26 + $0x130] sm:$0xff]   ;;  %v1881_v31 = vld [vmem:[%s1966_s26 + $0x138] sm:$0xff]  }
  0x18   : > { %1715 = vmatprep.subr.bf16.mxu0 %v1856_v7  ;;  %1832 = vmatprep.subr.bf16.mxu1 %v1856_v7  ;;  %v1882_v32 = vld [vmem:[%s1966_s26 + $0x60] sm:$0xff]   ;;  %v1883_v34 = vld [vmem:[%s1966_s26 + $0x68] sm:$0xff]   ;;  %v1886_v36 = vld [vmem:[%s1966_s26 + $0x70] sm:$0xff]  }
  0x19   : > { %v1884_v33 = vld [vmem:[%s1966_s26 + $0x140] sm:$0xff]   ;;  %v1885_v35 = vld [vmem:[%s1966_s26 + $0x148] sm:$0xff]   ;;  %v1888_v37 = vld [vmem:[%s1966_s26 + $0x150] sm:$0xff]  }
  0x1a   : > { %v1887_v38 = vld [vmem:[%s1966_s26 + $0x78] sm:$0xff]   ;;  %v1890_v40 = vld [vmem:[%s1966_s26 + $0x80] sm:$0xff]   ;;  %v1891_v42 = vld [vmem:[%s1966_s26 + $0x88] sm:$0xff]  }
  0x1b   : > { %1716 = vmatpush3.bf16.msra.mxu0 %v1856_v7  ;;  %1839 = vmatpush3.bf16.msra.mxu1 %v1856_v7  ;;  %v1889_v39 = vld [vmem:[%s1966_s26 + $0x158] sm:$0xff]   ;;  %v1892_v41 = vld [vmem:[%s1966_s26 + $0x160] sm:$0xff]   ;;  %v1893_v43 = vld [vmem:[%s1966_s26 + $0x168] sm:$0xff]  }
  0x1c   : > { %1841 = vmatprep.subr.msk.bf16.mxu0 %vm778_vm1, %v1857_v8  ;;  %1842 = vmatprep.subr.msk.bf16.mxu1 %vm778_vm1, %v1857_v8  ;;  %v1894_v44 = vld [vmem:[%s1966_s26 + $0x90] sm:$0xff]   ;;  %v1895_v46 = vld [vmem:[%s1966_s26 + $0x98] sm:$0xff]   ;;  %v1898_v48 = vld [vmem:[%s1966_s26 + $0xa0] sm:$0xff]  }
  0x1d   : > { %v1896_v45 = vld [vmem:[%s1966_s26 + $0x170] sm:$0xff]   ;;  %v1897_v47 = vld [vmem:[%s1966_s26 + $0x178] sm:$0xff]   ;;  %v1900_v49 = vld [vmem:[%s1966_s26 + $0x180] sm:$0xff]  }
  0x1e   : > { %v1899_v50 = vld [vmem:[%s1966_s26 + $0xa8] sm:$0xff]   ;;  %v1902_v52 = vld [vmem:[%s1966_s26 + $0xb0] sm:$0xff]   ;;  %v1903_v54 = vld [vmem:[%s1966_s26 + $0xb8] sm:$0xff]  }
  0x1f   : > { %1718 = vmatpush3.bf16.msra.mxu0 %v780_v9  ;;  %1840 = vmatpush3.bf16.msra.mxu1 %v780_v9  ;;  %v1901_v51 = vld [vmem:[%s1966_s26 + $0x188] sm:$0xff]   ;;  %v1904_v53 = vld [vmem:[%s1966_s26 + $0x190] sm:$0xff]   ;;  %v1905_v55 = vld [vmem:[%s1966_s26 + $0x198] sm:$0xff]  }
  0x20   : > { %v1906_v56 = vld [vmem:[%s1966_s26 + $0xc0] sm:$0xff]   ;;  %v1907_v58 = vld [vmem:[%s1966_s26 + $0xc8] sm:$0xff]   ;;  %v1910_v60 = vld [vmem:[%s1966_s26 + $0xd0] sm:$0xff]  }
  0x21   : > { %v1908_v57 = vld [vmem:[%s1966_s26 + $0x1a0] sm:$0xff]   ;;  %v1909_v59 = vld [vmem:[%s1966_s26 + $0x1a8] sm:$0xff]   ;;  %v1911_v61 = vld [vmem:[%s1966_s26 + $0xd8] sm:$0xff]  }
  0x22   : > { %1720 = vmatmul.mubr.msk.bf16.vlgmr.msra.gmra.mrb[0].mxu0 %vm615_vm0, %v1859_v10  ;;  %1776 = vmatmul.mubr.msk.bf16.vlgmr.msra.gmra.mrb[0].mxu1 %vm615_vm0, %v1861_v11 }
  0x23   : > { %1723 = vmatprep.mubr.msk.bf16.mxu0 %vm615_vm0, %v1862_v12  ;;  %1779 = vmatprep.mubr.msk.bf16.mxu1 %vm615_vm0, %v1864_v13 }
  0x2a   : > { %1724 = vmatmul.mubr.msk.bf16.gmra.mrb[4].mxu0 %vm615_vm0, %v1863_v14  ;;  %1780 = vmatmul.mubr.msk.bf16.gmra.mrb[4].mxu1 %vm615_vm0, %v1865_v15 }
  0x2b   : > { %1727 = vmatprep.mubr.msk.bf16.mxu0 %vm615_vm0, %v1866_v16  ;;  %1783 = vmatprep.mubr.msk.bf16.mxu1 %vm615_vm0, %v1868_v17 }
  0x32   : > { %1728 = vmatmul.mubr.msk.bf16.gmra.mrb[8].mxu0 %vm615_vm0, %v1867_v18  ;;  %1784 = vmatmul.mubr.msk.bf16.gmra.mrb[8].mxu1 %vm615_vm0, %v1869_v19 }
  0x33   : > { %1731 = vmatprep.mubr.msk.bf16.mxu0 %vm615_vm0, %v1870_v20  ;;  %1787 = vmatprep.mubr.msk.bf16.mxu1 %vm615_vm0, %v1872_v21 }
  0x3a   : > { %1732 = vmatmul.mubr.msk.bf16.gmra.mrb[12].mxu0 %vm615_vm0, %v1871_v22  ;;  %1788 = vmatmul.mubr.msk.bf16.gmra.mrb[12].mxu1 %vm615_vm0, %v1873_v23 }
  0x3b   : > { %1735 = vmatprep.mubr.msk.bf16.mxu0 %vm615_vm0, %v1874_v24  ;;  %1791 = vmatprep.mubr.msk.bf16.mxu1 %vm615_vm0, %v1876_v25 }
  0x42   : > { %1736 = vmatmul.mubr.msk.bf16.gmra.mrb[16].mxu0 %vm615_vm0, %v1875_v26  ;;  %1792 = vmatmul.mubr.msk.bf16.gmra.mrb[16].mxu1 %vm615_vm0, %v1877_v27 }
  0x43   : > { %1739 = vmatprep.mubr.msk.bf16.mxu0 %vm615_vm0, %v1878_v28  ;;  %1795 = vmatprep.mubr.msk.bf16.mxu1 %vm615_vm0, %v1880_v29 }
  0x4a   : > { %1740 = vmatmul.mubr.msk.bf16.gmra.mrb[20].mxu0 %vm615_vm0, %v1879_v30  ;;  %1796 = vmatmul.mubr.msk.bf16.gmra.mrb[20].mxu1 %vm615_vm0, %v1881_v31 }
  0x4b   : > { %1743 = vmatprep.mubr.msk.bf16.mxu0 %vm615_vm0, %v1882_v32  ;;  %1799 = vmatprep.mubr.msk.bf16.mxu1 %vm615_vm0, %v1884_v33 }
  0x52   : > { %1744 = vmatmul.mubr.msk.bf16.gmra.mrb[24].mxu0 %vm615_vm0, %v1883_v34  ;;  %1800 = vmatmul.mubr.msk.bf16.gmra.mrb[24].mxu1 %vm615_vm0, %v1885_v35 }
  0x53   : > { %1747 = vmatprep.mubr.msk.bf16.mxu0 %vm615_vm0, %v1886_v36  ;;  %1803 = vmatprep.mubr.msk.bf16.mxu1 %vm615_vm0, %v1888_v37 }
  0x5a   : > { %1748 = vmatmul.mubr.msk.bf16.gmra.mrb[28].mxu0 %vm615_vm0, %v1887_v38  ;;  %1804 = vmatmul.mubr.msk.bf16.gmra.mrb[28].mxu1 %vm615_vm0, %v1889_v39 }
  0x5b   : > { %1751 = vmatprep.mubr.msk.bf16.mxu0 %vm615_vm0, %v1890_v40  ;;  %1807 = vmatprep.mubr.msk.bf16.mxu1 %vm615_vm0, %v1892_v41 }
  0x62   : > { %1752 = vmatmul.mubr.msk.bf16.gmra.mrb[32].mxu0 %vm615_vm0, %v1891_v42  ;;  %1808 = vmatmul.mubr.msk.bf16.gmra.mrb[32].mxu1 %vm615_vm0, %v1893_v43 }
  0x63   : > { %1755 = vmatprep.mubr.msk.bf16.mxu0 %vm615_vm0, %v1894_v44  ;;  %1811 = vmatprep.mubr.msk.bf16.mxu1 %vm615_vm0, %v1896_v45 }
  0x6a   : > { %1756 = vmatmul.mubr.msk.bf16.gmra.mrb[36].mxu0 %vm615_vm0, %v1895_v46  ;;  %1812 = vmatmul.mubr.msk.bf16.gmra.mrb[36].mxu1 %vm615_vm0, %v1897_v47 }
  0x6b   : > { %1759 = vmatprep.mubr.msk.bf16.mxu0 %vm615_vm0, %v1898_v48  ;;  %1815 = vmatprep.mubr.msk.bf16.mxu1 %vm615_vm0, %v1900_v49 }
  0x72   : > { %1760 = vmatmul.mubr.msk.bf16.gmra.mrb[40].mxu0 %vm615_vm0, %v1899_v50  ;;  %1816 = vmatmul.mubr.msk.bf16.gmra.mrb[40].mxu1 %vm615_vm0, %v1901_v51 }
  0x73   : > { %1763 = vmatprep.mubr.msk.bf16.mxu0 %vm615_vm0, %v1902_v52  ;;  %1819 = vmatprep.mubr.msk.bf16.mxu1 %vm615_vm0, %v1904_v53 }
  0x7a   : > { %1764 = vmatmul.mubr.msk.bf16.gmra.mrb[44].mxu0 %vm615_vm0, %v1903_v54  ;;  %1820 = vmatmul.mubr.msk.bf16.gmra.mrb[44].mxu1 %vm615_vm0, %v1905_v55 }
  0x7b   : > { %1767 = vmatprep.mubr.msk.bf16.mxu0 %vm615_vm0, %v1906_v56  ;;  %1823 = vmatprep.mubr.msk.bf16.mxu1 %vm615_vm0, %v1908_v57 }
  0x82   : > { %1768 = vmatmul.mubr.msk.bf16.gmra.mrb[48].mxu0 %vm615_vm0, %v1907_v58  ;;  %1824 = vmatmul.mubr.msk.bf16.gmra.mrb[48].mxu1 %vm615_vm0, %v1909_v59 }
  0x83   : > { %1771 = vmatprep.mubr.msk.bf16.mxu0 %vm615_vm0, %v1910_v60 }
  0x8a   : > { %1772 = vmatmul.mubr.msk.bf16.gmra.mrb[52].mxu0 %vm615_vm0, %v1911_v61 }
  0xf5   : > { %v1721_v63 = vpop.f32.mrb[0].mxu0  ;;  %v1777_v0 = vpop.f32.mrb[0].mxu1 }
  0xf6   : > { %v825_v1 = vadd.f32 %v1721_v63, %v2088_v62  ;;  %v816_v2 = vpop.f32.mrb[1].mxu0  ;;  %v1049_v3 = vadd.f32 %v1777_v0, %v2088_v62  ;;  %v1040_v4 = vpop.f32.mrb[1].mxu1 }
  0xf7   : > { %v817_v5 = vadd.f32 %v2088_v62, %v816_v2  ;;  %v1722_v6 = vpop.f32.mrb[2].mxu0  ;;  %v1041_v7 = vadd.f32 %v2088_v62, %v1040_v4  ;;  %v1778_v8 = vpop.f32.mrb[2].mxu1 }
  0xf8   : > { %v1249_v9 = vmax.f32 %v825_v1, 0.0  ;;  %v828_v10 = vadd.f32 %v1722_v6, %v2088_v62  ;;  %v819_v11 = vpop.f32.mrb[3].mxu0  ;;  %v1305_v12 = vmax.f32 %v1049_v3, 0.0  ;;  %v1052_v13 = vadd.f32 %v1778_v8, %v2088_v62  ;;  %v1043_v14 = vpop.f32.mrb[3].mxu1 }
  0xf9   : > { %v1247_v15 = vmax.f32 %v817_v5, 0.0  ;;  %v820_v16 = vadd.f32 %v2088_v62, %v819_v11  ;;  %v1303_v17 = vmax.f32 %v1041_v7, 0.0  ;;  %v1044_v18 = vadd.f32 %v2088_v62, %v1043_v14 }
  0xfa   : > { %1357 = vst [vmem:[%s2096_s11 + $0x10] sm:$0xff] %v1249_v9  ;;  %v1250_v19 = vmax.f32 %v828_v10, 0.0  ;;  %1413 = vst [vmem:[%s2096_s11 + $0x1d0] sm:$0xff] %v1305_v12  ;;  %v1306_v20 = vmax.f32 %v1052_v13, 0.0 }
  0xfb   : > { %1355 = vst [vmem:[%s2096_s11] sm:$0xff] %v1247_v15  ;;  %v1248_v21 = vmax.f32 %v820_v16, 0.0  ;;  %1411 = vst [vmem:[%s2096_s11 + $0x1c0] sm:$0xff] %v1303_v17  ;;  %v1304_v22 = vmax.f32 %v1044_v18, 0.0 }
  0xfc   : > { %1358 = vst [vmem:[%s2096_s11 + $0x18] sm:$0xff] %v1250_v19  ;;  %1414 = vst [vmem:[%s2096_s11 + $0x1d8] sm:$0xff] %v1306_v20 }
  0xfd   : > { %1356 = vst [vmem:[%s2096_s11 + $0x8] sm:$0xff] %v1248_v21  ;;  %v1725_v23 = vpop.f32.mrb[4].mxu0  ;;  %1412 = vst [vmem:[%s2096_s11 + $0x1c8] sm:$0xff] %v1304_v22  ;;  %v1781_v24 = vpop.f32.mrb[4].mxu1 }
  0xfe   : > { %v841_v25 = vadd.f32 %v1725_v23, %v2088_v62  ;;  %v832_v26 = vpop.f32.mrb[5].mxu0  ;;  %v1065_v27 = vadd.f32 %v1781_v24, %v2088_v62  ;;  %v1056_v28 = vpop.f32.mrb[5].mxu1 }
  0xff   : > { %v833_v29 = vadd.f32 %v2088_v62, %v832_v26  ;;  %v1726_v30 = vpop.f32.mrb[6].mxu0  ;;  %v1057_v31 = vadd.f32 %v2088_v62, %v1056_v28  ;;  %v1782_v32 = vpop.f32.mrb[6].mxu1 }
 0x100   : > { %v1253_v33 = vmax.f32 %v841_v25, 0.0  ;;  %v844_v34 = vadd.f32 %v1726_v30, %v2088_v62  ;;  %v835_v35 = vpop.f32.mrb[7].mxu0  ;;  %v1309_v36 = vmax.f32 %v1065_v27, 0.0  ;;  %v1068_v37 = vadd.f32 %v1782_v32, %v2088_v62  ;;  %v1059_v38 = vpop.f32.mrb[7].mxu1 }
 0x101   : > { %v1251_v39 = vmax.f32 %v833_v29, 0.0  ;;  %v836_v40 = vadd.f32 %v2088_v62, %v835_v35  ;;  %v1307_v41 = vmax.f32 %v1057_v31, 0.0  ;;  %v1060_v42 = vadd.f32 %v2088_v62, %v1059_v38 }
 0x102   : > { %1361 = vst [vmem:[%s2096_s11 + $0x30] sm:$0xff] %v1253_v33  ;;  %v1254_v43 = vmax.f32 %v844_v34, 0.0  ;;  %1417 = vst [vmem:[%s2096_s11 + $0x1f0] sm:$0xff] %v1309_v36  ;;  %v1310_v44 = vmax.f32 %v1068_v37, 0.0 }
 0x103   : > { %1359 = vst [vmem:[%s2096_s11 + $0x20] sm:$0xff] %v1251_v39  ;;  %v1252_v45 = vmax.f32 %v836_v40, 0.0  ;;  %1415 = vst [vmem:[%s2096_s11 + $0x1e0] sm:$0xff] %v1307_v41  ;;  %v1308_v46 = vmax.f32 %v1060_v42, 0.0 }
 0x104   : > { %1362 = vst [vmem:[%s2096_s11 + $0x38] sm:$0xff] %v1254_v43  ;;  %1418 = vst [vmem:[%s2096_s11 + $0x1f8] sm:$0xff] %v1310_v44 }
 0x105   : > { %1360 = vst [vmem:[%s2096_s11 + $0x28] sm:$0xff] %v1252_v45  ;;  %v1729_v47 = vpop.f32.mrb[8].mxu0  ;;  %1416 = vst [vmem:[%s2096_s11 + $0x1e8] sm:$0xff] %v1308_v46  ;;  %v1785_v48 = vpop.f32.mrb[8].mxu1 }
 0x106   : > { %v857_v49 = vadd.f32 %v1729_v47, %v2088_v62  ;;  %v848_v50 = vpop.f32.mrb[9].mxu0  ;;  %v1081_v51 = vadd.f32 %v1785_v48, %v2088_v62  ;;  %v1072_v52 = vpop.f32.mrb[9].mxu1 }
 0x107   : > { %v849_v53 = vadd.f32 %v2088_v62, %v848_v50  ;;  %v1730_v54 = vpop.f32.mrb[10].mxu0  ;;  %v1073_v55 = vadd.f32 %v2088_v62, %v1072_v52  ;;  %v1786_v56 = vpop.f32.mrb[10].mxu1 }
 0x108   : > { %v1257_v57 = vmax.f32 %v857_v49, 0.0  ;;  %v860_v58 = vadd.f32 %v1730_v54, %v2088_v62  ;;  %v851_v59 = vpop.f32.mrb[11].mxu0  ;;  %v1313_v60 = vmax.f32 %v1081_v51, 0.0  ;;  %v1084_v61 = vadd.f32 %v1786_v56, %v2088_v62  ;;  %v1075_v63 = vpop.f32.mrb[11].mxu1 }
 0x109   : > { %v1255_v0 = vmax.f32 %v849_v53, 0.0  ;;  %v852_v1 = vadd.f32 %v2088_v62, %v851_v59  ;;  %v1311_v2 = vmax.f32 %v1073_v55, 0.0  ;;  %v1076_v3 = vadd.f32 %v2088_v62, %v1075_v63 }
 0x10a   : > { %1365 = vst [vmem:[%s2096_s11 + $0x50] sm:$0xff] %v1257_v57  ;;  %v1258_v4 = vmax.f32 %v860_v58, 0.0  ;;  %1421 = vst [vmem:[%s2096_s11 + $0x210] sm:$0xff] %v1313_v60  ;;  %v1314_v5 = vmax.f32 %v1084_v61, 0.0 }
 0x10b   : > { %1363 = vst [vmem:[%s2096_s11 + $0x40] sm:$0xff] %v1255_v0  ;;  %v1256_v6 = vmax.f32 %v852_v1, 0.0  ;;  %1419 = vst [vmem:[%s2096_s11 + $0x200] sm:$0xff] %v1311_v2  ;;  %v1312_v7 = vmax.f32 %v1076_v3, 0.0 }
 0x10c   : > { %1366 = vst [vmem:[%s2096_s11 + $0x58] sm:$0xff] %v1258_v4  ;;  %1422 = vst [vmem:[%s2096_s11 + $0x218] sm:$0xff] %v1314_v5 }
 0x10d   : > { %1364 = vst [vmem:[%s2096_s11 + $0x48] sm:$0xff] %v1256_v6  ;;  %v1733_v8 = vpop.f32.mrb[12].mxu0  ;;  %1420 = vst [vmem:[%s2096_s11 + $0x208] sm:$0xff] %v1312_v7  ;;  %v1789_v9 = vpop.f32.mrb[12].mxu1 }
 0x10e   : > { %v873_v10 = vadd.f32 %v1733_v8, %v2088_v62  ;;  %v864_v11 = vpop.f32.mrb[13].mxu0  ;;  %v1097_v12 = vadd.f32 %v1789_v9, %v2088_v62  ;;  %v1088_v13 = vpop.f32.mrb[13].mxu1 }
 0x10f   : > { %v865_v14 = vadd.f32 %v2088_v62, %v864_v11  ;;  %v1734_v15 = vpop.f32.mrb[14].mxu0  ;;  %v1089_v16 = vadd.f32 %v2088_v62, %v1088_v13  ;;  %v1790_v17 = vpop.f32.mrb[14].mxu1 }
 0x110   : > { %v1261_v18 = vmax.f32 %v873_v10, 0.0  ;;  %v876_v19 = vadd.f32 %v1734_v15, %v2088_v62  ;;  %v867_v20 = vpop.f32.mrb[15].mxu0  ;;  %v1317_v21 = vmax.f32 %v1097_v12, 0.0  ;;  %v1100_v22 = vadd.f32 %v1790_v17, %v2088_v62  ;;  %v1091_v23 = vpop.f32.mrb[15].mxu1 }
 0x111   : > { %v1259_v24 = vmax.f32 %v865_v14, 0.0  ;;  %v868_v25 = vadd.f32 %v2088_v62, %v867_v20  ;;  %v1315_v26 = vmax.f32 %v1089_v16, 0.0  ;;  %v1092_v27 = vadd.f32 %v2088_v62, %v1091_v23 }
 0x112   : > { %1369 = vst [vmem:[%s2096_s11 + $0x70] sm:$0xff] %v1261_v18  ;;  %v1262_v28 = vmax.f32 %v876_v19, 0.0  ;;  %1425 = vst [vmem:[%s2096_s11 + $0x230] sm:$0xff] %v1317_v21  ;;  %v1318_v29 = vmax.f32 %v1100_v22, 0.0 }
 0x113   : > { %1367 = vst [vmem:[%s2096_s11 + $0x60] sm:$0xff] %v1259_v24  ;;  %v1260_v30 = vmax.f32 %v868_v25, 0.0  ;;  %1423 = vst [vmem:[%s2096_s11 + $0x220] sm:$0xff] %v1315_v26  ;;  %v1316_v31 = vmax.f32 %v1092_v27, 0.0 }
 0x114   : > { %1370 = vst [vmem:[%s2096_s11 + $0x78] sm:$0xff] %v1262_v28  ;;  %1426 = vst [vmem:[%s2096_s11 + $0x238] sm:$0xff] %v1318_v29 }
 0x115   : > { %1368 = vst [vmem:[%s2096_s11 + $0x68] sm:$0xff] %v1260_v30  ;;  %v1737_v32 = vpop.f32.mrb[16].mxu0  ;;  %1424 = vst [vmem:[%s2096_s11 + $0x228] sm:$0xff] %v1316_v31  ;;  %v1793_v33 = vpop.f32.mrb[16].mxu1 }
 0x116   : > { %v889_v34 = vadd.f32 %v1737_v32, %v2088_v62  ;;  %v880_v35 = vpop.f32.mrb[17].mxu0  ;;  %v1113_v36 = vadd.f32 %v1793_v33, %v2088_v62  ;;  %v1104_v37 = vpop.f32.mrb[17].mxu1 }
 0x117   : > { %v881_v38 = vadd.f32 %v2088_v62, %v880_v35  ;;  %v1738_v39 = vpop.f32.mrb[18].mxu0  ;;  %v1105_v40 = vadd.f32 %v2088_v62, %v1104_v37  ;;  %v1794_v41 = vpop.f32.mrb[18].mxu1 }
 0x118   : > { %v1265_v42 = vmax.f32 %v889_v34, 0.0  ;;  %v892_v43 = vadd.f32 %v1738_v39, %v2088_v62  ;;  %v883_v44 = vpop.f32.mrb[19].mxu0  ;;  %v1321_v45 = vmax.f32 %v1113_v36, 0.0  ;;  %v1116_v46 = vadd.f32 %v1794_v41, %v2088_v62  ;;  %v1107_v47 = vpop.f32.mrb[19].mxu1 }
 0x119   : > { %v1263_v48 = vmax.f32 %v881_v38, 0.0  ;;  %v884_v49 = vadd.f32 %v2088_v62, %v883_v44  ;;  %v1319_v50 = vmax.f32 %v1105_v40, 0.0  ;;  %v1108_v51 = vadd.f32 %v2088_v62, %v1107_v47 }
 0x11a   : > { %1373 = vst [vmem:[%s2096_s11 + $0x90] sm:$0xff] %v1265_v42  ;;  %v1266_v52 = vmax.f32 %v892_v43, 0.0  ;;  %1429 = vst [vmem:[%s2096_s11 + $0x250] sm:$0xff] %v1321_v45  ;;  %v1322_v53 = vmax.f32 %v1116_v46, 0.0 }
 0x11b   : > { %1371 = vst [vmem:[%s2096_s11 + $0x80] sm:$0xff] %v1263_v48  ;;  %v1264_v54 = vmax.f32 %v884_v49, 0.0  ;;  %1427 = vst [vmem:[%s2096_s11 + $0x240] sm:$0xff] %v1319_v50  ;;  %v1320_v55 = vmax.f32 %v1108_v51, 0.0 }
 0x11c   : > { %1374 = vst [vmem:[%s2096_s11 + $0x98] sm:$0xff] %v1266_v52  ;;  %1430 = vst [vmem:[%s2096_s11 + $0x258] sm:$0xff] %v1322_v53 }
 0x11d   : > { %1372 = vst [vmem:[%s2096_s11 + $0x88] sm:$0xff] %v1264_v54  ;;  %v1741_v56 = vpop.f32.mrb[20].mxu0  ;;  %1428 = vst [vmem:[%s2096_s11 + $0x248] sm:$0xff] %v1320_v55  ;;  %v1797_v57 = vpop.f32.mrb[20].mxu1 }
 0x11e   : > { %v905_v58 = vadd.f32 %v1741_v56, %v2088_v62  ;;  %v896_v59 = vpop.f32.mrb[21].mxu0  ;;  %v1129_v60 = vadd.f32 %v1797_v57, %v2088_v62  ;;  %v1120_v61 = vpop.f32.mrb[21].mxu1 }
 0x11f   : > { %v897_v63 = vadd.f32 %v2088_v62, %v896_v59  ;;  %v1742_v0 = vpop.f32.mrb[22].mxu0  ;;  %v1121_v1 = vadd.f32 %v2088_v62, %v1120_v61  ;;  %v1798_v2 = vpop.f32.mrb[22].mxu1 }
 0x120   : > { %v1269_v3 = vmax.f32 %v905_v58, 0.0  ;;  %v908_v4 = vadd.f32 %v1742_v0, %v2088_v62  ;;  %v899_v5 = vpop.f32.mrb[23].mxu0  ;;  %v1325_v6 = vmax.f32 %v1129_v60, 0.0  ;;  %v1132_v7 = vadd.f32 %v1798_v2, %v2088_v62  ;;  %v1123_v8 = vpop.f32.mrb[23].mxu1 }
 0x121   : > { %v1267_v9 = vmax.f32 %v897_v63, 0.0  ;;  %v900_v10 = vadd.f32 %v2088_v62, %v899_v5  ;;  %v1323_v11 = vmax.f32 %v1121_v1, 0.0  ;;  %v1124_v12 = vadd.f32 %v2088_v62, %v1123_v8 }
 0x122   : > { %1377 = vst [vmem:[%s2096_s11 + $0xb0] sm:$0xff] %v1269_v3  ;;  %v1270_v13 = vmax.f32 %v908_v4, 0.0  ;;  %1433 = vst [vmem:[%s2096_s11 + $0x270] sm:$0xff] %v1325_v6  ;;  %v1326_v14 = vmax.f32 %v1132_v7, 0.0 }
 0x123   : > { %1375 = vst [vmem:[%s2096_s11 + $0xa0] sm:$0xff] %v1267_v9  ;;  %v1268_v15 = vmax.f32 %v900_v10, 0.0  ;;  %1431 = vst [vmem:[%s2096_s11 + $0x260] sm:$0xff] %v1323_v11  ;;  %v1324_v16 = vmax.f32 %v1124_v12, 0.0 }
 0x124   : > { %1378 = vst [vmem:[%s2096_s11 + $0xb8] sm:$0xff] %v1270_v13  ;;  %1434 = vst [vmem:[%s2096_s11 + $0x278] sm:$0xff] %v1326_v14 }
 0x125   : > { %1376 = vst [vmem:[%s2096_s11 + $0xa8] sm:$0xff] %v1268_v15  ;;  %v1745_v17 = vpop.f32.mrb[24].mxu0  ;;  %1432 = vst [vmem:[%s2096_s11 + $0x268] sm:$0xff] %v1324_v16  ;;  %v1801_v18 = vpop.f32.mrb[24].mxu1 }
 0x126   : > { %v921_v19 = vadd.f32 %v1745_v17, %v2088_v62  ;;  %v912_v20 = vpop.f32.mrb[25].mxu0  ;;  %v1145_v21 = vadd.f32 %v1801_v18, %v2088_v62  ;;  %v1136_v22 = vpop.f32.mrb[25].mxu1 }
 0x127   : > { %v913_v23 = vadd.f32 %v2088_v62, %v912_v20  ;;  %v1746_v24 = vpop.f32.mrb[26].mxu0  ;;  %v1137_v25 = vadd.f32 %v2088_v62, %v1136_v22  ;;  %v1802_v26 = vpop.f32.mrb[26].mxu1 }
 0x128   : > { %v1273_v27 = vmax.f32 %v921_v19, 0.0  ;;  %v924_v28 = vadd.f32 %v1746_v24, %v2088_v62  ;;  %v915_v29 = vpop.f32.mrb[27].mxu0  ;;  %v1329_v30 = vmax.f32 %v1145_v21, 0.0  ;;  %v1148_v31 = vadd.f32 %v1802_v26, %v2088_v62  ;;  %v1139_v32 = vpop.f32.mrb[27].mxu1 }
 0x129   : > { %v1271_v33 = vmax.f32 %v913_v23, 0.0  ;;  %v916_v34 = vadd.f32 %v2088_v62, %v915_v29  ;;  %v1327_v35 = vmax.f32 %v1137_v25, 0.0  ;;  %v1140_v36 = vadd.f32 %v2088_v62, %v1139_v32 }
 0x12a   : > { %1381 = vst [vmem:[%s2096_s11 + $0xd0] sm:$0xff] %v1273_v27  ;;  %v1274_v37 = vmax.f32 %v924_v28, 0.0  ;;  %1437 = vst [vmem:[%s2096_s11 + $0x290] sm:$0xff] %v1329_v30  ;;  %v1330_v38 = vmax.f32 %v1148_v31, 0.0 }
 0x12b   : > { %1379 = vst [vmem:[%s2096_s11 + $0xc0] sm:$0xff] %v1271_v33  ;;  %v1272_v39 = vmax.f32 %v916_v34, 0.0  ;;  %1435 = vst [vmem:[%s2096_s11 + $0x280] sm:$0xff] %v1327_v35  ;;  %v1328_v40 = vmax.f32 %v1140_v36, 0.0 }
 0x12c   : > { %1382 = vst [vmem:[%s2096_s11 + $0xd8] sm:$0xff] %v1274_v37  ;;  %1438 = vst [vmem:[%s2096_s11 + $0x298] sm:$0xff] %v1330_v38 }
 0x12d   : > { %1380 = vst [vmem:[%s2096_s11 + $0xc8] sm:$0xff] %v1272_v39  ;;  %v1749_v41 = vpop.f32.mrb[28].mxu0  ;;  %1436 = vst [vmem:[%s2096_s11 + $0x288] sm:$0xff] %v1328_v40  ;;  %v1805_v42 = vpop.f32.mrb[28].mxu1 }
 0x12e   : > { %v937_v43 = vadd.f32 %v1749_v41, %v2088_v62  ;;  %v928_v44 = vpop.f32.mrb[29].mxu0  ;;  %v1161_v45 = vadd.f32 %v1805_v42, %v2088_v62  ;;  %v1152_v46 = vpop.f32.mrb[29].mxu1 }
 0x12f   : > { %v929_v47 = vadd.f32 %v2088_v62, %v928_v44  ;;  %v1750_v48 = vpop.f32.mrb[30].mxu0  ;;  %v1153_v49 = vadd.f32 %v2088_v62, %v1152_v46  ;;  %v1806_v50 = vpop.f32.mrb[30].mxu1 }
 0x130   : > { %v1277_v51 = vmax.f32 %v937_v43, 0.0  ;;  %v940_v52 = vadd.f32 %v1750_v48, %v2088_v62  ;;  %v931_v53 = vpop.f32.mrb[31].mxu0  ;;  %v1333_v54 = vmax.f32 %v1161_v45, 0.0  ;;  %v1164_v55 = vadd.f32 %v1806_v50, %v2088_v62  ;;  %v1155_v56 = vpop.f32.mrb[31].mxu1 }
 0x131   : > { %v1275_v57 = vmax.f32 %v929_v47, 0.0  ;;  %v932_v58 = vadd.f32 %v2088_v62, %v931_v53  ;;  %v1331_v59 = vmax.f32 %v1153_v49, 0.0  ;;  %v1156_v60 = vadd.f32 %v2088_v62, %v1155_v56 }
 0x132   : > { %1385 = vst [vmem:[%s2096_s11 + $0xf0] sm:$0xff] %v1277_v51  ;;  %v1278_v61 = vmax.f32 %v940_v52, 0.0  ;;  %1441 = vst [vmem:[%s2096_s11 + $0x2b0] sm:$0xff] %v1333_v54  ;;  %v1334_v63 = vmax.f32 %v1164_v55, 0.0 }
 0x133   : > { %1383 = vst [vmem:[%s2096_s11 + $0xe0] sm:$0xff] %v1275_v57  ;;  %v1276_v0 = vmax.f32 %v932_v58, 0.0  ;;  %1439 = vst [vmem:[%s2096_s11 + $0x2a0] sm:$0xff] %v1331_v59  ;;  %v1332_v1 = vmax.f32 %v1156_v60, 0.0 }
 0x134   : > { %1386 = vst [vmem:[%s2096_s11 + $0xf8] sm:$0xff] %v1278_v61  ;;  %1442 = vst [vmem:[%s2096_s11 + $0x2b8] sm:$0xff] %v1334_v63 }
 0x135   : > { %1384 = vst [vmem:[%s2096_s11 + $0xe8] sm:$0xff] %v1276_v0  ;;  %v1753_v2 = vpop.f32.mrb[32].mxu0  ;;  %1440 = vst [vmem:[%s2096_s11 + $0x2a8] sm:$0xff] %v1332_v1  ;;  %v1809_v3 = vpop.f32.mrb[32].mxu1 }
 0x136   : > { %v953_v4 = vadd.f32 %v1753_v2, %v2088_v62  ;;  %v944_v5 = vpop.f32.mrb[33].mxu0  ;;  %v1177_v6 = vadd.f32 %v1809_v3, %v2088_v62  ;;  %v1168_v7 = vpop.f32.mrb[33].mxu1 }
 0x137   : > { %v945_v8 = vadd.f32 %v2088_v62, %v944_v5  ;;  %v1754_v9 = vpop.f32.mrb[34].mxu0  ;;  %v1169_v10 = vadd.f32 %v2088_v62, %v1168_v7  ;;  %v1810_v11 = vpop.f32.mrb[34].mxu1 }
 0x138   : > { %v1281_v12 = vmax.f32 %v953_v4, 0.0  ;;  %v956_v13 = vadd.f32 %v1754_v9, %v2088_v62  ;;  %v947_v14 = vpop.f32.mrb[35].mxu0  ;;  %v1337_v15 = vmax.f32 %v1177_v6, 0.0  ;;  %v1180_v16 = vadd.f32 %v1810_v11, %v2088_v62  ;;  %v1171_v17 = vpop.f32.mrb[35].mxu1 }
 0x139   : > { %v1279_v18 = vmax.f32 %v945_v8, 0.0  ;;  %v948_v19 = vadd.f32 %v2088_v62, %v947_v14  ;;  %v1335_v20 = vmax.f32 %v1169_v10, 0.0  ;;  %v1172_v21 = vadd.f32 %v2088_v62, %v1171_v17 }
 0x13a   : > { %1389 = vst [vmem:[%s2096_s11 + $0x110] sm:$0xff] %v1281_v12  ;;  %v1282_v22 = vmax.f32 %v956_v13, 0.0  ;;  %1445 = vst [vmem:[%s2096_s11 + $0x2d0] sm:$0xff] %v1337_v15  ;;  %v1338_v23 = vmax.f32 %v1180_v16, 0.0 }
 0x13b   : > { %1387 = vst [vmem:[%s2096_s11 + $0x100] sm:$0xff] %v1279_v18  ;;  %v1280_v24 = vmax.f32 %v948_v19, 0.0  ;;  %1443 = vst [vmem:[%s2096_s11 + $0x2c0] sm:$0xff] %v1335_v20  ;;  %v1336_v25 = vmax.f32 %v1172_v21, 0.0 }
 0x13c   : > { %1390 = vst [vmem:[%s2096_s11 + $0x118] sm:$0xff] %v1282_v22  ;;  %1446 = vst [vmem:[%s2096_s11 + $0x2d8] sm:$0xff] %v1338_v23 }
 0x13d   : > { %1388 = vst [vmem:[%s2096_s11 + $0x108] sm:$0xff] %v1280_v24  ;;  %v1757_v26 = vpop.f32.mrb[36].mxu0  ;;  %1444 = vst [vmem:[%s2096_s11 + $0x2c8] sm:$0xff] %v1336_v25  ;;  %v1813_v27 = vpop.f32.mrb[36].mxu1 }
 0x13e   : > { %v969_v28 = vadd.f32 %v1757_v26, %v2088_v62  ;;  %v960_v29 = vpop.f32.mrb[37].mxu0  ;;  %v1193_v30 = vadd.f32 %v1813_v27, %v2088_v62  ;;  %v1184_v31 = vpop.f32.mrb[37].mxu1 }
 0x13f   : > { %v961_v32 = vadd.f32 %v2088_v62, %v960_v29  ;;  %v1758_v33 = vpop.f32.mrb[38].mxu0  ;;  %v1185_v34 = vadd.f32 %v2088_v62, %v1184_v31  ;;  %v1814_v35 = vpop.f32.mrb[38].mxu1 }
 0x140   : > { %v1285_v36 = vmax.f32 %v969_v28, 0.0  ;;  %v972_v37 = vadd.f32 %v1758_v33, %v2088_v62  ;;  %v963_v38 = vpop.f32.mrb[39].mxu0  ;;  %v1341_v39 = vmax.f32 %v1193_v30, 0.0  ;;  %v1196_v40 = vadd.f32 %v1814_v35, %v2088_v62  ;;  %v1187_v41 = vpop.f32.mrb[39].mxu1 }
 0x141   : > { %v1283_v42 = vmax.f32 %v961_v32, 0.0  ;;  %v964_v43 = vadd.f32 %v2088_v62, %v963_v38  ;;  %v1339_v44 = vmax.f32 %v1185_v34, 0.0  ;;  %v1188_v45 = vadd.f32 %v2088_v62, %v1187_v41 }
 0x142   : > { %1393 = vst [vmem:[%s2096_s11 + $0x130] sm:$0xff] %v1285_v36  ;;  %v1286_v46 = vmax.f32 %v972_v37, 0.0  ;;  %1449 = vst [vmem:[%s2096_s11 + $0x2f0] sm:$0xff] %v1341_v39  ;;  %v1342_v47 = vmax.f32 %v1196_v40, 0.0 }
 0x143   : > { %1391 = vst [vmem:[%s2096_s11 + $0x120] sm:$0xff] %v1283_v42  ;;  %v1284_v48 = vmax.f32 %v964_v43, 0.0  ;;  %1447 = vst [vmem:[%s2096_s11 + $0x2e0] sm:$0xff] %v1339_v44  ;;  %v1340_v49 = vmax.f32 %v1188_v45, 0.0 }
 0x144   : > { %1394 = vst [vmem:[%s2096_s11 + $0x138] sm:$0xff] %v1286_v46  ;;  %1450 = vst [vmem:[%s2096_s11 + $0x2f8] sm:$0xff] %v1342_v47 }
 0x145   : > { %1392 = vst [vmem:[%s2096_s11 + $0x128] sm:$0xff] %v1284_v48  ;;  %v1761_v50 = vpop.f32.mrb[40].mxu0  ;;  %1448 = vst [vmem:[%s2096_s11 + $0x2e8] sm:$0xff] %v1340_v49  ;;  %v1817_v51 = vpop.f32.mrb[40].mxu1 }
 0x146   : > { %v985_v52 = vadd.f32 %v1761_v50, %v2088_v62  ;;  %v976_v53 = vpop.f32.mrb[41].mxu0  ;;  %v1209_v54 = vadd.f32 %v1817_v51, %v2088_v62  ;;  %v1200_v55 = vpop.f32.mrb[41].mxu1 }
 0x147   : > { %v977_v56 = vadd.f32 %v2088_v62, %v976_v53  ;;  %v1762_v57 = vpop.f32.mrb[42].mxu0  ;;  %v1201_v58 = vadd.f32 %v2088_v62, %v1200_v55  ;;  %v1818_v59 = vpop.f32.mrb[42].mxu1 }
 0x148   : > { %v1289_v60 = vmax.f32 %v985_v52, 0.0  ;;  %v988_v61 = vadd.f32 %v1762_v57, %v2088_v62  ;;  %v979_v63 = vpop.f32.mrb[43].mxu0  ;;  %v1345_v0 = vmax.f32 %v1209_v54, 0.0  ;;  %v1212_v1 = vadd.f32 %v1818_v59, %v2088_v62  ;;  %v1203_v2 = vpop.f32.mrb[43].mxu1 }
 0x149   : > { %v1287_v3 = vmax.f32 %v977_v56, 0.0  ;;  %v980_v4 = vadd.f32 %v2088_v62, %v979_v63  ;;  %v1343_v5 = vmax.f32 %v1201_v58, 0.0  ;;  %v1204_v6 = vadd.f32 %v2088_v62, %v1203_v2 }
 0x14a   : > { %1397 = vst [vmem:[%s2096_s11 + $0x150] sm:$0xff] %v1289_v60  ;;  %v1290_v7 = vmax.f32 %v988_v61, 0.0  ;;  %1453 = vst [vmem:[%s2096_s11 + $0x310] sm:$0xff] %v1345_v0  ;;  %v1346_v8 = vmax.f32 %v1212_v1, 0.0 }
 0x14b   : > { %1395 = vst [vmem:[%s2096_s11 + $0x140] sm:$0xff] %v1287_v3  ;;  %v1288_v9 = vmax.f32 %v980_v4, 0.0  ;;  %1451 = vst [vmem:[%s2096_s11 + $0x300] sm:$0xff] %v1343_v5  ;;  %v1344_v10 = vmax.f32 %v1204_v6, 0.0 }
 0x14c   : > { %1398 = vst [vmem:[%s2096_s11 + $0x158] sm:$0xff] %v1290_v7  ;;  %1454 = vst [vmem:[%s2096_s11 + $0x318] sm:$0xff] %v1346_v8 }
 0x14d   : > { %1396 = vst [vmem:[%s2096_s11 + $0x148] sm:$0xff] %v1288_v9  ;;  %v1765_v11 = vpop.f32.mrb[44].mxu0  ;;  %1452 = vst [vmem:[%s2096_s11 + $0x308] sm:$0xff] %v1344_v10  ;;  %v1821_v12 = vpop.f32.mrb[44].mxu1 }
 0x14e   : > { %v1001_v13 = vadd.f32 %v1765_v11, %v2088_v62  ;;  %v992_v14 = vpop.f32.mrb[45].mxu0  ;;  %v1225_v15 = vadd.f32 %v1821_v12, %v2088_v62  ;;  %v1216_v16 = vpop.f32.mrb[45].mxu1 }
 0x14f   : > { %v993_v17 = vadd.f32 %v2088_v62, %v992_v14  ;;  %v1766_v18 = vpop.f32.mrb[46].mxu0  ;;  %v1217_v19 = vadd.f32 %v2088_v62, %v1216_v16  ;;  %v1822_v20 = vpop.f32.mrb[46].mxu1 }
 0x150   : > { %v1293_v21 = vmax.f32 %v1001_v13, 0.0  ;;  %v1004_v22 = vadd.f32 %v1766_v18, %v2088_v62  ;;  %v995_v23 = vpop.f32.mrb[47].mxu0  ;;  %v1349_v24 = vmax.f32 %v1225_v15, 0.0  ;;  %v1228_v25 = vadd.f32 %v1822_v20, %v2088_v62  ;;  %v1219_v26 = vpop.f32.mrb[47].mxu1 }
 0x151   : > { %v1291_v27 = vmax.f32 %v993_v17, 0.0  ;;  %v996_v28 = vadd.f32 %v2088_v62, %v995_v23  ;;  %v1347_v29 = vmax.f32 %v1217_v19, 0.0  ;;  %v1220_v30 = vadd.f32 %v2088_v62, %v1219_v26 }
 0x152   : > { %1401 = vst [vmem:[%s2096_s11 + $0x170] sm:$0xff] %v1293_v21  ;;  %v1294_v31 = vmax.f32 %v1004_v22, 0.0  ;;  %1457 = vst [vmem:[%s2096_s11 + $0x330] sm:$0xff] %v1349_v24  ;;  %v1350_v32 = vmax.f32 %v1228_v25, 0.0 }
 0x153   : > { %1399 = vst [vmem:[%s2096_s11 + $0x160] sm:$0xff] %v1291_v27  ;;  %v1292_v33 = vmax.f32 %v996_v28, 0.0  ;;  %1455 = vst [vmem:[%s2096_s11 + $0x320] sm:$0xff] %v1347_v29  ;;  %v1348_v34 = vmax.f32 %v1220_v30, 0.0 }
 0x154   : > { %1402 = vst [vmem:[%s2096_s11 + $0x178] sm:$0xff] %v1294_v31  ;;  %1458 = vst [vmem:[%s2096_s11 + $0x338] sm:$0xff] %v1350_v32 }
 0x155   : > { %1400 = vst [vmem:[%s2096_s11 + $0x168] sm:$0xff] %v1292_v33  ;;  %v1769_v35 = vpop.f32.mrb[48].mxu0  ;;  %1456 = vst [vmem:[%s2096_s11 + $0x328] sm:$0xff] %v1348_v34  ;;  %v1825_v36 = vpop.f32.mrb[48].mxu1 }
 0x156   : > { %v1017_v37 = vadd.f32 %v1769_v35, %v2088_v62  ;;  %v1008_v38 = vpop.f32.mrb[49].mxu0  ;;  %v1241_v39 = vadd.f32 %v1825_v36, %v2088_v62  ;;  %v1232_v40 = vpop.f32.mrb[49].mxu1 }
 0x157   : > { %v1009_v41 = vadd.f32 %v2088_v62, %v1008_v38  ;;  %v1770_v42 = vpop.f32.mrb[50].mxu0  ;;  %v1233_v43 = vadd.f32 %v2088_v62, %v1232_v40  ;;  %v1826_v44 = vpop.f32.mrb[50].mxu1 }
 0x158   : > { %v1297_v45 = vmax.f32 %v1017_v37, 0.0  ;;  %v1020_v46 = vadd.f32 %v1770_v42, %v2088_v62  ;;  %v1011_v47 = vpop.f32.mrb[51].mxu0  ;;  %v1353_v48 = vmax.f32 %v1241_v39, 0.0  ;;  %v1244_v49 = vadd.f32 %v1826_v44, %v2088_v62  ;;  %v1235_v50 = vpop.f32.mrb[51].mxu1 }
 0x159   : > { %v1295_v51 = vmax.f32 %v1009_v41, 0.0  ;;  %v1012_v52 = vadd.f32 %v2088_v62, %v1011_v47  ;;  %v1351_v53 = vmax.f32 %v1233_v43, 0.0  ;;  %v1236_v54 = vadd.f32 %v2088_v62, %v1235_v50 }
 0x15a   : > { %1405 = vst [vmem:[%s2096_s11 + $0x190] sm:$0xff] %v1297_v45  ;;  %v1298_v55 = vmax.f32 %v1020_v46, 0.0  ;;  %1461 = vst [vmem:[%s2096_s11 + $0x350] sm:$0xff] %v1353_v48  ;;  %v1354_v56 = vmax.f32 %v1244_v49, 0.0 }
 0x15b   : > { %1403 = vst [vmem:[%s2096_s11 + $0x180] sm:$0xff] %v1295_v51  ;;  %v1296_v57 = vmax.f32 %v1012_v52, 0.0  ;;  %1459 = vst [vmem:[%s2096_s11 + $0x340] sm:$0xff] %v1351_v53  ;;  %v1352_v58 = vmax.f32 %v1236_v54, 0.0 }
 0x15c   : > { %1406 = vst [vmem:[%s2096_s11 + $0x198] sm:$0xff] %v1298_v55  ;;  %1462 = vst [vmem:[%s2096_s11 + $0x358] sm:$0xff] %v1354_v56 }
 0x15d   : > { %1404 = vst [vmem:[%s2096_s11 + $0x188] sm:$0xff] %v1296_v57  ;;  %v1773_v59 = vpop.f32.mrb[52].mxu0  ;;  %1460 = vst [vmem:[%s2096_s11 + $0x348] sm:$0xff] %v1352_v58 }
 0x15e   : > { %v1033_v60 = vadd.f32 %v1773_v59, %v2088_v62  ;;  %v1024_v61 = vpop.f32.mrb[53].mxu0 }
 0x15f   : > { %v1025_v63 = vadd.f32 %v2088_v62, %v1024_v61  ;;  %v1774_v0 = vpop.f32.mrb[54].mxu0 }
 0x160   : > { %v1301_v1 = vmax.f32 %v1033_v60, 0.0  ;;  %v1036_v2 = vadd.f32 %v1774_v0, %v2088_v62  ;;  %v1027_v3 = vpop.f32.mrb[55].mxu0 }
 0x161   : > { %v1299_v4 = vmax.f32 %v1025_v63, 0.0  ;;  %v1028_v5 = vadd.f32 %v2088_v62, %v1027_v3 }
 0x162   : > { %1409 = vst [vmem:[%s2096_s11 + $0x1b0] sm:$0xff] %v1301_v1  ;;  %v1302_v6 = vmax.f32 %v1036_v2, 0.0 }
 0x163   : > { %1407 = vst [vmem:[%s2096_s11 + $0x1a0] sm:$0xff] %v1299_v4  ;;  %v1300_v7 = vmax.f32 %v1028_v5, 0.0 }
 0x164   : > { %1410 = vst [vmem:[%s2096_s11 + $0x1b8] sm:$0xff] %v1302_v6 }
 0x165   : > { %1408 = vst [vmem:[%s2096_s11 + $0x1a8] sm:$0xff] %v1300_v7 }
 0x166 PF: > { %s13_s12 = sadd.s32 1, %s1918_s12  }
 0x167   : > { %p10_p4 = scmp.ge.s32.totalorder %s13_s12, 5  }
 0x169   :  { %12 = sbr.rel (!%p10_p4) target bundleno = 1 (0x1), region = 62 }

// kernel: cnn_forward.6
= control target key start
LH: loop header
LB: loop body
LE: loop exit
PB: predicated region body
PF: predicated region fallthrough
CT: control target
= control target key end

     0   :  { %s1909_s0 = inlined_call_operand.vmem [shape: f32[72,1152], index: 0, kind: input, shape index: {}]   ;;  %s1910_s1 = inlined_call_operand.vmem [shape: f32[72,1152], index: 1, kind: input, shape index: {}]   ;;  %s1911_s2 = inlined_call_operand.vmem [shape: f32[72,1152], index: 2, kind: input, shape index: {}]   ;;  %s1912_s3 = inlined_call_operand.vmem [shape: f32[72,1152], index: 3, kind: input, shape index: {}]   ;;  %s1913_s4 = inlined_call_operand.vmem [shape: f32[72,1152], index: 4, kind: output, shape index: {}]  }
   0x1   :  { %v17_v0 = vld [vmem:[%s1909_s0] sm:$0xff]  ;;  %v18_v5 = vld [vmem:[%s1909_s0 + $0x8] sm:$0xff]  ;;  %v19_v11 = vld [vmem:[%s1909_s0 + $0x10] sm:$0xff] }
   0x2   :  { %v98_v1 = vld [vmem:[%s1910_s1] sm:$0xff]  ;;  %v99_v6 = vld [vmem:[%s1910_s1 + $0x8] sm:$0xff]  ;;  %v100_v13 = vld [vmem:[%s1910_s1 + $0x10] sm:$0xff] }
   0x3   :  { %v260_v2 = vld [vmem:[%s1911_s2] sm:$0xff]  ;;  %v179_v3 = vmax.f32 %v17_v0, %v98_v1  ;;  %v180_v8 = vmax.f32 %v18_v5, %v99_v6  ;;  %v261_v9 = vld [vmem:[%s1911_s2 + $0x8] sm:$0xff]  ;;  %v262_v14 = vld [vmem:[%s1911_s2 + $0x10] sm:$0xff]  ;;  %v181_v17 = vmax.f32 %v19_v11, %v100_v13 }
   0x4   :  { %v341_v4 = vld [vmem:[%s1912_s3] sm:$0xff]  ;;  %v342_v10 = vld [vmem:[%s1912_s3 + $0x8] sm:$0xff]  ;;  %v343_v15 = vld [vmem:[%s1912_s3 + $0x10] sm:$0xff] }
   0x5   :  { %v422_v7 = vmax.f32 %v260_v2, %v341_v4  ;;  %v423_v12 = vmax.f32 %v261_v9, %v342_v10  ;;  %v424_v18 = vmax.f32 %v262_v14, %v343_v15  ;;  %v20_v19 = vld [vmem:[%s1909_s0 + $0x18] sm:$0xff]  ;;  %v21_v25 = vld [vmem:[%s1909_s0 + $0x20] sm:$0xff]  ;;  %v22_v32 = vld [vmem:[%s1909_s0 + $0x28] sm:$0xff] }
   0x6   :  { %v101_v20 = vld [vmem:[%s1910_s1 + $0x18] sm:$0xff]  ;;  %v102_v26 = vld [vmem:[%s1910_s1 + $0x20] sm:$0xff]  ;;  %v103_v34 = vld [vmem:[%s1910_s1 + $0x28] sm:$0xff] }
   0x7   :  { %v503_v16 = vmax.f32 %v179_v3, %v422_v7  ;;  %v263_v21 = vld [vmem:[%s1911_s2 + $0x18] sm:$0xff]  ;;  %v504_v22 = vmax.f32 %v180_v8, %v423_v12  ;;  %v182_v23 = vmax.f32 %v20_v19, %v101_v20  ;;  %v505_v27 = vmax.f32 %v181_v17, %v424_v18  ;;  %v264_v30 = vld [vmem:[%s1911_s2 + $0x20] sm:$0xff]  ;;  %v265_v35 = vld [vmem:[%s1911_s2 + $0x28] sm:$0xff] }
   0x8   :  { %v344_v24 = vld [vmem:[%s1912_s3 + $0x18] sm:$0xff]  ;;  %v183_v29 = vmax.f32 %v21_v25, %v102_v26  ;;  %v345_v31 = vld [vmem:[%s1912_s3 + $0x20] sm:$0xff]  ;;  %v346_v36 = vld [vmem:[%s1912_s3 + $0x28] sm:$0xff]  ;;  %v184_v38 = vmax.f32 %v22_v32, %v103_v34 }
   0x9   :  { %584 = vst [vmem:[%s1913_s4] sm:$0xff] %v503_v16  ;;  %v425_v28 = vmax.f32 %v263_v21, %v344_v24  ;;  %585 = vst [vmem:[%s1913_s4 + $0x8] sm:$0xff] %v504_v22  ;;  %v426_v33 = vmax.f32 %v264_v30, %v345_v31  ;;  %v427_v39 = vmax.f32 %v265_v35, %v346_v36  ;;  %v23_v40 = vld [vmem:[%s1909_s0 + $0x30] sm:$0xff]  ;;  %v24_v46 = vld [vmem:[%s1909_s0 + $0x38] sm:$0xff] }
   0xa   :  { %586 = vst [vmem:[%s1913_s4 + $0x10] sm:$0xff] %v505_v27  ;;  %v104_v41 = vld [vmem:[%s1910_s1 + $0x30] sm:$0xff]  ;;  %v105_v47 = vld [vmem:[%s1910_s1 + $0x38] sm:$0xff]  ;;  %v25_v53 = vld [vmem:[%s1909_s0 + $0x40] sm:$0xff] }
   0xb   :  { %v506_v37 = vmax.f32 %v182_v23, %v425_v28  ;;  %v266_v42 = vld [vmem:[%s1911_s2 + $0x30] sm:$0xff]  ;;  %v507_v43 = vmax.f32 %v183_v29, %v426_v33  ;;  %v185_v44 = vmax.f32 %v23_v40, %v104_v41  ;;  %v508_v48 = vmax.f32 %v184_v38, %v427_v39  ;;  %v267_v51 = vld [vmem:[%s1911_s2 + $0x38] sm:$0xff]  ;;  %v106_v55 = vld [vmem:[%s1910_s1 + $0x40] sm:$0xff] }
   0xc   :  { %v347_v45 = vld [vmem:[%s1912_s3 + $0x30] sm:$0xff]  ;;  %v186_v50 = vmax.f32 %v24_v46, %v105_v47  ;;  %v348_v52 = vld [vmem:[%s1912_s3 + $0x38] sm:$0xff]  ;;  %v268_v56 = vld [vmem:[%s1911_s2 + $0x40] sm:$0xff]  ;;  %v187_v59 = vmax.f32 %v25_v53, %v106_v55 }
   0xd   :  { %587 = vst [vmem:[%s1913_s4 + $0x18] sm:$0xff] %v506_v37  ;;  %v428_v49 = vmax.f32 %v266_v42, %v347_v45  ;;  %588 = vst [vmem:[%s1913_s4 + $0x20] sm:$0xff] %v507_v43  ;;  %v429_v54 = vmax.f32 %v267_v51, %v348_v52  ;;  %v349_v57 = vld [vmem:[%s1912_s3 + $0x40] sm:$0xff]  ;;  %v26_v61 = vld [vmem:[%s1909_s0 + $0x48] sm:$0xff] }
   0xe   :  { %589 = vst [vmem:[%s1913_s4 + $0x28] sm:$0xff] %v508_v48  ;;  %v430_v60 = vmax.f32 %v268_v56, %v349_v57  ;;  %v107_v62 = vld [vmem:[%s1910_s1 + $0x48] sm:$0xff]  ;;  %v27_v3 = vld [vmem:[%s1909_s0 + $0x50] sm:$0xff]  ;;  %v28_v10 = vld [vmem:[%s1909_s0 + $0x58] sm:$0xff] }
   0xf   :  { %v509_v58 = vmax.f32 %v185_v44, %v428_v49  ;;  %v269_v63 = vld [vmem:[%s1911_s2 + $0x48] sm:$0xff]  ;;  %v510_v0 = vmax.f32 %v186_v50, %v429_v54  ;;  %v188_v1 = vmax.f32 %v26_v61, %v107_v62  ;;  %v108_v4 = vld [vmem:[%s1910_s1 + $0x50] sm:$0xff]  ;;  %v109_v12 = vld [vmem:[%s1910_s1 + $0x58] sm:$0xff] }
  0x10   :  { %v350_v2 = vld [vmem:[%s1912_s3 + $0x48] sm:$0xff]  ;;  %v511_v5 = vmax.f32 %v187_v59, %v430_v60  ;;  %v189_v7 = vmax.f32 %v27_v3, %v108_v4  ;;  %v270_v8 = vld [vmem:[%s1911_s2 + $0x50] sm:$0xff]  ;;  %v271_v13 = vld [vmem:[%s1911_s2 + $0x58] sm:$0xff]  ;;  %v190_v16 = vmax.f32 %v28_v10, %v109_v12 }
  0x11   :  { %590 = vst [vmem:[%s1913_s4 + $0x30] sm:$0xff] %v509_v58  ;;  %v431_v6 = vmax.f32 %v269_v63, %v350_v2  ;;  %v351_v9 = vld [vmem:[%s1912_s3 + $0x50] sm:$0xff]  ;;  %591 = vst [vmem:[%s1913_s4 + $0x38] sm:$0xff] %v510_v0  ;;  %v352_v14 = vld [vmem:[%s1912_s3 + $0x58] sm:$0xff] }
  0x12   :  { %v432_v11 = vmax.f32 %v270_v8, %v351_v9  ;;  %592 = vst [vmem:[%s1913_s4 + $0x40] sm:$0xff] %v511_v5  ;;  %v433_v17 = vmax.f32 %v271_v13, %v352_v14  ;;  %v29_v18 = vld [vmem:[%s1909_s0 + $0x60] sm:$0xff]  ;;  %v30_v24 = vld [vmem:[%s1909_s0 + $0x68] sm:$0xff]  ;;  %v31_v31 = vld [vmem:[%s1909_s0 + $0x70] sm:$0xff] }
  0x13   :  { %v512_v15 = vmax.f32 %v188_v1, %v431_v6  ;;  %v110_v19 = vld [vmem:[%s1910_s1 + $0x60] sm:$0xff]  ;;  %v111_v25 = vld [vmem:[%s1910_s1 + $0x68] sm:$0xff]  ;;  %v112_v33 = vld [vmem:[%s1910_s1 + $0x70] sm:$0xff] }
  0x14   :  { %v272_v20 = vld [vmem:[%s1911_s2 + $0x60] sm:$0xff]  ;;  %v513_v21 = vmax.f32 %v189_v7, %v432_v11  ;;  %v191_v22 = vmax.f32 %v29_v18, %v110_v19  ;;  %v514_v26 = vmax.f32 %v190_v16, %v433_v17  ;;  %v192_v28 = vmax.f32 %v30_v24, %v111_v25  ;;  %v273_v29 = vld [vmem:[%s1911_s2 + $0x68] sm:$0xff]  ;;  %v274_v34 = vld [vmem:[%s1911_s2 + $0x70] sm:$0xff] }
  0x15   :  { %v353_v23 = vld [vmem:[%s1912_s3 + $0x60] sm:$0xff]  ;;  %593 = vst [vmem:[%s1913_s4 + $0x48] sm:$0xff] %v512_v15  ;;  %v354_v30 = vld [vmem:[%s1912_s3 + $0x68] sm:$0xff]  ;;  %v355_v35 = vld [vmem:[%s1912_s3 + $0x70] sm:$0xff]  ;;  %v193_v37 = vmax.f32 %v31_v31, %v112_v33 }
  0x16   :  { %v434_v27 = vmax.f32 %v272_v20, %v353_v23  ;;  %594 = vst [vmem:[%s1913_s4 + $0x50] sm:$0xff] %v513_v21  ;;  %v435_v32 = vmax.f32 %v273_v29, %v354_v30  ;;  %595 = vst [vmem:[%s1913_s4 + $0x58] sm:$0xff] %v514_v26  ;;  %v436_v38 = vmax.f32 %v274_v34, %v355_v35  ;;  %v32_v39 = vld [vmem:[%s1909_s0 + $0x78] sm:$0xff]  ;;  %v33_v45 = vld [vmem:[%s1909_s0 + $0x80] sm:$0xff] }
  0x17   :  { %v113_v40 = vld [vmem:[%s1910_s1 + $0x78] sm:$0xff]  ;;  %v114_v46 = vld [vmem:[%s1910_s1 + $0x80] sm:$0xff]  ;;  %v34_v52 = vld [vmem:[%s1909_s0 + $0x88] sm:$0xff] }
  0x18   :  { %v515_v36 = vmax.f32 %v191_v22, %v434_v27  ;;  %v275_v41 = vld [vmem:[%s1911_s2 + $0x78] sm:$0xff]  ;;  %v516_v42 = vmax.f32 %v192_v28, %v435_v32  ;;  %v194_v43 = vmax.f32 %v32_v39, %v113_v40  ;;  %v517_v47 = vmax.f32 %v193_v37, %v436_v38  ;;  %v276_v50 = vld [vmem:[%s1911_s2 + $0x80] sm:$0xff]  ;;  %v115_v54 = vld [vmem:[%s1910_s1 + $0x88] sm:$0xff] }
  0x19   :  { %v356_v44 = vld [vmem:[%s1912_s3 + $0x78] sm:$0xff]  ;;  %v195_v49 = vmax.f32 %v33_v45, %v114_v46  ;;  %v357_v51 = vld [vmem:[%s1912_s3 + $0x80] sm:$0xff]  ;;  %v277_v55 = vld [vmem:[%s1911_s2 + $0x88] sm:$0xff]  ;;  %v196_v58 = vmax.f32 %v34_v52, %v115_v54 }
  0x1a   :  { %596 = vst [vmem:[%s1913_s4 + $0x60] sm:$0xff] %v515_v36  ;;  %v437_v48 = vmax.f32 %v275_v41, %v356_v44  ;;  %597 = vst [vmem:[%s1913_s4 + $0x68] sm:$0xff] %v516_v42  ;;  %v438_v53 = vmax.f32 %v276_v50, %v357_v51  ;;  %v358_v56 = vld [vmem:[%s1912_s3 + $0x88] sm:$0xff]  ;;  %v35_v60 = vld [vmem:[%s1909_s0 + $0x90] sm:$0xff] }
  0x1b   :  { %598 = vst [vmem:[%s1913_s4 + $0x70] sm:$0xff] %v517_v47  ;;  %v439_v59 = vmax.f32 %v277_v55, %v358_v56  ;;  %v116_v61 = vld [vmem:[%s1910_s1 + $0x90] sm:$0xff]  ;;  %v36_v2 = vld [vmem:[%s1909_s0 + $0x98] sm:$0xff]  ;;  %v37_v9 = vld [vmem:[%s1909_s0 + $0xa0] sm:$0xff] }
  0x1c   :  { %v518_v57 = vmax.f32 %v194_v43, %v437_v48  ;;  %v278_v62 = vld [vmem:[%s1911_s2 + $0x90] sm:$0xff]  ;;  %v519_v63 = vmax.f32 %v195_v49, %v438_v53  ;;  %v197_v0 = vmax.f32 %v35_v60, %v116_v61  ;;  %v117_v3 = vld [vmem:[%s1910_s1 + $0x98] sm:$0xff]  ;;  %v118_v11 = vld [vmem:[%s1910_s1 + $0xa0] sm:$0xff] }
  0x1d   :  { %v359_v1 = vld [vmem:[%s1912_s3 + $0x90] sm:$0xff]  ;;  %v520_v4 = vmax.f32 %v196_v58, %v439_v59  ;;  %v198_v6 = vmax.f32 %v36_v2, %v117_v3  ;;  %v279_v7 = vld [vmem:[%s1911_s2 + $0x98] sm:$0xff]  ;;  %v280_v12 = vld [vmem:[%s1911_s2 + $0xa0] sm:$0xff]  ;;  %v199_v15 = vmax.f32 %v37_v9, %v118_v11 }
  0x1e   :  { %599 = vst [vmem:[%s1913_s4 + $0x78] sm:$0xff] %v518_v57  ;;  %v440_v5 = vmax.f32 %v278_v62, %v359_v1  ;;  %v360_v8 = vld [vmem:[%s1912_s3 + $0x98] sm:$0xff]  ;;  %600 = vst [vmem:[%s1913_s4 + $0x80] sm:$0xff] %v519_v63  ;;  %v361_v13 = vld [vmem:[%s1912_s3 + $0xa0] sm:$0xff] }
  0x1f   :  { %v441_v10 = vmax.f32 %v279_v7, %v360_v8  ;;  %601 = vst [vmem:[%s1913_s4 + $0x88] sm:$0xff] %v520_v4  ;;  %v442_v16 = vmax.f32 %v280_v12, %v361_v13  ;;  %v38_v17 = vld [vmem:[%s1909_s0 + $0xa8] sm:$0xff]  ;;  %v39_v23 = vld [vmem:[%s1909_s0 + $0xb0] sm:$0xff]  ;;  %v40_v30 = vld [vmem:[%s1909_s0 + $0xb8] sm:$0xff] }
  0x20   :  { %v521_v14 = vmax.f32 %v197_v0, %v440_v5  ;;  %v119_v18 = vld [vmem:[%s1910_s1 + $0xa8] sm:$0xff]  ;;  %v120_v24 = vld [vmem:[%s1910_s1 + $0xb0] sm:$0xff]  ;;  %v121_v32 = vld [vmem:[%s1910_s1 + $0xb8] sm:$0xff] }
  0x21   :  { %v281_v19 = vld [vmem:[%s1911_s2 + $0xa8] sm:$0xff]  ;;  %v522_v20 = vmax.f32 %v198_v6, %v441_v10  ;;  %v200_v21 = vmax.f32 %v38_v17, %v119_v18  ;;  %v523_v25 = vmax.f32 %v199_v15, %v442_v16  ;;  %v201_v27 = vmax.f32 %v39_v23, %v120_v24  ;;  %v282_v28 = vld [vmem:[%s1911_s2 + $0xb0] sm:$0xff]  ;;  %v283_v33 = vld [vmem:[%s1911_s2 + $0xb8] sm:$0xff] }
  0x22   :  { %v362_v22 = vld [vmem:[%s1912_s3 + $0xa8] sm:$0xff]  ;;  %602 = vst [vmem:[%s1913_s4 + $0x90] sm:$0xff] %v521_v14  ;;  %v363_v29 = vld [vmem:[%s1912_s3 + $0xb0] sm:$0xff]  ;;  %v364_v34 = vld [vmem:[%s1912_s3 + $0xb8] sm:$0xff]  ;;  %v202_v36 = vmax.f32 %v40_v30, %v121_v32 }
  0x23   :  { %v443_v26 = vmax.f32 %v281_v19, %v362_v22  ;;  %603 = vst [vmem:[%s1913_s4 + $0x98] sm:$0xff] %v522_v20  ;;  %v444_v31 = vmax.f32 %v282_v28, %v363_v29  ;;  %604 = vst [vmem:[%s1913_s4 + $0xa0] sm:$0xff] %v523_v25  ;;  %v445_v37 = vmax.f32 %v283_v33, %v364_v34  ;;  %v41_v38 = vld [vmem:[%s1909_s0 + $0xc0] sm:$0xff]  ;;  %v42_v44 = vld [vmem:[%s1909_s0 + $0xc8] sm:$0xff] }
  0x24   :  { %v122_v39 = vld [vmem:[%s1910_s1 + $0xc0] sm:$0xff]  ;;  %v123_v45 = vld [vmem:[%s1910_s1 + $0xc8] sm:$0xff]  ;;  %v43_v51 = vld [vmem:[%s1909_s0 + $0xd0] sm:$0xff] }
  0x25   :  { %v524_v35 = vmax.f32 %v200_v21, %v443_v26  ;;  %v284_v40 = vld [vmem:[%s1911_s2 + $0xc0] sm:$0xff]  ;;  %v525_v41 = vmax.f32 %v201_v27, %v444_v31  ;;  %v203_v42 = vmax.f32 %v41_v38, %v122_v39  ;;  %v526_v46 = vmax.f32 %v202_v36, %v445_v37  ;;  %v285_v49 = vld [vmem:[%s1911_s2 + $0xc8] sm:$0xff]  ;;  %v124_v53 = vld [vmem:[%s1910_s1 + $0xd0] sm:$0xff] }
  0x26   :  { %v365_v43 = vld [vmem:[%s1912_s3 + $0xc0] sm:$0xff]  ;;  %v204_v48 = vmax.f32 %v42_v44, %v123_v45  ;;  %v366_v50 = vld [vmem:[%s1912_s3 + $0xc8] sm:$0xff]  ;;  %v286_v54 = vld [vmem:[%s1911_s2 + $0xd0] sm:$0xff]  ;;  %v205_v57 = vmax.f32 %v43_v51, %v124_v53 }
  0x27   :  { %605 = vst [vmem:[%s1913_s4 + $0xa8] sm:$0xff] %v524_v35  ;;  %v446_v47 = vmax.f32 %v284_v40, %v365_v43  ;;  %606 = vst [vmem:[%s1913_s4 + $0xb0] sm:$0xff] %v525_v41  ;;  %v447_v52 = vmax.f32 %v285_v49, %v366_v50  ;;  %v367_v55 = vld [vmem:[%s1912_s3 + $0xd0] sm:$0xff]  ;;  %v44_v59 = vld [vmem:[%s1909_s0 + $0xd8] sm:$0xff] }
  0x28   :  { %607 = vst [vmem:[%s1913_s4 + $0xb8] sm:$0xff] %v526_v46  ;;  %v448_v58 = vmax.f32 %v286_v54, %v367_v55  ;;  %v125_v60 = vld [vmem:[%s1910_s1 + $0xd8] sm:$0xff]  ;;  %v45_v1 = vld [vmem:[%s1909_s0 + $0xe0] sm:$0xff]  ;;  %v46_v8 = vld [vmem:[%s1909_s0 + $0xe8] sm:$0xff] }
  0x29   :  { %v527_v56 = vmax.f32 %v203_v42, %v446_v47  ;;  %v287_v61 = vld [vmem:[%s1911_s2 + $0xd8] sm:$0xff]  ;;  %v528_v62 = vmax.f32 %v204_v48, %v447_v52  ;;  %v206_v63 = vmax.f32 %v44_v59, %v125_v60  ;;  %v126_v2 = vld [vmem:[%s1910_s1 + $0xe0] sm:$0xff]  ;;  %v127_v10 = vld [vmem:[%s1910_s1 + $0xe8] sm:$0xff] }
  0x2a   :  { %v368_v0 = vld [vmem:[%s1912_s3 + $0xd8] sm:$0xff]  ;;  %v529_v3 = vmax.f32 %v205_v57, %v448_v58  ;;  %v207_v5 = vmax.f32 %v45_v1, %v126_v2  ;;  %v288_v6 = vld [vmem:[%s1911_s2 + $0xe0] sm:$0xff]  ;;  %v289_v11 = vld [vmem:[%s1911_s2 + $0xe8] sm:$0xff]  ;;  %v208_v14 = vmax.f32 %v46_v8, %v127_v10 }
  0x2b   :  { %608 = vst [vmem:[%s1913_s4 + $0xc0] sm:$0xff] %v527_v56  ;;  %v449_v4 = vmax.f32 %v287_v61, %v368_v0  ;;  %v369_v7 = vld [vmem:[%s1912_s3 + $0xe0] sm:$0xff]  ;;  %609 = vst [vmem:[%s1913_s4 + $0xc8] sm:$0xff] %v528_v62  ;;  %v370_v12 = vld [vmem:[%s1912_s3 + $0xe8] sm:$0xff] }
  0x2c   :  { %v450_v9 = vmax.f32 %v288_v6, %v369_v7  ;;  %610 = vst [vmem:[%s1913_s4 + $0xd0] sm:$0xff] %v529_v3  ;;  %v451_v15 = vmax.f32 %v289_v11, %v370_v12  ;;  %v47_v16 = vld [vmem:[%s1909_s0 + $0xf0] sm:$0xff]  ;;  %v48_v22 = vld [vmem:[%s1909_s0 + $0xf8] sm:$0xff]  ;;  %v49_v29 = vld [vmem:[%s1909_s0 + $0x100] sm:$0xff] }
  0x2d   :  { %v530_v13 = vmax.f32 %v206_v63, %v449_v4  ;;  %v128_v17 = vld [vmem:[%s1910_s1 + $0xf0] sm:$0xff]  ;;  %v129_v23 = vld [vmem:[%s1910_s1 + $0xf8] sm:$0xff]  ;;  %v130_v31 = vld [vmem:[%s1910_s1 + $0x100] sm:$0xff] }
  0x2e   :  { %v290_v18 = vld [vmem:[%s1911_s2 + $0xf0] sm:$0xff]  ;;  %v531_v19 = vmax.f32 %v207_v5, %v450_v9  ;;  %v209_v20 = vmax.f32 %v47_v16, %v128_v17  ;;  %v532_v24 = vmax.f32 %v208_v14, %v451_v15  ;;  %v210_v26 = vmax.f32 %v48_v22, %v129_v23  ;;  %v291_v27 = vld [vmem:[%s1911_s2 + $0xf8] sm:$0xff]  ;;  %v292_v32 = vld [vmem:[%s1911_s2 + $0x100] sm:$0xff] }
  0x2f   :  { %v371_v21 = vld [vmem:[%s1912_s3 + $0xf0] sm:$0xff]  ;;  %611 = vst [vmem:[%s1913_s4 + $0xd8] sm:$0xff] %v530_v13  ;;  %v372_v28 = vld [vmem:[%s1912_s3 + $0xf8] sm:$0xff]  ;;  %v373_v33 = vld [vmem:[%s1912_s3 + $0x100] sm:$0xff]  ;;  %v211_v35 = vmax.f32 %v49_v29, %v130_v31 }
  0x30   :  { %v452_v25 = vmax.f32 %v290_v18, %v371_v21  ;;  %612 = vst [vmem:[%s1913_s4 + $0xe0] sm:$0xff] %v531_v19  ;;  %v453_v30 = vmax.f32 %v291_v27, %v372_v28  ;;  %613 = vst [vmem:[%s1913_s4 + $0xe8] sm:$0xff] %v532_v24  ;;  %v454_v36 = vmax.f32 %v292_v32, %v373_v33  ;;  %v50_v37 = vld [vmem:[%s1909_s0 + $0x108] sm:$0xff]  ;;  %v51_v43 = vld [vmem:[%s1909_s0 + $0x110] sm:$0xff] }
  0x31   :  { %v131_v38 = vld [vmem:[%s1910_s1 + $0x108] sm:$0xff]  ;;  %v132_v44 = vld [vmem:[%s1910_s1 + $0x110] sm:$0xff]  ;;  %v52_v50 = vld [vmem:[%s1909_s0 + $0x118] sm:$0xff] }
  0x32   :  { %v533_v34 = vmax.f32 %v209_v20, %v452_v25  ;;  %v293_v39 = vld [vmem:[%s1911_s2 + $0x108] sm:$0xff]  ;;  %v534_v40 = vmax.f32 %v210_v26, %v453_v30  ;;  %v212_v41 = vmax.f32 %v50_v37, %v131_v38  ;;  %v535_v45 = vmax.f32 %v211_v35, %v454_v36  ;;  %v294_v48 = vld [vmem:[%s1911_s2 + $0x110] sm:$0xff]  ;;  %v133_v52 = vld [vmem:[%s1910_s1 + $0x118] sm:$0xff] }
  0x33   :  { %v374_v42 = vld [vmem:[%s1912_s3 + $0x108] sm:$0xff]  ;;  %v213_v47 = vmax.f32 %v51_v43, %v132_v44  ;;  %v375_v49 = vld [vmem:[%s1912_s3 + $0x110] sm:$0xff]  ;;  %v295_v53 = vld [vmem:[%s1911_s2 + $0x118] sm:$0xff]  ;;  %v214_v56 = vmax.f32 %v52_v50, %v133_v52 }
  0x34   :  { %614 = vst [vmem:[%s1913_s4 + $0xf0] sm:$0xff] %v533_v34  ;;  %v455_v46 = vmax.f32 %v293_v39, %v374_v42  ;;  %615 = vst [vmem:[%s1913_s4 + $0xf8] sm:$0xff] %v534_v40  ;;  %v456_v51 = vmax.f32 %v294_v48, %v375_v49  ;;  %v376_v54 = vld [vmem:[%s1912_s3 + $0x118] sm:$0xff]  ;;  %v53_v58 = vld [vmem:[%s1909_s0 + $0x120] sm:$0xff] }
  0x35   :  { %616 = vst [vmem:[%s1913_s4 + $0x100] sm:$0xff] %v535_v45  ;;  %v457_v57 = vmax.f32 %v295_v53, %v376_v54  ;;  %v134_v59 = vld [vmem:[%s1910_s1 + $0x120] sm:$0xff]  ;;  %v54_v0 = vld [vmem:[%s1909_s0 + $0x128] sm:$0xff]  ;;  %v55_v7 = vld [vmem:[%s1909_s0 + $0x130] sm:$0xff] }
  0x36   :  { %v536_v55 = vmax.f32 %v212_v41, %v455_v46  ;;  %v296_v60 = vld [vmem:[%s1911_s2 + $0x120] sm:$0xff]  ;;  %v537_v61 = vmax.f32 %v213_v47, %v456_v51  ;;  %v215_v62 = vmax.f32 %v53_v58, %v134_v59  ;;  %v135_v1 = vld [vmem:[%s1910_s1 + $0x128] sm:$0xff]  ;;  %v136_v9 = vld [vmem:[%s1910_s1 + $0x130] sm:$0xff] }
  0x37   :  { %v377_v63 = vld [vmem:[%s1912_s3 + $0x120] sm:$0xff]  ;;  %v538_v2 = vmax.f32 %v214_v56, %v457_v57  ;;  %v216_v4 = vmax.f32 %v54_v0, %v135_v1  ;;  %v297_v5 = vld [vmem:[%s1911_s2 + $0x128] sm:$0xff]  ;;  %v298_v10 = vld [vmem:[%s1911_s2 + $0x130] sm:$0xff]  ;;  %v217_v13 = vmax.f32 %v55_v7, %v136_v9 }
  0x38   :  { %617 = vst [vmem:[%s1913_s4 + $0x108] sm:$0xff] %v536_v55  ;;  %v458_v3 = vmax.f32 %v296_v60, %v377_v63  ;;  %v378_v6 = vld [vmem:[%s1912_s3 + $0x128] sm:$0xff]  ;;  %618 = vst [vmem:[%s1913_s4 + $0x110] sm:$0xff] %v537_v61  ;;  %v379_v11 = vld [vmem:[%s1912_s3 + $0x130] sm:$0xff] }
  0x39   :  { %v459_v8 = vmax.f32 %v297_v5, %v378_v6  ;;  %619 = vst [vmem:[%s1913_s4 + $0x118] sm:$0xff] %v538_v2  ;;  %v460_v14 = vmax.f32 %v298_v10, %v379_v11  ;;  %v56_v15 = vld [vmem:[%s1909_s0 + $0x138] sm:$0xff]  ;;  %v57_v21 = vld [vmem:[%s1909_s0 + $0x140] sm:$0xff]  ;;  %v58_v28 = vld [vmem:[%s1909_s0 + $0x148] sm:$0xff] }
  0x3a   :  { %v539_v12 = vmax.f32 %v215_v62, %v458_v3  ;;  %v137_v16 = vld [vmem:[%s1910_s1 + $0x138] sm:$0xff]  ;;  %v138_v22 = vld [vmem:[%s1910_s1 + $0x140] sm:$0xff]  ;;  %v139_v30 = vld [vmem:[%s1910_s1 + $0x148] sm:$0xff] }
  0x3b   :  { %v299_v17 = vld [vmem:[%s1911_s2 + $0x138] sm:$0xff]  ;;  %v540_v18 = vmax.f32 %v216_v4, %v459_v8  ;;  %v218_v19 = vmax.f32 %v56_v15, %v137_v16  ;;  %v541_v23 = vmax.f32 %v217_v13, %v460_v14  ;;  %v219_v25 = vmax.f32 %v57_v21, %v138_v22  ;;  %v300_v26 = vld [vmem:[%s1911_s2 + $0x140] sm:$0xff]  ;;  %v301_v31 = vld [vmem:[%s1911_s2 + $0x148] sm:$0xff] }
  0x3c   :  { %v380_v20 = vld [vmem:[%s1912_s3 + $0x138] sm:$0xff]  ;;  %620 = vst [vmem:[%s1913_s4 + $0x120] sm:$0xff] %v539_v12  ;;  %v381_v27 = vld [vmem:[%s1912_s3 + $0x140] sm:$0xff]  ;;  %v382_v32 = vld [vmem:[%s1912_s3 + $0x148] sm:$0xff]  ;;  %v220_v34 = vmax.f32 %v58_v28, %v139_v30 }
  0x3d   :  { %v461_v24 = vmax.f32 %v299_v17, %v380_v20  ;;  %621 = vst [vmem:[%s1913_s4 + $0x128] sm:$0xff] %v540_v18  ;;  %v462_v29 = vmax.f32 %v300_v26, %v381_v27  ;;  %622 = vst [vmem:[%s1913_s4 + $0x130] sm:$0xff] %v541_v23  ;;  %v463_v35 = vmax.f32 %v301_v31, %v382_v32  ;;  %v59_v36 = vld [vmem:[%s1909_s0 + $0x150] sm:$0xff]  ;;  %v60_v42 = vld [vmem:[%s1909_s0 + $0x158] sm:$0xff] }
  0x3e   :  { %v140_v37 = vld [vmem:[%s1910_s1 + $0x150] sm:$0xff]  ;;  %v141_v43 = vld [vmem:[%s1910_s1 + $0x158] sm:$0xff]  ;;  %v61_v49 = vld [vmem:[%s1909_s0 + $0x160] sm:$0xff] }
  0x3f   :  { %v542_v33 = vmax.f32 %v218_v19, %v461_v24  ;;  %v302_v38 = vld [vmem:[%s1911_s2 + $0x150] sm:$0xff]  ;;  %v543_v39 = vmax.f32 %v219_v25, %v462_v29  ;;  %v221_v40 = vmax.f32 %v59_v36, %v140_v37  ;;  %v544_v44 = vmax.f32 %v220_v34, %v463_v35  ;;  %v303_v47 = vld [vmem:[%s1911_s2 + $0x158] sm:$0xff]  ;;  %v142_v51 = vld [vmem:[%s1910_s1 + $0x160] sm:$0xff] }
  0x40   :  { %v383_v41 = vld [vmem:[%s1912_s3 + $0x150] sm:$0xff]  ;;  %v222_v46 = vmax.f32 %v60_v42, %v141_v43  ;;  %v384_v48 = vld [vmem:[%s1912_s3 + $0x158] sm:$0xff]  ;;  %v304_v52 = vld [vmem:[%s1911_s2 + $0x160] sm:$0xff]  ;;  %v223_v55 = vmax.f32 %v61_v49, %v142_v51 }
  0x41   :  { %623 = vst [vmem:[%s1913_s4 + $0x138] sm:$0xff] %v542_v33  ;;  %v464_v45 = vmax.f32 %v302_v38, %v383_v41  ;;  %624 = vst [vmem:[%s1913_s4 + $0x140] sm:$0xff] %v543_v39  ;;  %v465_v50 = vmax.f32 %v303_v47, %v384_v48  ;;  %v385_v53 = vld [vmem:[%s1912_s3 + $0x160] sm:$0xff]  ;;  %v62_v57 = vld [vmem:[%s1909_s0 + $0x168] sm:$0xff] }
  0x42   :  { %625 = vst [vmem:[%s1913_s4 + $0x148] sm:$0xff] %v544_v44  ;;  %v466_v56 = vmax.f32 %v304_v52, %v385_v53  ;;  %v143_v58 = vld [vmem:[%s1910_s1 + $0x168] sm:$0xff]  ;;  %v63_v63 = vld [vmem:[%s1909_s0 + $0x170] sm:$0xff]  ;;  %v64_v6 = vld [vmem:[%s1909_s0 + $0x178] sm:$0xff] }
  0x43   :  { %v545_v54 = vmax.f32 %v221_v40, %v464_v45  ;;  %v305_v59 = vld [vmem:[%s1911_s2 + $0x168] sm:$0xff]  ;;  %v546_v60 = vmax.f32 %v222_v46, %v465_v50  ;;  %v224_v61 = vmax.f32 %v62_v57, %v143_v58  ;;  %v144_v0 = vld [vmem:[%s1910_s1 + $0x170] sm:$0xff]  ;;  %v145_v8 = vld [vmem:[%s1910_s1 + $0x178] sm:$0xff] }
  0x44   :  { %v386_v62 = vld [vmem:[%s1912_s3 + $0x168] sm:$0xff]  ;;  %v547_v1 = vmax.f32 %v223_v55, %v466_v56  ;;  %v225_v3 = vmax.f32 %v63_v63, %v144_v0  ;;  %v306_v4 = vld [vmem:[%s1911_s2 + $0x170] sm:$0xff]  ;;  %v307_v9 = vld [vmem:[%s1911_s2 + $0x178] sm:$0xff]  ;;  %v226_v12 = vmax.f32 %v64_v6, %v145_v8 }
  0x45   :  { %626 = vst [vmem:[%s1913_s4 + $0x150] sm:$0xff] %v545_v54  ;;  %v467_v2 = vmax.f32 %v305_v59, %v386_v62  ;;  %v387_v5 = vld [vmem:[%s1912_s3 + $0x170] sm:$0xff]  ;;  %627 = vst [vmem:[%s1913_s4 + $0x158] sm:$0xff] %v546_v60  ;;  %v388_v10 = vld [vmem:[%s1912_s3 + $0x178] sm:$0xff] }
  0x46   :  { %v468_v7 = vmax.f32 %v306_v4, %v387_v5  ;;  %628 = vst [vmem:[%s1913_s4 + $0x160] sm:$0xff] %v547_v1  ;;  %v469_v13 = vmax.f32 %v307_v9, %v388_v10  ;;  %v65_v14 = vld [vmem:[%s1909_s0 + $0x180] sm:$0xff]  ;;  %v66_v20 = vld [vmem:[%s1909_s0 + $0x188] sm:$0xff]  ;;  %v67_v27 = vld [vmem:[%s1909_s0 + $0x190] sm:$0xff] }
  0x47   :  { %v548_v11 = vmax.f32 %v224_v61, %v467_v2  ;;  %v146_v15 = vld [vmem:[%s1910_s1 + $0x180] sm:$0xff]  ;;  %v147_v21 = vld [vmem:[%s1910_s1 + $0x188] sm:$0xff]  ;;  %v148_v29 = vld [vmem:[%s1910_s1 + $0x190] sm:$0xff] }
  0x48   :  { %v308_v16 = vld [vmem:[%s1911_s2 + $0x180] sm:$0xff]  ;;  %v549_v17 = vmax.f32 %v225_v3, %v468_v7  ;;  %v227_v18 = vmax.f32 %v65_v14, %v146_v15  ;;  %v550_v22 = vmax.f32 %v226_v12, %v469_v13  ;;  %v228_v24 = vmax.f32 %v66_v20, %v147_v21  ;;  %v309_v25 = vld [vmem:[%s1911_s2 + $0x188] sm:$0xff]  ;;  %v310_v30 = vld [vmem:[%s1911_s2 + $0x190] sm:$0xff] }
  0x49   :  { %v389_v19 = vld [vmem:[%s1912_s3 + $0x180] sm:$0xff]  ;;  %629 = vst [vmem:[%s1913_s4 + $0x168] sm:$0xff] %v548_v11  ;;  %v390_v26 = vld [vmem:[%s1912_s3 + $0x188] sm:$0xff]  ;;  %v391_v31 = vld [vmem:[%s1912_s3 + $0x190] sm:$0xff]  ;;  %v229_v33 = vmax.f32 %v67_v27, %v148_v29 }
  0x4a   :  { %v470_v23 = vmax.f32 %v308_v16, %v389_v19  ;;  %630 = vst [vmem:[%s1913_s4 + $0x170] sm:$0xff] %v549_v17  ;;  %v471_v28 = vmax.f32 %v309_v25, %v390_v26  ;;  %631 = vst [vmem:[%s1913_s4 + $0x178] sm:$0xff] %v550_v22  ;;  %v472_v34 = vmax.f32 %v310_v30, %v391_v31  ;;  %v68_v35 = vld [vmem:[%s1909_s0 + $0x198] sm:$0xff]  ;;  %v69_v41 = vld [vmem:[%s1909_s0 + $0x1a0] sm:$0xff] }
  0x4b   :  { %v149_v36 = vld [vmem:[%s1910_s1 + $0x198] sm:$0xff]  ;;  %v150_v42 = vld [vmem:[%s1910_s1 + $0x1a0] sm:$0xff]  ;;  %v70_v48 = vld [vmem:[%s1909_s0 + $0x1a8] sm:$0xff] }
  0x4c   :  { %v551_v32 = vmax.f32 %v227_v18, %v470_v23  ;;  %v311_v37 = vld [vmem:[%s1911_s2 + $0x198] sm:$0xff]  ;;  %v552_v38 = vmax.f32 %v228_v24, %v471_v28  ;;  %v230_v39 = vmax.f32 %v68_v35, %v149_v36  ;;  %v553_v43 = vmax.f32 %v229_v33, %v472_v34  ;;  %v312_v46 = vld [vmem:[%s1911_s2 + $0x1a0] sm:$0xff]  ;;  %v151_v50 = vld [vmem:[%s1910_s1 + $0x1a8] sm:$0xff] }
  0x4d   :  { %v392_v40 = vld [vmem:[%s1912_s3 + $0x198] sm:$0xff]  ;;  %v231_v45 = vmax.f32 %v69_v41, %v150_v42  ;;  %v393_v47 = vld [vmem:[%s1912_s3 + $0x1a0] sm:$0xff]  ;;  %v313_v51 = vld [vmem:[%s1911_s2 + $0x1a8] sm:$0xff]  ;;  %v232_v54 = vmax.f32 %v70_v48, %v151_v50 }
  0x4e   :  { %632 = vst [vmem:[%s1913_s4 + $0x180] sm:$0xff] %v551_v32  ;;  %v473_v44 = vmax.f32 %v311_v37, %v392_v40  ;;  %633 = vst [vmem:[%s1913_s4 + $0x188] sm:$0xff] %v552_v38  ;;  %v474_v49 = vmax.f32 %v312_v46, %v393_v47  ;;  %v394_v52 = vld [vmem:[%s1912_s3 + $0x1a8] sm:$0xff]  ;;  %v71_v56 = vld [vmem:[%s1909_s0 + $0x1b0] sm:$0xff] }
  0x4f   :  { %634 = vst [vmem:[%s1913_s4 + $0x190] sm:$0xff] %v553_v43  ;;  %v475_v55 = vmax.f32 %v313_v51, %v394_v52  ;;  %v152_v57 = vld [vmem:[%s1910_s1 + $0x1b0] sm:$0xff]  ;;  %v72_v62 = vld [vmem:[%s1909_s0 + $0x1b8] sm:$0xff]  ;;  %v73_v5 = vld [vmem:[%s1909_s0 + $0x1c0] sm:$0xff] }
  0x50   :  { %v554_v53 = vmax.f32 %v230_v39, %v473_v44  ;;  %v314_v58 = vld [vmem:[%s1911_s2 + $0x1b0] sm:$0xff]  ;;  %v555_v59 = vmax.f32 %v231_v45, %v474_v49  ;;  %v233_v60 = vmax.f32 %v71_v56, %v152_v57  ;;  %v153_v63 = vld [vmem:[%s1910_s1 + $0x1b8] sm:$0xff]  ;;  %v154_v7 = vld [vmem:[%s1910_s1 + $0x1c0] sm:$0xff] }
  0x51   :  { %v395_v61 = vld [vmem:[%s1912_s3 + $0x1b0] sm:$0xff]  ;;  %v556_v0 = vmax.f32 %v232_v54, %v475_v55  ;;  %v234_v2 = vmax.f32 %v72_v62, %v153_v63  ;;  %v315_v3 = vld [vmem:[%s1911_s2 + $0x1b8] sm:$0xff]  ;;  %v316_v8 = vld [vmem:[%s1911_s2 + $0x1c0] sm:$0xff]  ;;  %v235_v11 = vmax.f32 %v73_v5, %v154_v7 }
  0x52   :  { %635 = vst [vmem:[%s1913_s4 + $0x198] sm:$0xff] %v554_v53  ;;  %v476_v1 = vmax.f32 %v314_v58, %v395_v61  ;;  %v396_v4 = vld [vmem:[%s1912_s3 + $0x1b8] sm:$0xff]  ;;  %636 = vst [vmem:[%s1913_s4 + $0x1a0] sm:$0xff] %v555_v59  ;;  %v397_v9 = vld [vmem:[%s1912_s3 + $0x1c0] sm:$0xff] }
  0x53   :  { %v477_v6 = vmax.f32 %v315_v3, %v396_v4  ;;  %637 = vst [vmem:[%s1913_s4 + $0x1a8] sm:$0xff] %v556_v0  ;;  %v478_v12 = vmax.f32 %v316_v8, %v397_v9  ;;  %v74_v13 = vld [vmem:[%s1909_s0 + $0x1c8] sm:$0xff]  ;;  %v75_v19 = vld [vmem:[%s1909_s0 + $0x1d0] sm:$0xff]  ;;  %v76_v26 = vld [vmem:[%s1909_s0 + $0x1d8] sm:$0xff] }
  0x54   :  { %v557_v10 = vmax.f32 %v233_v60, %v476_v1  ;;  %v155_v14 = vld [vmem:[%s1910_s1 + $0x1c8] sm:$0xff]  ;;  %v156_v20 = vld [vmem:[%s1910_s1 + $0x1d0] sm:$0xff]  ;;  %v157_v28 = vld [vmem:[%s1910_s1 + $0x1d8] sm:$0xff] }
  0x55   :  { %v317_v15 = vld [vmem:[%s1911_s2 + $0x1c8] sm:$0xff]  ;;  %v558_v16 = vmax.f32 %v234_v2, %v477_v6  ;;  %v236_v17 = vmax.f32 %v74_v13, %v155_v14  ;;  %v559_v21 = vmax.f32 %v235_v11, %v478_v12  ;;  %v237_v23 = vmax.f32 %v75_v19, %v156_v20  ;;  %v318_v24 = vld [vmem:[%s1911_s2 + $0x1d0] sm:$0xff]  ;;  %v319_v29 = vld [vmem:[%s1911_s2 + $0x1d8] sm:$0xff] }
  0x56   :  { %v398_v18 = vld [vmem:[%s1912_s3 + $0x1c8] sm:$0xff]  ;;  %638 = vst [vmem:[%s1913_s4 + $0x1b0] sm:$0xff] %v557_v10  ;;  %v399_v25 = vld [vmem:[%s1912_s3 + $0x1d0] sm:$0xff]  ;;  %v400_v30 = vld [vmem:[%s1912_s3 + $0x1d8] sm:$0xff]  ;;  %v238_v32 = vmax.f32 %v76_v26, %v157_v28 }
  0x57   :  { %v479_v22 = vmax.f32 %v317_v15, %v398_v18  ;;  %639 = vst [vmem:[%s1913_s4 + $0x1b8] sm:$0xff] %v558_v16  ;;  %v480_v27 = vmax.f32 %v318_v24, %v399_v25  ;;  %640 = vst [vmem:[%s1913_s4 + $0x1c0] sm:$0xff] %v559_v21  ;;  %v481_v33 = vmax.f32 %v319_v29, %v400_v30  ;;  %v77_v34 = vld [vmem:[%s1909_s0 + $0x1e0] sm:$0xff]  ;;  %v78_v40 = vld [vmem:[%s1909_s0 + $0x1e8] sm:$0xff] }
  0x58   :  { %v158_v35 = vld [vmem:[%s1910_s1 + $0x1e0] sm:$0xff]  ;;  %v159_v41 = vld [vmem:[%s1910_s1 + $0x1e8] sm:$0xff]  ;;  %v79_v47 = vld [vmem:[%s1909_s0 + $0x1f0] sm:$0xff] }
  0x59   :  { %v560_v31 = vmax.f32 %v236_v17, %v479_v22  ;;  %v320_v36 = vld [vmem:[%s1911_s2 + $0x1e0] sm:$0xff]  ;;  %v561_v37 = vmax.f32 %v237_v23, %v480_v27  ;;  %v239_v38 = vmax.f32 %v77_v34, %v158_v35  ;;  %v562_v42 = vmax.f32 %v238_v32, %v481_v33  ;;  %v321_v45 = vld [vmem:[%s1911_s2 + $0x1e8] sm:$0xff]  ;;  %v160_v49 = vld [vmem:[%s1910_s1 + $0x1f0] sm:$0xff] }
  0x5a   :  { %v401_v39 = vld [vmem:[%s1912_s3 + $0x1e0] sm:$0xff]  ;;  %v240_v44 = vmax.f32 %v78_v40, %v159_v41  ;;  %v402_v46 = vld [vmem:[%s1912_s3 + $0x1e8] sm:$0xff]  ;;  %v322_v50 = vld [vmem:[%s1911_s2 + $0x1f0] sm:$0xff]  ;;  %v241_v53 = vmax.f32 %v79_v47, %v160_v49 }
  0x5b   :  { %641 = vst [vmem:[%s1913_s4 + $0x1c8] sm:$0xff] %v560_v31  ;;  %v482_v43 = vmax.f32 %v320_v36, %v401_v39  ;;  %642 = vst [vmem:[%s1913_s4 + $0x1d0] sm:$0xff] %v561_v37  ;;  %v483_v48 = vmax.f32 %v321_v45, %v402_v46  ;;  %v403_v51 = vld [vmem:[%s1912_s3 + $0x1f0] sm:$0xff]  ;;  %v80_v55 = vld [vmem:[%s1909_s0 + $0x1f8] sm:$0xff] }
  0x5c   :  { %643 = vst [vmem:[%s1913_s4 + $0x1d8] sm:$0xff] %v562_v42  ;;  %v484_v54 = vmax.f32 %v322_v50, %v403_v51  ;;  %v161_v56 = vld [vmem:[%s1910_s1 + $0x1f8] sm:$0xff]  ;;  %v81_v61 = vld [vmem:[%s1909_s0 + $0x200] sm:$0xff]  ;;  %v82_v4 = vld [vmem:[%s1909_s0 + $0x208] sm:$0xff] }
  0x5d   :  { %v563_v52 = vmax.f32 %v239_v38, %v482_v43  ;;  %v323_v57 = vld [vmem:[%s1911_s2 + $0x1f8] sm:$0xff]  ;;  %v564_v58 = vmax.f32 %v240_v44, %v483_v48  ;;  %v242_v59 = vmax.f32 %v80_v55, %v161_v56  ;;  %v162_v62 = vld [vmem:[%s1910_s1 + $0x200] sm:$0xff]  ;;  %v163_v6 = vld [vmem:[%s1910_s1 + $0x208] sm:$0xff] }
  0x5e   :  { %v404_v60 = vld [vmem:[%s1912_s3 + $0x1f8] sm:$0xff]  ;;  %v565_v63 = vmax.f32 %v241_v53, %v484_v54  ;;  %v243_v1 = vmax.f32 %v81_v61, %v162_v62  ;;  %v324_v2 = vld [vmem:[%s1911_s2 + $0x200] sm:$0xff]  ;;  %v325_v7 = vld [vmem:[%s1911_s2 + $0x208] sm:$0xff]  ;;  %v244_v10 = vmax.f32 %v82_v4, %v163_v6 }
  0x5f   :  { %644 = vst [vmem:[%s1913_s4 + $0x1e0] sm:$0xff] %v563_v52  ;;  %v485_v0 = vmax.f32 %v323_v57, %v404_v60  ;;  %v405_v3 = vld [vmem:[%s1912_s3 + $0x200] sm:$0xff]  ;;  %645 = vst [vmem:[%s1913_s4 + $0x1e8] sm:$0xff] %v564_v58  ;;  %v406_v8 = vld [vmem:[%s1912_s3 + $0x208] sm:$0xff] }
  0x60   :  { %v486_v5 = vmax.f32 %v324_v2, %v405_v3  ;;  %646 = vst [vmem:[%s1913_s4 + $0x1f0] sm:$0xff] %v565_v63  ;;  %v487_v11 = vmax.f32 %v325_v7, %v406_v8  ;;  %v83_v12 = vld [vmem:[%s1909_s0 + $0x210] sm:$0xff]  ;;  %v84_v18 = vld [vmem:[%s1909_s0 + $0x218] sm:$0xff]  ;;  %v85_v25 = vld [vmem:[%s1909_s0 + $0x220] sm:$0xff] }
  0x61   :  { %v566_v9 = vmax.f32 %v242_v59, %v485_v0  ;;  %v164_v13 = vld [vmem:[%s1910_s1 + $0x210] sm:$0xff]  ;;  %v165_v19 = vld [vmem:[%s1910_s1 + $0x218] sm:$0xff]  ;;  %v166_v27 = vld [vmem:[%s1910_s1 + $0x220] sm:$0xff] }
  0x62   :  { %v326_v14 = vld [vmem:[%s1911_s2 + $0x210] sm:$0xff]  ;;  %v567_v15 = vmax.f32 %v243_v1, %v486_v5  ;;  %v245_v16 = vmax.f32 %v83_v12, %v164_v13  ;;  %v568_v20 = vmax.f32 %v244_v10, %v487_v11  ;;  %v246_v22 = vmax.f32 %v84_v18, %v165_v19  ;;  %v327_v23 = vld [vmem:[%s1911_s2 + $0x218] sm:$0xff]  ;;  %v328_v28 = vld [vmem:[%s1911_s2 + $0x220] sm:$0xff] }
  0x63   :  { %v407_v17 = vld [vmem:[%s1912_s3 + $0x210] sm:$0xff]  ;;  %647 = vst [vmem:[%s1913_s4 + $0x1f8] sm:$0xff] %v566_v9  ;;  %v408_v24 = vld [vmem:[%s1912_s3 + $0x218] sm:$0xff]  ;;  %v409_v29 = vld [vmem:[%s1912_s3 + $0x220] sm:$0xff]  ;;  %v247_v31 = vmax.f32 %v85_v25, %v166_v27 }
  0x64   :  { %v488_v21 = vmax.f32 %v326_v14, %v407_v17  ;;  %648 = vst [vmem:[%s1913_s4 + $0x200] sm:$0xff] %v567_v15  ;;  %v489_v26 = vmax.f32 %v327_v23, %v408_v24  ;;  %649 = vst [vmem:[%s1913_s4 + $0x208] sm:$0xff] %v568_v20  ;;  %v490_v32 = vmax.f32 %v328_v28, %v409_v29  ;;  %v86_v33 = vld [vmem:[%s1909_s0 + $0x228] sm:$0xff]  ;;  %v87_v39 = vld [vmem:[%s1909_s0 + $0x230] sm:$0xff] }
  0x65   :  { %v167_v34 = vld [vmem:[%s1910_s1 + $0x228] sm:$0xff]  ;;  %v168_v40 = vld [vmem:[%s1910_s1 + $0x230] sm:$0xff]  ;;  %v88_v46 = vld [vmem:[%s1909_s0 + $0x238] sm:$0xff] }
  0x66   :  { %v569_v30 = vmax.f32 %v245_v16, %v488_v21  ;;  %v329_v35 = vld [vmem:[%s1911_s2 + $0x228] sm:$0xff]  ;;  %v570_v36 = vmax.f32 %v246_v22, %v489_v26  ;;  %v248_v37 = vmax.f32 %v86_v33, %v167_v34  ;;  %v571_v41 = vmax.f32 %v247_v31, %v490_v32  ;;  %v330_v44 = vld [vmem:[%s1911_s2 + $0x230] sm:$0xff]  ;;  %v169_v48 = vld [vmem:[%s1910_s1 + $0x238] sm:$0xff] }
  0x67   :  { %v410_v38 = vld [vmem:[%s1912_s3 + $0x228] sm:$0xff]  ;;  %v249_v43 = vmax.f32 %v87_v39, %v168_v40  ;;  %v411_v45 = vld [vmem:[%s1912_s3 + $0x230] sm:$0xff]  ;;  %v331_v49 = vld [vmem:[%s1911_s2 + $0x238] sm:$0xff]  ;;  %v250_v52 = vmax.f32 %v88_v46, %v169_v48 }
  0x68   :  { %650 = vst [vmem:[%s1913_s4 + $0x210] sm:$0xff] %v569_v30  ;;  %v491_v42 = vmax.f32 %v329_v35, %v410_v38  ;;  %651 = vst [vmem:[%s1913_s4 + $0x218] sm:$0xff] %v570_v36  ;;  %v492_v47 = vmax.f32 %v330_v44, %v411_v45  ;;  %v412_v50 = vld [vmem:[%s1912_s3 + $0x238] sm:$0xff]  ;;  %v89_v54 = vld [vmem:[%s1909_s0 + $0x240] sm:$0xff] }
  0x69   :  { %652 = vst [vmem:[%s1913_s4 + $0x220] sm:$0xff] %v571_v41  ;;  %v493_v53 = vmax.f32 %v331_v49, %v412_v50  ;;  %v170_v55 = vld [vmem:[%s1910_s1 + $0x240] sm:$0xff]  ;;  %v90_v60 = vld [vmem:[%s1909_s0 + $0x248] sm:$0xff]  ;;  %v91_v3 = vld [vmem:[%s1909_s0 + $0x250] sm:$0xff] }
  0x6a   :  { %v572_v51 = vmax.f32 %v248_v37, %v491_v42  ;;  %v332_v56 = vld [vmem:[%s1911_s2 + $0x240] sm:$0xff]  ;;  %v573_v57 = vmax.f32 %v249_v43, %v492_v47  ;;  %v251_v58 = vmax.f32 %v89_v54, %v170_v55  ;;  %v171_v61 = vld [vmem:[%s1910_s1 + $0x248] sm:$0xff]  ;;  %v172_v5 = vld [vmem:[%s1910_s1 + $0x250] sm:$0xff] }
  0x6b   :  { %v413_v59 = vld [vmem:[%s1912_s3 + $0x240] sm:$0xff]  ;;  %v574_v62 = vmax.f32 %v250_v52, %v493_v53  ;;  %v252_v0 = vmax.f32 %v90_v60, %v171_v61  ;;  %v333_v1 = vld [vmem:[%s1911_s2 + $0x248] sm:$0xff]  ;;  %v334_v6 = vld [vmem:[%s1911_s2 + $0x250] sm:$0xff]  ;;  %v253_v9 = vmax.f32 %v91_v3, %v172_v5 }
  0x6c   :  { %653 = vst [vmem:[%s1913_s4 + $0x228] sm:$0xff] %v572_v51  ;;  %v494_v63 = vmax.f32 %v332_v56, %v413_v59  ;;  %v414_v2 = vld [vmem:[%s1912_s3 + $0x248] sm:$0xff]  ;;  %654 = vst [vmem:[%s1913_s4 + $0x230] sm:$0xff] %v573_v57  ;;  %v415_v7 = vld [vmem:[%s1912_s3 + $0x250] sm:$0xff] }
  0x6d   :  { %v495_v4 = vmax.f32 %v333_v1, %v414_v2  ;;  %655 = vst [vmem:[%s1913_s4 + $0x238] sm:$0xff] %v574_v62  ;;  %v496_v10 = vmax.f32 %v334_v6, %v415_v7  ;;  %v92_v11 = vld [vmem:[%s1909_s0 + $0x258] sm:$0xff]  ;;  %v93_v17 = vld [vmem:[%s1909_s0 + $0x260] sm:$0xff]  ;;  %v94_v24 = vld [vmem:[%s1909_s0 + $0x268] sm:$0xff] }
  0x6e   :  { %v575_v8 = vmax.f32 %v251_v58, %v494_v63  ;;  %v173_v12 = vld [vmem:[%s1910_s1 + $0x258] sm:$0xff]  ;;  %v174_v18 = vld [vmem:[%s1910_s1 + $0x260] sm:$0xff]  ;;  %v175_v26 = vld [vmem:[%s1910_s1 + $0x268] sm:$0xff] }
  0x6f   :  { %v335_v13 = vld [vmem:[%s1911_s2 + $0x258] sm:$0xff]  ;;  %v576_v14 = vmax.f32 %v252_v0, %v495_v4  ;;  %v254_v15 = vmax.f32 %v92_v11, %v173_v12  ;;  %v577_v19 = vmax.f32 %v253_v9, %v496_v10  ;;  %v255_v21 = vmax.f32 %v93_v17, %v174_v18  ;;  %v336_v22 = vld [vmem:[%s1911_s2 + $0x260] sm:$0xff]  ;;  %v337_v27 = vld [vmem:[%s1911_s2 + $0x268] sm:$0xff] }
  0x70   :  { %v416_v16 = vld [vmem:[%s1912_s3 + $0x258] sm:$0xff]  ;;  %656 = vst [vmem:[%s1913_s4 + $0x240] sm:$0xff] %v575_v8  ;;  %v417_v23 = vld [vmem:[%s1912_s3 + $0x260] sm:$0xff]  ;;  %v418_v28 = vld [vmem:[%s1912_s3 + $0x268] sm:$0xff]  ;;  %v256_v30 = vmax.f32 %v94_v24, %v175_v26 }
  0x71   :  { %v497_v20 = vmax.f32 %v335_v13, %v416_v16  ;;  %657 = vst [vmem:[%s1913_s4 + $0x248] sm:$0xff] %v576_v14  ;;  %v498_v25 = vmax.f32 %v336_v22, %v417_v23  ;;  %658 = vst [vmem:[%s1913_s4 + $0x250] sm:$0xff] %v577_v19  ;;  %v499_v31 = vmax.f32 %v337_v27, %v418_v28  ;;  %v95_v32 = vld [vmem:[%s1909_s0 + $0x270] sm:$0xff]  ;;  %v96_v38 = vld [vmem:[%s1909_s0 + $0x278] sm:$0xff] }
  0x72   :  { %v176_v33 = vld [vmem:[%s1910_s1 + $0x270] sm:$0xff]  ;;  %v177_v39 = vld [vmem:[%s1910_s1 + $0x278] sm:$0xff]  ;;  %v97_v45 = vld [vmem:[%s1909_s0 + $0x280] sm:$0xff] }
  0x73   :  { %v578_v29 = vmax.f32 %v254_v15, %v497_v20  ;;  %v338_v34 = vld [vmem:[%s1911_s2 + $0x270] sm:$0xff]  ;;  %v579_v35 = vmax.f32 %v255_v21, %v498_v25  ;;  %v257_v36 = vmax.f32 %v95_v32, %v176_v33  ;;  %v580_v40 = vmax.f32 %v256_v30, %v499_v31  ;;  %v339_v43 = vld [vmem:[%s1911_s2 + $0x278] sm:$0xff]  ;;  %v178_v47 = vld [vmem:[%s1910_s1 + $0x280] sm:$0xff] }
  0x74   :  { %v419_v37 = vld [vmem:[%s1912_s3 + $0x270] sm:$0xff]  ;;  %v258_v42 = vmax.f32 %v96_v38, %v177_v39  ;;  %v420_v44 = vld [vmem:[%s1912_s3 + $0x278] sm:$0xff]  ;;  %v340_v48 = vld [vmem:[%s1911_s2 + $0x280] sm:$0xff]  ;;  %v259_v51 = vmax.f32 %v97_v45, %v178_v47 }
  0x75   :  { %659 = vst [vmem:[%s1913_s4 + $0x258] sm:$0xff] %v578_v29  ;;  %v500_v41 = vmax.f32 %v338_v34, %v419_v37  ;;  %660 = vst [vmem:[%s1913_s4 + $0x260] sm:$0xff] %v579_v35  ;;  %v501_v46 = vmax.f32 %v339_v43, %v420_v44  ;;  %v421_v49 = vld [vmem:[%s1912_s3 + $0x280] sm:$0xff] }
  0x76   :  { %661 = vst [vmem:[%s1913_s4 + $0x268] sm:$0xff] %v580_v40  ;;  %v502_v52 = vmax.f32 %v340_v48, %v421_v49 }
  0x77   :  { %v581_v50 = vmax.f32 %v257_v36, %v500_v41  ;;  %v582_v53 = vmax.f32 %v258_v42, %v501_v46 }
  0x78   :  { %v583_v54 = vmax.f32 %v259_v51, %v502_v52 }
  0x79   :  { %662 = vst [vmem:[%s1913_s4 + $0x270] sm:$0xff] %v581_v50  ;;  %663 = vst [vmem:[%s1913_s4 + $0x278] sm:$0xff] %v582_v53 }
  0x7a   :  { %664 = vst [vmem:[%s1913_s4 + $0x280] sm:$0xff] %v583_v54 }

// kernel: cnn_forward.7
= control target key start
LH: loop header
LB: loop body
LE: loop exit
PB: predicated region body
PF: predicated region fallthrough
CT: control target
= control target key end

     0   :  { %s4387_s12 = smov 0   ;;  %s5262_s0 = inlined_call_operand.vmem [shape: bf16[1296,576], index: 0, kind: input, shape index: {}]   ;;  %s5263_s1 = inlined_call_operand.vmem [shape: bf16[576,128], index: 1, kind: input, shape index: {}]   ;;  %s5264_s2 = inlined_call_operand.vmem [shape: f32[1,128], index: 2, kind: input, shape index: {}]   ;;  %s5265_s3 = inlined_call_operand.vmem [shape: f32[1296,128], index: 3, kind: output, shape index: {}]  }
   0x1 LB: > { %s3155_s13 = sadd.s32 4294967295, %s4362_s12   ;;  %p3159_p0 = scmp.ge.s32.totalorder %s4362_s12, 1  ;;  %s4362_s12 = sphi %s4387_s12, %s13_s12  }
   0x2   : > { %p139_p1 = scmp.lt.s32.totalorder %s4362_s12, 3 }
   0x4   : > { %p140_p2 = pnand %p3159_p0, %p139_p1 }
   0x5   : > { %v4034_v0 = vld [vmem:[%s5263_s1] sm:$0xff] (!%p140_p2)   ;;  %v4364_v1 = vmov (!%p140_p2), 0   ;;  %v4036_v3 = vld [vmem:[%s5263_s1 + $0x8] sm:$0xff] (!%p140_p2)   ;;  %v4038_v5 = vld [vmem:[%s5263_s1 + $0x10] sm:$0xff] (!%p140_p2)   ;;  %s164_s5 = smul.u32 (!%p140_p2), 81, %s3155_s13  ;;  %v4365_v39 = vmov (!%p140_p2), 0.0  }
   0x6   : > { %143 = sbr.rel (%p140_p2) target bundleno = 775 (0x307), region = 32  ;;  %1857 = vmatprep.subr.bf16.mxu1 (!%p140_p2), %v4364_v1  ;;  %2217 = vmatprep.subr.bf16.mxu0 (!%p140_p2), %v4364_v1  ;;  %v4403_v2 = vld [vmem:[%s5263_s1 + $0x80] sm:$0xff] (!%p140_p2)   ;;  %v4413_v4 = vld [vmem:[%s5263_s1 + $0x88] sm:$0xff] (!%p140_p2)   ;;  %v4424_v6 = vld [vmem:[%s5263_s1 + $0x90] sm:$0xff] (!%p140_p2)   ;;  %vm4366_vm0 = vmmov (!%p140_p2), 0   ;;  %vm1733_vm1 = vcmask (!%p140_p2), 523264  }
   0x7   : > { %1858 = vmatpush1.bf16.msra.mxu1 (!%p140_p2), %v4034_v0  ;;  %2218 = vmatpush1.bf16.msra.mxu0 (!%p140_p2), %v4403_v2  ;;  %v4040_v7 = vld [vmem:[%s5263_s1 + $0x18] sm:$0xff] (!%p140_p2)   ;;  %v4042_v9 = vld [vmem:[%s5263_s1 + $0x20] sm:$0xff] (!%p140_p2)   ;;  %v4044_v11 = vld [vmem:[%s5263_s1 + $0x28] sm:$0xff] (!%p140_p2)   ;;  %p165_p3 = scmp.lt.s32.totalorder (!%p140_p2), %s164_s5, 161 }
   0x8   : > { %1859 = vmatprep.subr.bf16.mxu1 (!%p140_p2), %v4364_v1  ;;  %2219 = vmatprep.subr.bf16.mxu0 (!%p140_p2), %v4364_v1  ;;  %v4435_v8 = vld [vmem:[%s5263_s1 + $0x98] sm:$0xff] (!%p140_p2)   ;;  %v4448_v10 = vld [vmem:[%s5263_s1 + $0xa0] sm:$0xff] (!%p140_p2)   ;;  %v4459_v12 = vld [vmem:[%s5263_s1 + $0xa8] sm:$0xff] (!%p140_p2)  }
   0x9   : > { %v4046_v13 = vld [vmem:[%s5263_s1 + $0x30] sm:$0xff] (!%p140_p2)   ;;  %v4048_v15 = vld [vmem:[%s5263_s1 + $0x38] sm:$0xff] (!%p140_p2)   ;;  %v4050_v17 = vld [vmem:[%s5263_s1 + $0x40] sm:$0xff] (!%p140_p2)  }
   0xa   : > { %v4472_v14 = vld [vmem:[%s5263_s1 + $0xb0] sm:$0xff] (!%p140_p2)   ;;  %v4484_v16 = vld [vmem:[%s5263_s1 + $0xb8] sm:$0xff] (!%p140_p2)   ;;  %v4500_v18 = vld [vmem:[%s5263_s1 + $0xc0] sm:$0xff] (!%p140_p2)  }
   0xb   : > { %1860 = vmatpush1.bf16.msra.mxu1 (!%p140_p2), %v4036_v3  ;;  %2220 = vmatpush1.bf16.msra.mxu0 (!%p140_p2), %v4413_v4  ;;  %v4052_v20 = vld [vmem:[%s5263_s1 + $0x48] sm:$0xff] (!%p140_p2)   ;;  %v4054_v23 = vld [vmem:[%s5263_s1 + $0x50] sm:$0xff] (!%p140_p2)   ;;  %v4056_v25 = vld [vmem:[%s5263_s1 + $0x58] sm:$0xff] (!%p140_p2)  }
   0xc   : > { %1861 = vmatprep.subr.bf16.mxu1 (!%p140_p2), %v4364_v1  ;;  %2221 = vmatprep.subr.bf16.mxu0 (!%p140_p2), %v4364_v1  ;;  %v4513_v22 = vld [vmem:[%s5263_s1 + $0xc8] sm:$0xff] (!%p140_p2)   ;;  %v4524_v24 = vld [vmem:[%s5263_s1 + $0xd0] sm:$0xff] (!%p140_p2)   ;;  %v4535_v26 = vld [vmem:[%s5263_s1 + $0xd8] sm:$0xff] (!%p140_p2)  }
   0xd   : > { %s5267_s5 = smov (!%p165_p3, %s164_s5), 161  ;;  %v4058_v27 = vld [vmem:[%s5263_s1 + $0x60] sm:$0xff]   ;;  %v4060_v29 = vld [vmem:[%s5263_s1 + $0x68] sm:$0xff]   ;;  %v4062_v31 = vld [vmem:[%s5263_s1 + $0x70] sm:$0xff]  }
   0xe   : > { %s4022_s19 = smul.u32 20, %s5267_s5  ;;  %v4546_v28 = vld [vmem:[%s5263_s1 + $0xe0] sm:$0xff]   ;;  %v4557_v30 = vld [vmem:[%s5263_s1 + $0xe8] sm:$0xff]   ;;  %v4568_v32 = vld [vmem:[%s5263_s1 + $0xf0] sm:$0xff]   ;;  %s3161_s18 = sshll.u32 %s5267_s5, 3 }
   0xf   : > { %1862 = vmatpush1.bf16.msra.mxu1 %v4038_v5  ;;  %2222 = vmatpush1.bf16.msra.mxu0 %v4424_v6  ;;  %v4064_v33 = vld [vmem:[%s5263_s1 + $0x78] sm:$0xff]   ;;  %v4072_v38 = vld [vmem:[%s5263_s1 + $0x100] sm:$0xff]   ;;  %v4103_v41 = vld [vmem:[%s5263_s1 + $0x108] sm:$0xff]   ;;  %s4977_s21 = scalar_lea.vmem %s5265_s3, %s3161_s18 }
  0x10   : > { %1863 = vmatprep.subr.bf16.mxu1 %v4364_v1  ;;  %2223 = vmatprep.subr.bf16.mxu0 %v4364_v1  ;;  %s4493_s26 = scalar_lea.vmem %s5262_s0, %s4022_s19  ;;  %v4579_v34 = vld [vmem:[%s5263_s1 + $0xf8] sm:$0xff]   ;;  %v4134_v46 = vld [vmem:[%s5263_s1 + $0x110] sm:$0xff]  }
  0x11   : > { %v4068_v19 = vld [vmem:[%s4493_s26 + $0x4] ss:$20 sps:$4 sm:$0xff]   ;;  %v4071_v21 = vld [vmem:[%s4493_s26 + $0xc] ss:$20 sps:$4 sm:$0xff]   ;;  %v4069_v36 = vld [vmem:[%s4493_s26 + $0x8] ss:$20 sps:$4 sm:$0xff]  }
  0x12   : > { %1889 = vmatprep.mubr.bf16.mxu1 %v4068_v19  ;;  %2249 = vmatprep.mubr.bf16.mxu0 %v4071_v21  ;;  %v4066_v35 = vld [vmem:[%s4493_s26] ss:$20 sps:$4 sm:$0xff]   ;;  %v4077_v42 = vld [vmem:[%s4493_s26 + $0x28] ss:$20 sps:$4 sm:$0xff]   ;;  %v4078_v43 = vld [vmem:[%s4493_s26 + $0x30] ss:$20 sps:$4 sm:$0xff]  }
  0x13   : > { %1864 = vmatpush1.bf16.msra.mxu1 %v4040_v7  ;;  %2224 = vmatpush1.bf16.msra.mxu0 %v4435_v8  ;;  %v4073_v37 = vld [vmem:[%s4493_s26 + $0x2c] ss:$20 sps:$4 sm:$0xff]   ;;  %v4075_v40 = vld [vmem:[%s4493_s26 + $0x34] ss:$20 sps:$4 sm:$0xff]   ;;  %v4081_v45 = vld [vmem:[%s4493_s26 + $0x5c] ss:$20 sps:$4 sm:$0xff]  }
  0x14   : > { %1865 = vmatprep.subr.bf16.mxu1 %v4364_v1  ;;  %2225 = vmatprep.subr.bf16.mxu0 %v4364_v1  ;;  %v4079_v44 = vld [vmem:[%s4493_s26 + $0x54] ss:$20 sps:$4 sm:$0xff]   ;;  %v4083_v47 = vld [vmem:[%s4493_s26 + $0x50] ss:$20 sps:$4 sm:$0xff]   ;;  %v4084_v48 = vld [vmem:[%s4493_s26 + $0x58] ss:$20 sps:$4 sm:$0xff]  }
  0x15   : > { %v4085_v49 = vld [vmem:[%s4493_s26 + $0x7c] ss:$20 sps:$4 sm:$0xff]   ;;  %v4087_v50 = vld [vmem:[%s4493_s26 + $0x84] ss:$20 sps:$4 sm:$0xff]   ;;  %v4090_v53 = vld [vmem:[%s4493_s26 + $0x80] ss:$20 sps:$4 sm:$0xff]  }
  0x16   : > { %v4169_v51 = vld [vmem:[%s5263_s1 + $0x118] sm:$0xff]   ;;  %v4093_v55 = vld [vmem:[%s4493_s26 + $0xac] ss:$20 sps:$4 sm:$0xff]   ;;  %v4099_v59 = vld [vmem:[%s4493_s26 + $0xd4] ss:$20 sps:$4 sm:$0xff]  }
  0x17   : > { %1866 = vmatpush1.bf16.msra.mxu1 %v4042_v9  ;;  %2226 = vmatpush1.bf16.msra.mxu0 %v4448_v10  ;;  %v4089_v52 = vld [vmem:[%s4493_s26 + $0x78] ss:$20 sps:$4 sm:$0xff]   ;;  %v4095_v56 = vld [vmem:[%s4493_s26 + $0xa0] ss:$20 sps:$4 sm:$0xff]   ;;  %v4096_v57 = vld [vmem:[%s4493_s26 + $0xa8] ss:$20 sps:$4 sm:$0xff]  }
  0x18   : > { %1867 = vmatprep.subr.bf16.mxu1 %v4364_v1  ;;  %2227 = vmatprep.subr.bf16.mxu0 %v4364_v1  ;;  %v4091_v54 = vld [vmem:[%s4493_s26 + $0xa4] ss:$20 sps:$4 sm:$0xff]   ;;  %v4097_v58 = vld [vmem:[%s4493_s26 + $0xcc] ss:$20 sps:$4 sm:$0xff]   ;;  %v4101_v60 = vld [vmem:[%s4493_s26 + $0xc8] ss:$20 sps:$4 sm:$0xff]  }
  0x19   : > { %v4102_v61 = vld [vmem:[%s4493_s26 + $0xd0] ss:$20 sps:$4 sm:$0xff]   ;;  %v4104_v62 = vld [vmem:[%s4493_s26 + $0xf4] ss:$20 sps:$4 sm:$0xff]   ;;  %v4114_v5 = vld [vmem:[%s4493_s26 + $0x118] ss:$20 sps:$4 sm:$0xff]  }
  0x1a   : > { %v4106_v63 = vld [vmem:[%s4493_s26 + $0xfc] ss:$20 sps:$4 sm:$0xff]   ;;  %v4116_v7 = vld [vmem:[%s4493_s26 + $0x144] ss:$20 sps:$4 sm:$0xff]   ;;  %v4120_v9 = vld [vmem:[%s4493_s26 + $0x140] ss:$20 sps:$4 sm:$0xff]  }
  0x1b   : > { %1868 = vmatpush1.bf16.msra.mxu1 %v4044_v11  ;;  %2228 = vmatpush1.bf16.msra.mxu0 %v4459_v12  ;;  %v4108_v0 = vld [vmem:[%s4493_s26 + $0xf0] ss:$20 sps:$4 sm:$0xff]   ;;  %v4122_v11 = vld [vmem:[%s4493_s26 + $0x16c] ss:$20 sps:$4 sm:$0xff]  }
  0x1c   : > { %1869 = vmatprep.subr.bf16.mxu1 %v4364_v1  ;;  %2229 = vmatprep.subr.bf16.mxu0 %v4364_v1  ;;  %v4110_v3 = vld [vmem:[%s4493_s26 + $0x11c] ss:$20 sps:$4 sm:$0xff]   ;;  %v4137_v19 = vld [vmem:[%s4493_s26 + $0x1c4] ss:$20 sps:$4 sm:$0xff]   ;;  %v4140_v21 = vld [vmem:[%s4493_s26 + $0x1c0] ss:$20 sps:$4 sm:$0xff]  }
  0x1f   : > { %1870 = vmatpush1.bf16.msra.mxu1 %v4046_v13  ;;  %2230 = vmatpush1.bf16.msra.mxu0 %v4472_v14  ;;  %v4126_v13 = vld [vmem:[%s4493_s26 + $0x168] ss:$20 sps:$4 sm:$0xff]  }
  0x20   : > { %1871 = vmatprep.subr.bf16.mxu1 %v4364_v1  ;;  %2231 = vmatprep.subr.bf16.mxu0 %v4364_v1 }
  0x23   : > { %1872 = vmatpush1.bf16.msra.mxu1 %v4048_v15  ;;  %2232 = vmatpush1.bf16.msra.mxu0 %v4484_v16  ;;  %v4128_v15 = vld [vmem:[%s4493_s26 + $0x194] ss:$20 sps:$4 sm:$0xff]  }
  0x24   : > { %1873 = vmatprep.subr.bf16.mxu1 %v4364_v1  ;;  %2233 = vmatprep.subr.bf16.mxu0 %v4364_v1 }
  0x27   : > { %1874 = vmatpush1.bf16.msra.mxu1 %v4050_v17  ;;  %2234 = vmatpush1.bf16.msra.mxu0 %v4500_v18  ;;  %v4133_v17 = vld [vmem:[%s4493_s26 + $0x198] ss:$20 sps:$4 sm:$0xff]  }
  0x28   : > { %1875 = vmatprep.subr.bf16.mxu1 %v4364_v1  ;;  %2235 = vmatprep.subr.bf16.mxu0 %v4364_v1 }
  0x2b   : > { %1876 = vmatpush1.bf16.msra.mxu1 %v4052_v20  ;;  %2236 = vmatpush1.bf16.msra.mxu0 %v4513_v22  ;;  %v4139_v20 = vld [vmem:[%s4493_s26 + $0x1b8] ss:$20 sps:$4 sm:$0xff]  }
  0x2c   : > { %1877 = vmatprep.subr.bf16.mxu1 %v4364_v1  ;;  %2237 = vmatprep.subr.bf16.mxu0 %v4364_v1 }
  0x2f   : > { %1878 = vmatpush1.bf16.msra.mxu1 %v4054_v23  ;;  %2238 = vmatpush1.bf16.msra.mxu0 %v4524_v24  ;;  %v4143_v23 = vld [vmem:[%s4493_s26 + $0x1ec] ss:$20 sps:$4 sm:$0xff]  }
  0x30   : > { %1879 = vmatprep.subr.bf16.mxu1 %v4364_v1  ;;  %2239 = vmatprep.subr.bf16.mxu0 %v4364_v1 }
  0x33   : > { %1880 = vmatpush1.bf16.msra.mxu1 %v4056_v25  ;;  %2240 = vmatpush1.bf16.msra.mxu0 %v4535_v26  ;;  %v4146_v25 = vld [vmem:[%s4493_s26 + $0x1e8] ss:$20 sps:$4 sm:$0xff]  }
  0x34   : > { %1881 = vmatprep.subr.bf16.mxu1 %v4364_v1  ;;  %2241 = vmatprep.subr.bf16.mxu0 %v4364_v1 }
  0x37   : > { %1882 = vmatpush1.bf16.msra.mxu1 %v4058_v27  ;;  %2242 = vmatpush1.bf16.msra.mxu0 %v4546_v28  ;;  %v4149_v27 = vld [vmem:[%s4493_s26 + $0x214] ss:$20 sps:$4 sm:$0xff]  }
  0x38   : > { %1883 = vmatprep.subr.bf16.mxu1 %v4364_v1  ;;  %2243 = vmatprep.subr.bf16.mxu0 %v4364_v1 }
  0x3b   : > { %1884 = vmatpush1.bf16.msra.mxu1 %v4060_v29  ;;  %2244 = vmatpush1.bf16.msra.mxu0 %v4557_v30  ;;  %v4152_v29 = vld [vmem:[%s4493_s26 + $0x210] ss:$20 sps:$4 sm:$0xff]  }
  0x3c   : > { %1885 = vmatprep.subr.bf16.mxu1 %v4364_v1  ;;  %2245 = vmatprep.subr.bf16.mxu0 %v4364_v1 }
  0x3f   : > { %1886 = vmatpush1.bf16.msra.mxu1 %v4062_v31  ;;  %2246 = vmatpush1.bf16.msra.mxu0 %v4568_v32  ;;  %v4155_v31 = vld [vmem:[%s4493_s26 + $0x23c] ss:$20 sps:$4 sm:$0xff]  }
  0x40   : > { %1887 = vmatprep.subr.bf16.mxu1 %v4364_v1  ;;  %2247 = vmatprep.subr.bf16.mxu0 %v4364_v1 }
  0x43   : > { %1888 = vmatpush1.bf16.msra.mxu1 %v4064_v33  ;;  %2248 = vmatpush1.bf16.msra.mxu0 %v4579_v34  ;;  %v4158_v33 = vld [vmem:[%s4493_s26 + $0x238] ss:$20 sps:$4 sm:$0xff]  }
  0x44   : > { %3664 = vmatprep.subr.bf16.mxu1 %v4364_v1  ;;  %3492 = vmatprep.subr.bf16.mxu0 %v4365_v39 }
  0x46   : > { %1890 = vmatmul.mubr.bf16.vlgmr.msra.gmra.mrb[0].mxu1 %v4066_v35  ;;  %2250 = vmatmul.mubr.bf16.vlgmr.msra.gmra.mrb[0].mxu0 %v4069_v36  ;;  %v4161_v35 = vld [vmem:[%s4493_s26 + $0x264] ss:$20 sps:$4 sm:$0xff]  }
  0x47   : > { %1897 = vmatprep.mubr.bf16.mxu1 %v4073_v37  ;;  %3493 = vmatpush3.bf16.msra.mxu0 %v4072_v38  ;;  %v4163_v36 = vld [vmem:[%s4493_s26 + $0x258] ss:$20 sps:$4 sm:$0xff]   ;;  %v4164_v37 = vld [vmem:[%s4493_s26 + $0x260] ss:$20 sps:$4 sm:$0xff]  }
  0x48   : > { %3680 = vmatpush1.bf16.msra.mxu1 %v4403_v2  ;;  %2257 = vmatprep.mubr.bf16.mxu0 %v4075_v40  ;;  %v4109_v2 = vld [vmem:[%s4493_s26 + $0xf8] ss:$20 sps:$4 sm:$0xff]  }
  0x49   : > { %3665 = vmatprep.subr.bf16.mxu1 %v4364_v1  ;;  %3494 = vmatprep.subr.bf16.mxu0 %v4365_v39  ;;  %v4165_v38 = vld [vmem:[%s4493_s26 + $0x284] ss:$20 sps:$4 sm:$0xff]   ;;  %v4167_v40 = vld [vmem:[%s4493_s26 + $0x28c] ss:$20 sps:$4 sm:$0xff]  }
  0x4b   : > { %3495 = vmatpush3.bf16.msra.mxu0 %v4103_v41  ;;  %v4170_v41 = vld [vmem:[%s4493_s26 + $0x280] ss:$20 sps:$4 sm:$0xff]  }
  0x4c   : > { %3681 = vmatpush1.bf16.msra.mxu1 %v4413_v4  ;;  %3496 = vmatprep.subr.bf16.mxu0 %v4365_v39  ;;  %v4112_v4 = vld [vmem:[%s4493_s26 + $0x124] ss:$20 sps:$4 sm:$0xff]  }
  0x4d   : > { %3666 = vmatprep.subr.bf16.mxu1 %v4364_v1 }
  0x4e   : > { %1898 = vmatmul.mubr.bf16.gmra.mrb[4].mxu1 %v4077_v42  ;;  %2258 = vmatmul.mubr.bf16.gmra.mrb[4].mxu0 %v4078_v43  ;;  %v4171_v42 = vld [vmem:[%s4493_s26 + $0x288] ss:$20 sps:$4 sm:$0xff]   ;;  %v4172_v43 = vld [vmem:[%s4493_s26 + $0x2ac] ss:$20 sps:$4 sm:$0xff]  }
  0x4f   : > { %1905 = vmatprep.mubr.bf16.mxu1 %v4079_v44  ;;  %2265 = vmatprep.mubr.bf16.mxu0 %v4081_v45  ;;  %v4174_v44 = vld [vmem:[%s4493_s26 + $0x2b4] ss:$20 sps:$4 sm:$0xff]  }
  0x50   : > { %3682 = vmatpush1.bf16.msra.mxu1 %v4424_v6  ;;  %3497 = vmatpush3.bf16.msra.mxu0 %v4134_v46  ;;  %v4115_v6 = vld [vmem:[%s4493_s26 + $0x120] ss:$20 sps:$4 sm:$0xff]   ;;  %v4176_v45 = vld [vmem:[%s4493_s26 + $0x2a8] ss:$20 sps:$4 sm:$0xff]   ;;  %v4177_v46 = vld [vmem:[%s4493_s26 + $0x2b0] ss:$20 sps:$4 sm:$0xff]  }
  0x51   : > { %3667 = vmatprep.subr.bf16.mxu1 %v4364_v1  ;;  %3498 = vmatprep.subr.bf16.mxu0 %v4365_v39 }
  0x54   : > { %3683 = vmatpush1.bf16.msra.mxu1 %v4435_v8  ;;  %3499 = vmatpush3.bf16.msra.mxu0 %v4169_v51  ;;  %v4118_v8 = vld [vmem:[%s4493_s26 + $0x14c] ss:$20 sps:$4 sm:$0xff]   ;;  %v4184_v51 = vld [vmem:[%s4493_s26 + $0x2fc] ss:$20 sps:$4 sm:$0xff]  }
  0x55   : > { %3668 = vmatprep.subr.bf16.mxu1 %v4364_v1 }
  0x56   : > { %1906 = vmatmul.mubr.bf16.gmra.mrb[8].mxu1 %v4083_v47  ;;  %2266 = vmatmul.mubr.bf16.gmra.mrb[8].mxu0 %v4084_v48  ;;  %v4178_v47 = vld [vmem:[%s4493_s26 + $0x2d4] ss:$20 sps:$4 sm:$0xff]   ;;  %v4180_v48 = vld [vmem:[%s4493_s26 + $0x2dc] ss:$20 sps:$4 sm:$0xff]  }
  0x57   : > { %1913 = vmatprep.mubr.bf16.mxu1 %v4085_v49  ;;  %2273 = vmatprep.mubr.bf16.mxu0 %v4087_v50  ;;  %v4182_v49 = vld [vmem:[%s4493_s26 + $0x2d0] ss:$20 sps:$4 sm:$0xff]   ;;  %v4183_v50 = vld [vmem:[%s4493_s26 + $0x2d8] ss:$20 sps:$4 sm:$0xff]  }
  0x58   : > { %3684 = vmatpush1.bf16.msra.mxu1 %v4448_v10  ;;  %v4121_v10 = vld [vmem:[%s4493_s26 + $0x148] ss:$20 sps:$4 sm:$0xff]  }
  0x59   : > { %3669 = vmatprep.subr.bf16.mxu1 %v4364_v1 }
  0x5c   : > { %3685 = vmatpush1.bf16.msra.mxu1 %v4459_v12  ;;  %v4124_v12 = vld [vmem:[%s4493_s26 + $0x174] ss:$20 sps:$4 sm:$0xff]  }
  0x5d   : > { %3670 = vmatprep.subr.bf16.mxu1 %v4364_v1 }
  0x5e   : > { %1914 = vmatmul.mubr.bf16.gmra.mrb[12].mxu1 %v4089_v52  ;;  %2274 = vmatmul.mubr.bf16.gmra.mrb[12].mxu0 %v4090_v53  ;;  %v4186_v52 = vld [vmem:[%s4493_s26 + $0x304] ss:$20 sps:$4 sm:$0xff]  }
  0x5f   : > { %1921 = vmatprep.mubr.bf16.mxu1 %v4091_v54  ;;  %2281 = vmatprep.mubr.bf16.mxu0 %v4093_v55  ;;  %v4188_v53 = vld [vmem:[%s4493_s26 + $0x2f8] ss:$20 sps:$4 sm:$0xff]   ;;  %v4189_v54 = vld [vmem:[%s4493_s26 + $0x300] ss:$20 sps:$4 sm:$0xff]  }
  0x60   : > { %3686 = vmatpush1.bf16.msra.mxu1 %v4472_v14  ;;  %v4127_v14 = vld [vmem:[%s4493_s26 + $0x170] ss:$20 sps:$4 sm:$0xff]  }
  0x61   : > { %3671 = vmatprep.subr.bf16.mxu1 %v4364_v1  ;;  %v4190_v55 = vld [vmem:[%s4493_s26 + $0x324] ss:$20 sps:$4 sm:$0xff]  }
  0x64   : > { %3687 = vmatpush1.bf16.msra.mxu1 %v4484_v16  ;;  %v4130_v16 = vld [vmem:[%s4493_s26 + $0x19c] ss:$20 sps:$4 sm:$0xff]  }
  0x65   : > { %3672 = vmatprep.subr.bf16.mxu1 %v4364_v1 }
  0x66   : > { %1922 = vmatmul.mubr.bf16.gmra.mrb[16].mxu1 %v4095_v56  ;;  %2282 = vmatmul.mubr.bf16.gmra.mrb[16].mxu0 %v4096_v57  ;;  %v4192_v56 = vld [vmem:[%s4493_s26 + $0x32c] ss:$20 sps:$4 sm:$0xff]  }
  0x67   : > { %1929 = vmatprep.mubr.bf16.mxu1 %v4097_v58  ;;  %2289 = vmatprep.mubr.bf16.mxu0 %v4099_v59  ;;  %v4194_v57 = vld [vmem:[%s4493_s26 + $0x320] ss:$20 sps:$4 sm:$0xff]   ;;  %v4195_v58 = vld [vmem:[%s4493_s26 + $0x328] ss:$20 sps:$4 sm:$0xff]  }
  0x68   : > { %3688 = vmatpush1.bf16.msra.mxu1 %v4500_v18  ;;  %v4135_v18 = vld [vmem:[%s4493_s26 + $0x1bc] ss:$20 sps:$4 sm:$0xff]   ;;  %v4196_v59 = vld [vmem:[%s4493_s26 + $0x34c] ss:$20 sps:$4 sm:$0xff]  }
  0x69   : > { %3673 = vmatprep.subr.bf16.mxu1 %v4364_v1 }
  0x6c   : > { %3689 = vmatpush1.bf16.msra.mxu1 %v4513_v22  ;;  %v4141_v22 = vld [vmem:[%s4493_s26 + $0x1e4] ss:$20 sps:$4 sm:$0xff]  }
  0x6d   : > { %3674 = vmatprep.subr.bf16.mxu1 %v4364_v1 }
  0x6e   : > { %1930 = vmatmul.mubr.bf16.gmra.mrb[20].mxu1 %v4101_v60  ;;  %2290 = vmatmul.mubr.bf16.gmra.mrb[20].mxu0 %v4102_v61  ;;  %v4198_v60 = vld [vmem:[%s4493_s26 + $0x348] ss:$20 sps:$4 sm:$0xff]   ;;  %v4199_v61 = vld [vmem:[%s4493_s26 + $0x10] ss:$20 sps:$4 sm:$0xff]  }
  0x6f   : > { %1937 = vmatprep.mubr.bf16.mxu1 %v4104_v62  ;;  %2297 = vmatprep.mubr.bf16.mxu0 %v4106_v63  ;;  %v4200_v62 = vld [vmem:[%s4493_s26 + $0x374] ss:$20 sps:$4 sm:$0xff]   ;;  %v4202_v63 = vld [vmem:[%s4493_s26 + $0x370] ss:$20 sps:$4 sm:$0xff]  }
  0x70   : > { %3690 = vmatpush1.bf16.msra.mxu1 %v4524_v24  ;;  %v4145_v24 = vld [vmem:[%s4493_s26 + $0x1e0] ss:$20 sps:$4 sm:$0xff]  }
  0x71   : > { %3675 = vmatprep.subr.bf16.mxu1 %v4364_v1 }
  0x74   : > { %3691 = vmatpush1.bf16.msra.mxu1 %v4535_v26  ;;  %v4147_v26 = vld [vmem:[%s4493_s26 + $0x20c] ss:$20 sps:$4 sm:$0xff]  }
  0x75   : > { %3676 = vmatprep.subr.bf16.mxu1 %v4364_v1 }
  0x76   : > { %1938 = vmatmul.mubr.bf16.gmra.mrb[24].mxu1 %v4108_v0  ;;  %2298 = vmatmul.mubr.bf16.gmra.mrb[24].mxu0 %v4109_v2  ;;  %v4203_v0 = vld [vmem:[%s4493_s26 + $0x38] ss:$20 sps:$4 sm:$0xff]   ;;  %v4204_v2 = vld [vmem:[%s4493_s26 + $0x39c] ss:$20 sps:$4 sm:$0xff]  }
  0x77   : > { %1945 = vmatprep.mubr.bf16.mxu1 %v4110_v3  ;;  %2305 = vmatprep.mubr.bf16.mxu0 %v4112_v4  ;;  %v4206_v3 = vld [vmem:[%s4493_s26 + $0x398] ss:$20 sps:$4 sm:$0xff]   ;;  %v4207_v4 = vld [vmem:[%s4493_s26 + $0x60] ss:$20 sps:$4 sm:$0xff]  }
  0x78   : > { %3692 = vmatpush1.bf16.msra.mxu1 %v4546_v28  ;;  %v4151_v28 = vld [vmem:[%s4493_s26 + $0x208] ss:$20 sps:$4 sm:$0xff]  }
  0x79   : > { %3677 = vmatprep.subr.bf16.mxu1 %v4364_v1 }
  0x7c   : > { %3693 = vmatpush1.bf16.msra.mxu1 %v4557_v30  ;;  %v4153_v30 = vld [vmem:[%s4493_s26 + $0x234] ss:$20 sps:$4 sm:$0xff]  }
  0x7d   : > { %3678 = vmatprep.subr.bf16.mxu1 %v4364_v1 }
  0x7e   : > { %1946 = vmatmul.mubr.bf16.gmra.mrb[28].mxu1 %v4114_v5  ;;  %2306 = vmatmul.mubr.bf16.gmra.mrb[28].mxu0 %v4115_v6  ;;  %v4208_v5 = vld [vmem:[%s4493_s26 + $0x3c4] ss:$20 sps:$4 sm:$0xff]   ;;  %v4210_v6 = vld [vmem:[%s4493_s26 + $0x3c0] ss:$20 sps:$4 sm:$0xff]  }
  0x7f   : > { %1953 = vmatprep.mubr.bf16.mxu1 %v4116_v7  ;;  %2313 = vmatprep.mubr.bf16.mxu0 %v4118_v8  ;;  %v4211_v7 = vld [vmem:[%s4493_s26 + $0x88] ss:$20 sps:$4 sm:$0xff]   ;;  %v4212_v8 = vld [vmem:[%s4493_s26 + $0x3ec] ss:$20 sps:$4 sm:$0xff]  }
  0x80   : > { %3694 = vmatpush1.bf16.msra.mxu1 %v4568_v32  ;;  %v4157_v32 = vld [vmem:[%s4493_s26 + $0x230] ss:$20 sps:$4 sm:$0xff]  }
  0x81   : > { %3679 = vmatprep.subr.bf16.mxu1 %v4364_v1  ;;  %v4132_v1 = vld [vmem:[%s4493_s26 + $0x190] ss:$20 sps:$4 sm:$0xff]  }
  0x84   : > { %3695 = vmatpush1.bf16.msra.mxu1 %v4579_v34  ;;  %v4159_v34 = vld [vmem:[%s4493_s26 + $0x25c] ss:$20 sps:$4 sm:$0xff]  }
  0x86   : > { %1954 = vmatmul.mubr.bf16.gmra.mrb[32].mxu1 %v4120_v9  ;;  %2314 = vmatmul.mubr.bf16.gmra.mrb[32].mxu0 %v4121_v10  ;;  %v4214_v9 = vld [vmem:[%s4493_s26 + $0x3e8] ss:$20 sps:$4 sm:$0xff]   ;;  %v4215_v10 = vld [vmem:[%s4493_s26 + $0xb0] ss:$20 sps:$4 sm:$0xff]  }
  0x87   : > { %1961 = vmatprep.mubr.bf16.mxu1 %v4122_v11  ;;  %2321 = vmatprep.mubr.bf16.mxu0 %v4124_v12  ;;  %v4216_v11 = vld [vmem:[%s4493_s26 + $0x414] ss:$20 sps:$4 sm:$0xff]   ;;  %v4218_v12 = vld [vmem:[%s4493_s26 + $0x410] ss:$20 sps:$4 sm:$0xff]  }
  0x8e   : > { %1962 = vmatmul.mubr.bf16.gmra.mrb[36].mxu1 %v4126_v13  ;;  %2322 = vmatmul.mubr.bf16.gmra.mrb[36].mxu0 %v4127_v14  ;;  %v4219_v13 = vld [vmem:[%s4493_s26 + $0xd8] ss:$20 sps:$4 sm:$0xff]   ;;  %v4220_v14 = vld [vmem:[%s4493_s26 + $0x43c] ss:$20 sps:$4 sm:$0xff]  }
  0x8f   : > { %1969 = vmatprep.mubr.bf16.mxu1 %v4128_v15  ;;  %2329 = vmatprep.mubr.bf16.mxu0 %v4130_v16 }
  0x96   : > { %1970 = vmatmul.mubr.bf16.gmra.mrb[40].mxu1 %v4132_v1  ;;  %2330 = vmatmul.mubr.bf16.gmra.mrb[40].mxu0 %v4133_v17  ;;  %v4222_v1 = vld [vmem:[%s4493_s26 + $0x438] ss:$20 sps:$4 sm:$0xff]   ;;  %v4223_v17 = vld [vmem:[%s4493_s26 + $0x100] ss:$20 sps:$4 sm:$0xff]  }
  0x97   : > { %1977 = vmatprep.mubr.bf16.mxu1 %v4135_v18  ;;  %2337 = vmatprep.mubr.bf16.mxu0 %v4137_v19  ;;  %v4224_v19 = vld [vmem:[%s4493_s26 + $0x464] ss:$20 sps:$4 sm:$0xff]  }
  0x9e   : > { %1978 = vmatmul.mubr.bf16.gmra.mrb[44].mxu1 %v4139_v20  ;;  %2338 = vmatmul.mubr.bf16.gmra.mrb[44].mxu0 %v4140_v21 }
  0x9f   : > { %1985 = vmatprep.mubr.bf16.mxu1 %v4141_v22  ;;  %2345 = vmatprep.mubr.bf16.mxu0 %v4143_v23  ;;  %v4226_v23 = vld [vmem:[%s4493_s26 + $0x460] ss:$20 sps:$4 sm:$0xff]  }
  0xa6   : > { %1986 = vmatmul.mubr.bf16.gmra.mrb[48].mxu1 %v4145_v24  ;;  %2346 = vmatmul.mubr.bf16.gmra.mrb[48].mxu0 %v4146_v25  ;;  %v4227_v24 = vld [vmem:[%s4493_s26 + $0x128] ss:$20 sps:$4 sm:$0xff]  }
  0xa7   : > { %1993 = vmatprep.mubr.bf16.mxu1 %v4147_v26  ;;  %2353 = vmatprep.mubr.bf16.mxu0 %v4149_v27  ;;  %v4228_v26 = vld [vmem:[%s4493_s26 + $0x48c] ss:$20 sps:$4 sm:$0xff]  }
  0xae   : > { %1994 = vmatmul.mubr.bf16.gmra.mrb[52].mxu1 %v4151_v28  ;;  %2354 = vmatmul.mubr.bf16.gmra.mrb[52].mxu0 %v4152_v29 }
  0xaf   : > { %2001 = vmatprep.mubr.bf16.mxu1 %v4153_v30  ;;  %2361 = vmatprep.mubr.bf16.mxu0 %v4155_v31  ;;  %v4230_v30 = vld [vmem:[%s4493_s26 + $0x488] ss:$20 sps:$4 sm:$0xff]   ;;  %v4231_v31 = vld [vmem:[%s4493_s26 + $0x150] ss:$20 sps:$4 sm:$0xff]  }
  0xb6   : > { %2002 = vmatmul.mubr.bf16.gmra.mrb[56].mxu1 %v4157_v32  ;;  %2362 = vmatmul.mubr.bf16.gmra.mrb[56].mxu0 %v4158_v33  ;;  %v4232_v33 = vld [vmem:[%s4493_s26 + $0x4b4] ss:$20 sps:$4 sm:$0xff]  }
  0xb7   : > { %2009 = vmatprep.mubr.bf16.mxu1 %v4159_v34  ;;  %2369 = vmatprep.mubr.bf16.mxu0 %v4161_v35 }
  0xbe   : > { %2010 = vmatmul.mubr.bf16.gmra.mrb[60].mxu1 %v4163_v36  ;;  %2370 = vmatmul.mubr.bf16.gmra.mrb[60].mxu0 %v4164_v37  ;;  %v4234_v37 = vld [vmem:[%s4493_s26 + $0x4b0] ss:$20 sps:$4 sm:$0xff]  }
  0xbf   : > { %2017 = vmatprep.mubr.bf16.mxu1 %v4165_v38  ;;  %2377 = vmatprep.mubr.bf16.mxu0 %v4167_v40  ;;  %v4235_v38 = vld [vmem:[%s4493_s26 + $0x178] ss:$20 sps:$4 sm:$0xff]  }
  0xc6   : > { %2018 = vmatmul.mubr.bf16.gmra.mrb[64].mxu1 %v4170_v41  ;;  %2378 = vmatmul.mubr.bf16.gmra.mrb[64].mxu0 %v4171_v42  ;;  %v4236_v41 = vld [vmem:[%s4493_s26 + $0x4dc] ss:$20 sps:$4 sm:$0xff]  }
  0xc7   : > { %2025 = vmatprep.mubr.bf16.mxu1 %v4172_v43  ;;  %2385 = vmatprep.mubr.bf16.mxu0 %v4174_v44 }
  0xce   : > { %2026 = vmatmul.mubr.bf16.gmra.mrb[68].mxu1 %v4176_v45  ;;  %2386 = vmatmul.mubr.bf16.gmra.mrb[68].mxu0 %v4177_v46  ;;  %v4238_v45 = vld [vmem:[%s4493_s26 + $0x4d8] ss:$20 sps:$4 sm:$0xff]   ;;  %v4239_v46 = vld [vmem:[%s4493_s26 + $0x1a0] ss:$20 sps:$4 sm:$0xff]  }
  0xcf   : > { %2033 = vmatprep.mubr.bf16.mxu1 %v4178_v47  ;;  %2393 = vmatprep.mubr.bf16.mxu0 %v4180_v48  ;;  %v4240_v48 = vld [vmem:[%s4493_s26 + $0x504] ss:$20 sps:$4 sm:$0xff]  }
  0xd6   : > { %2034 = vmatmul.mubr.bf16.gmra.mrb[72].mxu1 %v4182_v49  ;;  %2394 = vmatmul.mubr.bf16.gmra.mrb[72].mxu0 %v4183_v50 }
  0xd7   : > { %2041 = vmatprep.mubr.bf16.mxu1 %v4184_v51  ;;  %2401 = vmatprep.mubr.bf16.mxu0 %v4186_v52  ;;  %v4242_v52 = vld [vmem:[%s4493_s26 + $0x500] ss:$20 sps:$4 sm:$0xff]  }
  0xde   : > { %2042 = vmatmul.mubr.bf16.gmra.mrb[76].mxu1 %v4188_v53  ;;  %2402 = vmatmul.mubr.bf16.gmra.mrb[76].mxu0 %v4189_v54  ;;  %v4243_v53 = vld [vmem:[%s4493_s26 + $0x1c8] ss:$20 sps:$4 sm:$0xff]  }
  0xdf   : > { %2049 = vmatprep.mubr.bf16.mxu1 %v4190_v55  ;;  %2409 = vmatprep.mubr.bf16.mxu0 %v4192_v56  ;;  %v4244_v55 = vld [vmem:[%s4493_s26 + $0x52c] ss:$20 sps:$4 sm:$0xff]  }
  0xe6   : > { %2050 = vmatmul.mubr.bf16.gmra.mrb[80].mxu1 %v4194_v57  ;;  %2410 = vmatmul.mubr.bf16.gmra.mrb[80].mxu0 %v4195_v58 }
  0xe7   : > { %2057 = vmatprep.mubr.bf16.mxu1 %v4196_v59  ;;  %3500 = vmatprep.mubr.msk.bf16.mxu0 %vm4366_vm0, %v4365_v39  ;;  %v4246_v59 = vld [vmem:[%s4493_s26 + $0x528] ss:$20 sps:$4 sm:$0xff]  }
  0xee   : > { %2058 = vmatmul.mubr.bf16.gmra.mrb[84].mxu1 %v4198_v60  ;;  %3501 = vmatmul.mubr.msk.bf16.vlgmr.msra.gmra.mrb[0].mxu0 %vm1733_vm1, %v4199_v61  ;;  %v4247_v60 = vld [vmem:[%s4493_s26 + $0x1f0] ss:$20 sps:$4 sm:$0xff]  }
  0xef   : > { %2065 = vmatprep.mubr.bf16.mxu1 %v4200_v62  ;;  %3504 = vmatprep.mubr.msk.bf16.mxu0 %vm4366_vm0, %v4365_v39  ;;  %v4248_v62 = vld [vmem:[%s4493_s26 + $0x554] ss:$20 sps:$4 sm:$0xff]  }
  0xf6   : > { %2066 = vmatmul.mubr.bf16.gmra.mrb[88].mxu1 %v4202_v63  ;;  %3505 = vmatmul.mubr.msk.bf16.gmra.mrb[4].mxu0 %vm1733_vm1, %v4203_v0 }
  0xf7   : > { %2073 = vmatprep.mubr.bf16.mxu1 %v4204_v2  ;;  %3508 = vmatprep.mubr.msk.bf16.mxu0 %vm4366_vm0, %v4365_v39 }
  0xfe   : > { %2074 = vmatmul.mubr.bf16.gmra.mrb[92].mxu1 %v4206_v3  ;;  %3509 = vmatmul.mubr.msk.bf16.gmra.mrb[8].mxu0 %vm1733_vm1, %v4207_v4  ;;  %v4250_v3 = vld [vmem:[%s4493_s26 + $0x550] ss:$20 sps:$4 sm:$0xff]   ;;  %v4251_v4 = vld [vmem:[%s4493_s26 + $0x218] ss:$20 sps:$4 sm:$0xff]  }
  0xff   : > { %2081 = vmatprep.mubr.bf16.mxu1 %v4208_v5  ;;  %3512 = vmatprep.mubr.msk.bf16.mxu0 %vm4366_vm0, %v4365_v39 }
 0x106   : > { %2082 = vmatmul.mubr.bf16.gmra.mrb[96].mxu1 %v4210_v6  ;;  %3513 = vmatmul.mubr.msk.bf16.gmra.mrb[12].mxu0 %vm1733_vm1, %v4211_v7  ;;  %v4252_v6 = vld [vmem:[%s4493_s26 + $0x57c] ss:$20 sps:$4 sm:$0xff]  }
 0x107   : > { %2089 = vmatprep.mubr.bf16.mxu1 %v4212_v8  ;;  %3516 = vmatprep.mubr.msk.bf16.mxu0 %vm4366_vm0, %v4365_v39 }
 0x10e   : > { %2090 = vmatmul.mubr.bf16.gmra.mrb[100].mxu1 %v4214_v9  ;;  %3517 = vmatmul.mubr.msk.bf16.gmra.mrb[16].mxu0 %vm1733_vm1, %v4215_v10  ;;  %v4254_v10 = vld [vmem:[%s4493_s26 + $0x578] ss:$20 sps:$4 sm:$0xff]  }
 0x10f   : > { %2097 = vmatprep.mubr.bf16.mxu1 %v4216_v11  ;;  %3520 = vmatprep.mubr.msk.bf16.mxu0 %vm4366_vm0, %v4365_v39  ;;  %v4255_v11 = vld [vmem:[%s4493_s26 + $0x240] ss:$20 sps:$4 sm:$0xff]  }
 0x116   : > { %2098 = vmatmul.mubr.bf16.gmra.mrb[104].mxu1 %v4218_v12  ;;  %3521 = vmatmul.mubr.msk.bf16.gmra.mrb[20].mxu0 %vm1733_vm1, %v4219_v13  ;;  %v4256_v13 = vld [vmem:[%s4493_s26 + $0x5a4] ss:$20 sps:$4 sm:$0xff]  }
 0x117   : > { %2105 = vmatprep.mubr.bf16.mxu1 %v4220_v14  ;;  %3524 = vmatprep.mubr.msk.bf16.mxu0 %vm4366_vm0, %v4365_v39 }
 0x119   : > { %v4752_v15 = vpop.f32.mrb[0].mxu1 }
 0x11a   : > { %v1893_v16 = vpop.f32.mrb[1].mxu1 }
 0x11b   : > { %v4756_v18 = vpop.f32.mrb[2].mxu1 }
 0x11c   : > { %v1896_v20 = vpop.f32.mrb[3].mxu1 }
 0x11e   : > { %2106 = vmatmul.mubr.bf16.gmra.mrb[108].mxu1 %v4222_v1  ;;  %3525 = vmatmul.mubr.msk.bf16.gmra.mrb[24].mxu0 %vm1733_vm1, %v4223_v17  ;;  %v4258_v17 = vld [vmem:[%s4493_s26 + $0x5a0] ss:$20 sps:$4 sm:$0xff]  }
 0x11f   : > { %2113 = vmatprep.mubr.bf16.mxu1 %v4224_v19  ;;  %3528 = vmatprep.mubr.msk.bf16.mxu0 %vm4366_vm0, %v4365_v39  ;;  %v4259_v19 = vld [vmem:[%s4493_s26 + $0x268] ss:$20 sps:$4 sm:$0xff]  }
 0x121   : > { %v4762_v21 = vpop.f32.mrb[4].mxu1 }
 0x122   : > { %v1901_v22 = vpop.f32.mrb[5].mxu1 }
 0x123   : > { %v4766_v25 = vpop.f32.mrb[6].mxu1  ;;  %v4260_v22 = vld [vmem:[%s4493_s26 + $0x5cc] ss:$20 sps:$4 sm:$0xff]  }
 0x124   : > { %v1904_v27 = vpop.f32.mrb[7].mxu1 }
 0x125   : > { %v4262_v27 = vld [vmem:[%s4493_s26 + $0x5c8] ss:$20 sps:$4 sm:$0xff]  }
 0x126   : > { %2114 = vmatmul.mubr.bf16.gmra.mrb[112].mxu1 %v4226_v23  ;;  %3529 = vmatmul.mubr.msk.bf16.gmra.mrb[28].mxu0 %vm1733_vm1, %v4227_v24 }
 0x127   : > { %2121 = vmatprep.mubr.bf16.mxu1 %v4228_v26  ;;  %3532 = vmatprep.mubr.msk.bf16.mxu0 %vm4366_vm0, %v4365_v39 }
 0x129   : > { %v4772_v28 = vpop.f32.mrb[8].mxu1 }
 0x12a   : > { %v1909_v29 = vpop.f32.mrb[9].mxu1 }
 0x12b   : > { %v4776_v32 = vpop.f32.mrb[10].mxu1  ;;  %v4263_v29 = vld [vmem:[%s4493_s26 + $0x290] ss:$20 sps:$4 sm:$0xff]  }
 0x12c   : > { %v1912_v34 = vpop.f32.mrb[11].mxu1 }
 0x12e   : > { %2122 = vmatmul.mubr.bf16.gmra.mrb[116].mxu1 %v4230_v30  ;;  %3533 = vmatmul.mubr.msk.bf16.gmra.mrb[32].mxu0 %vm1733_vm1, %v4231_v31  ;;  %v4264_v31 = vld [vmem:[%s4493_s26 + $0x5f4] ss:$20 sps:$4 sm:$0xff]  }
 0x12f   : > { %2129 = vmatprep.mubr.bf16.mxu1 %v4232_v33  ;;  %3536 = vmatprep.mubr.msk.bf16.mxu0 %vm4366_vm0, %v4365_v39 }
 0x131   : > { %v4782_v35 = vpop.f32.mrb[12].mxu1 }
 0x132   : > { %v1917_v36 = vpop.f32.mrb[13].mxu1 }
 0x133   : > { %v4786_v40 = vpop.f32.mrb[14].mxu1 }
 0x134   : > { %v1920_v42 = vpop.f32.mrb[15].mxu1 }
 0x135   : > { %v4268_v42 = vld [vmem:[%s4493_s26 + $0x61c] ss:$20 sps:$4 sm:$0xff]  }
 0x136   : > { %2130 = vmatmul.mubr.bf16.gmra.mrb[120].mxu1 %v4234_v37  ;;  %3537 = vmatmul.mubr.msk.bf16.gmra.mrb[36].mxu0 %vm1733_vm1, %v4235_v38  ;;  %v4266_v37 = vld [vmem:[%s4493_s26 + $0x5f0] ss:$20 sps:$4 sm:$0xff]   ;;  %v4267_v38 = vld [vmem:[%s4493_s26 + $0x2b8] ss:$20 sps:$4 sm:$0xff]  }
 0x137   : > { %2137 = vmatprep.mubr.bf16.mxu1 %v4236_v41  ;;  %3540 = vmatprep.mubr.msk.bf16.mxu0 %vm4366_vm0, %v4365_v39 }
 0x139   : > { %v4792_v43 = vpop.f32.mrb[16].mxu1 }
 0x13a   : > { %v1925_v44 = vpop.f32.mrb[17].mxu1 }
 0x13b   : > { %v4796_v47 = vpop.f32.mrb[18].mxu1 }
 0x13c   : > { %v1928_v49 = vpop.f32.mrb[19].mxu1 }
 0x13d   : > { %v4270_v49 = vld [vmem:[%s4493_s26 + $0x618] ss:$20 sps:$4 sm:$0xff]  }
 0x13e   : > { %2138 = vmatmul.mubr.bf16.gmra.mrb[124].mxu1 %v4238_v45  ;;  %3541 = vmatmul.mubr.msk.bf16.gmra.mrb[40].mxu0 %vm1733_vm1, %v4239_v46  ;;  %v418_v45 = vld [vmem:[%s4493_s26 + $0x640] sm:$0xff] }
 0x13f   : > { %2145 = vmatprep.mubr.bf16.mxu1 %v4240_v48  ;;  %3544 = vmatprep.mubr.msk.bf16.mxu0 %vm4366_vm0, %v4365_v39 }
 0x141   : > { %v4802_v50 = vpop.f32.mrb[20].mxu1 }
 0x142   : > { %v1933_v51 = vpop.f32.mrb[21].mxu1 }
 0x143   : > { %v4806_v54 = vpop.f32.mrb[22].mxu1  ;;  %v4271_v51 = vld [vmem:[%s4493_s26 + $0x2e0] ss:$20 sps:$4 sm:$0xff]  }
 0x144   : > { %v1936_v56 = vpop.f32.mrb[23].mxu1 }
 0x146   : > { %2146 = vmatmul.mubr.bf16.gmra.mrb[128].mxu1 %v4242_v52  ;;  %3545 = vmatmul.mubr.msk.bf16.gmra.mrb[44].mxu0 %vm1733_vm1, %v4243_v53  ;;  %v3364_v53 = vcombine.high %v418_v45, %v418_v45 }
 0x147   : > { %2153 = vmatprep.mubr.bf16.mxu1 %v4244_v55  ;;  %3548 = vmatprep.mubr.msk.bf16.mxu0 %vm4366_vm0, %v4365_v39 }
 0x149   : > { %v4812_v57 = vpop.f32.mrb[24].mxu1 }
 0x14a   : > { %v1941_v58 = vpop.f32.mrb[25].mxu1 }
 0x14b   : > { %v4816_v61 = vpop.f32.mrb[26].mxu1 }
 0x14c   : > { %v1944_v63 = vpop.f32.mrb[27].mxu1 }
 0x14d   : > { %v4277_v63 = vld [vmem:[%s4493_s26 + $0x354] ss:$20 sps:$4 sm:$0xff]  }
 0x14e   : > { %2154 = vmatmul.mubr.bf16.gmra.mrb[132].mxu1 %v4246_v59  ;;  %3549 = vmatmul.mubr.msk.bf16.gmra.mrb[48].mxu0 %vm1733_vm1, %v4247_v60  ;;  %v3363_v59 = vcombine.low %v418_v45, %v418_v45  ;;  %v4274_v60 = vld [vmem:[%s4493_s26 + $0x308] ss:$20 sps:$4 sm:$0xff]  }
 0x14f   : > { %2161 = vmatprep.mubr.bf16.mxu1 %v4248_v62  ;;  %3552 = vmatprep.mubr.msk.bf16.mxu0 %vm4366_vm0, %v4365_v39  ;;  %v4290_v45 = vld [vmem:[%s4493_s26 + $0x3a8] ss:$20 sps:$4 sm:$0xff]  }
 0x151   : > { %v4822_v0 = vpop.f32.mrb[28].mxu1 }
 0x152   : > { %v1949_v2 = vpop.f32.mrb[29].mxu1 }
 0x153   : > { %v4826_v5 = vpop.f32.mrb[30].mxu1 }
 0x154   : > { %v1952_v7 = vpop.f32.mrb[31].mxu1 }
 0x155   : > { %v4278_v7 = vld [vmem:[%s4493_s26 + $0x330] ss:$20 sps:$4 sm:$0xff]  }
 0x156   : > { %2162 = vmatmul.mubr.bf16.gmra.mrb[136].mxu1 %v4250_v3  ;;  %3553 = vmatmul.mubr.msk.bf16.gmra.mrb[52].mxu0 %vm1733_vm1, %v4251_v4  ;;  %v4275_v4 = vld [vmem:[%s4493_s26 + $0x350] ss:$20 sps:$4 sm:$0xff]  }
 0x157   : > { %2169 = vmatprep.mubr.bf16.mxu1 %v4252_v6  ;;  %3556 = vmatprep.mubr.msk.bf16.mxu0 %vm4366_vm0, %v4365_v39 }
 0x159   : > { %v4832_v8 = vpop.f32.mrb[32].mxu1 }
 0x15a   : > { %v1957_v9 = vpop.f32.mrb[33].mxu1 }
 0x15b   : > { %v4836_v12 = vpop.f32.mrb[34].mxu1 }
 0x15c   : > { %v1960_v14 = vpop.f32.mrb[35].mxu1 }
 0x15e   : > { %2170 = vmatmul.mubr.bf16.gmra.mrb[140].mxu1 %v4254_v10  ;;  %3557 = vmatmul.mubr.msk.bf16.gmra.mrb[56].mxu0 %vm1733_vm1, %v4255_v11  ;;  %v4279_v10 = vld [vmem:[%s4493_s26 + $0x37c] ss:$20 sps:$4 sm:$0xff]  }
 0x15f   : > { %2177 = vmatprep.mubr.bf16.mxu1 %v4256_v13  ;;  %3560 = vmatprep.mubr.msk.bf16.mxu0 %vm4366_vm0, %v4365_v39 }
 0x161   : > { %v4842_v16 = vpop.f32.mrb[36].mxu1 }
 0x162   : > { %v1965_v1 = vpop.f32.mrb[37].mxu1 }
 0x163   : > { %v4846_v20 = vpop.f32.mrb[38].mxu1  ;;  %v4281_v1 = vld [vmem:[%s4493_s26 + $0x378] ss:$20 sps:$4 sm:$0xff]  }
 0x164   : > { %v1968_v23 = vpop.f32.mrb[39].mxu1 }
 0x166   : > { %2178 = vmatmul.mubr.bf16.gmra.mrb[144].mxu1 %v4258_v17  ;;  %3561 = vmatmul.mubr.msk.bf16.gmra.mrb[60].mxu0 %vm1733_vm1, %v4259_v19  ;;  %v4282_v17 = vld [vmem:[%s4493_s26 + $0x358] ss:$20 sps:$4 sm:$0xff]  }
 0x167   : > { %2185 = vmatprep.mubr.bf16.mxu1 %v4260_v22  ;;  %3564 = vmatprep.mubr.msk.bf16.mxu0 %vm4366_vm0, %v4365_v39  ;;  %v4283_v22 = vld [vmem:[%s4493_s26 + $0x3a4] ss:$20 sps:$4 sm:$0xff]  }
 0x169   : > { %v4852_v24 = vpop.f32.mrb[40].mxu1 }
 0x16a   : > { %v1973_v26 = vpop.f32.mrb[41].mxu1 }
 0x16b   : > { %v4856_v30 = vpop.f32.mrb[42].mxu1 }
 0x16c   : > { %v1976_v33 = vpop.f32.mrb[43].mxu1 }
 0x16e   : > { %2186 = vmatmul.mubr.bf16.gmra.mrb[148].mxu1 %v4262_v27  ;;  %3565 = vmatmul.mubr.msk.bf16.gmra.mrb[64].mxu0 %vm1733_vm1, %v4263_v29  ;;  %v4285_v29 = vld [vmem:[%s4493_s26 + $0x3a0] ss:$20 sps:$4 sm:$0xff]  }
 0x16f   : > { %2193 = vmatprep.mubr.bf16.mxu1 %v4264_v31  ;;  %3568 = vmatprep.mubr.msk.bf16.mxu0 %vm4366_vm0, %v4365_v39  ;;  %v4286_v31 = vld [vmem:[%s4493_s26 + $0x380] ss:$20 sps:$4 sm:$0xff]  }
 0x171   : > { %v4862_v34 = vpop.f32.mrb[44].mxu1 }
 0x172   : > { %v1981_v36 = vpop.f32.mrb[45].mxu1 }
 0x173   : > { %v4866_v41 = vpop.f32.mrb[46].mxu1  ;;  %v4287_v36 = vld [vmem:[%s4493_s26 + $0x3cc] ss:$20 sps:$4 sm:$0xff]  }
 0x174   : > { %v1984_v44 = vpop.f32.mrb[47].mxu1 }
 0x175   : > { %v4289_v44 = vld [vmem:[%s4493_s26 + $0x3c8] ss:$20 sps:$4 sm:$0xff]  }
 0x176   : > { %2194 = vmatmul.mubr.bf16.gmra.mrb[152].mxu1 %v4266_v37  ;;  %3569 = vmatmul.mubr.msk.bf16.gmra.mrb[68].mxu0 %vm1733_vm1, %v4267_v38 }
 0x177   : > { %2201 = vmatprep.mubr.bf16.mxu1 %v4268_v42  ;;  %3572 = vmatprep.mubr.msk.bf16.mxu0 %vm4366_vm0, %v4365_v39 }
 0x179   : > { %v4873_v46 = vpop.f32.mrb[48].mxu1 }
 0x17a   : > { %v1989_v48 = vpop.f32.mrb[49].mxu1 }
 0x17b   : > { %v4877_v52 = vpop.f32.mrb[50].mxu1 }
 0x17c   : > { %v1992_v55 = vpop.f32.mrb[51].mxu1 }
 0x17e   : > { %2202 = vmatmul.mubr.bf16.gmra.mrb[156].mxu1 %v4270_v49  ;;  %3573 = vmatmul.mubr.msk.bf16.gmra.mrb[72].mxu0 %vm1733_vm1, %v4271_v51  ;;  %v4291_v49 = vld [vmem:[%s4493_s26 + $0x3f4] ss:$20 sps:$4 sm:$0xff]  }
 0x17f   : > { %2209 = vmatprep.mubr.bf16.mxu1 %v3364_v53  ;;  %3576 = vmatprep.mubr.msk.bf16.mxu0 %vm4366_vm0, %v4365_v39 }
 0x181   : > { %v4882_v56 = vpop.f32.mrb[52].mxu1 }
 0x182   : > { %v1997_v58 = vpop.f32.mrb[53].mxu1 }
 0x183   : > { %v4885_v62 = vpop.f32.mrb[54].mxu1  ;;  %v4293_v58 = vld [vmem:[%s4493_s26 + $0x3f0] ss:$20 sps:$4 sm:$0xff]  }
 0x184   : > { %v2000_v2 = vpop.f32.mrb[55].mxu1 }
 0x186   : > { %2210 = vmatmul.mubr.bf16.gmra.mrb[160].mxu1 %v3363_v59  ;;  %3577 = vmatmul.mubr.msk.bf16.gmra.mrb[76].mxu0 %vm1733_vm1, %v4274_v60  ;;  %v4294_v59 = vld [vmem:[%s4493_s26 + $0x3d0] ss:$20 sps:$4 sm:$0xff]  }
 0x187   : > { %2417 = vmatprep.mubr.bf16.mxu1 %v4277_v63  ;;  %3580 = vmatprep.mubr.msk.bf16.mxu0 %vm4366_vm0, %v4365_v39  ;;  %v4295_v63 = vld [vmem:[%s4493_s26 + $0x41c] ss:$20 sps:$4 sm:$0xff]  }
 0x189   : > { %v4891_v3 = vpop.f32.mrb[56].mxu1 }
 0x18a   : > { %v2005_v6 = vpop.f32.mrb[57].mxu1 }
 0x18b   : > { %v4895_v9 = vpop.f32.mrb[58].mxu1 }
 0x18c   : > { %v2008_v11 = vpop.f32.mrb[59].mxu1 }
 0x18e   : > { %2418 = vmatmul.mubr.bf16.vlgmr.msra.gmra.mrb[84].mxu1 %v4275_v4  ;;  %3581 = vmatmul.mubr.msk.bf16.gmra.mrb[80].mxu0 %vm1733_vm1, %v4278_v7  ;;  %v4297_v7 = vld [vmem:[%s4493_s26 + $0x418] ss:$20 sps:$4 sm:$0xff]  }
 0x18f   : > { %2425 = vmatprep.mubr.bf16.mxu1 %v4279_v10  ;;  %3584 = vmatprep.mubr.msk.bf16.mxu0 %vm4366_vm0, %v4365_v39  ;;  %v4298_v10 = vld [vmem:[%s4493_s26 + $0x3f8] ss:$20 sps:$4 sm:$0xff]  }
 0x191   : > { %v4901_v13 = vpop.f32.mrb[60].mxu1 }
 0x192   : > { %v2013_v14 = vpop.f32.mrb[61].mxu1 }
 0x193   : > { %v4905_v19 = vpop.f32.mrb[62].mxu1  ;;  %v4299_v14 = vld [vmem:[%s4493_s26 + $0x444] ss:$20 sps:$4 sm:$0xff]  }
 0x194   : > { %v2016_v23 = vpop.f32.mrb[63].mxu1 }
 0x195   : > { %v4301_v23 = vld [vmem:[%s4493_s26 + $0x440] ss:$20 sps:$4 sm:$0xff]  }
 0x196   : > { %2426 = vmatmul.mubr.bf16.gmra.mrb[88].mxu1 %v4281_v1  ;;  %3585 = vmatmul.mubr.msk.bf16.gmra.mrb[84].mxu0 %vm1733_vm1, %v4282_v17 }
 0x197   : > { %2433 = vmatprep.mubr.bf16.mxu1 %v4283_v22  ;;  %3588 = vmatprep.mubr.msk.bf16.mxu0 %vm4366_vm0, %v4365_v39 }
 0x199   : > { %v4911_v26 = vpop.f32.mrb[64].mxu1 }
 0x19a   : > { %v2021_v27 = vpop.f32.mrb[65].mxu1 }
 0x19b   : > { %v4915_v33 = vpop.f32.mrb[66].mxu1  ;;  %v4302_v27 = vld [vmem:[%s4493_s26 + $0x420] ss:$20 sps:$4 sm:$0xff]  }
 0x19c   : > { %v2024_v37 = vpop.f32.mrb[67].mxu1 }
 0x19d   : > { %v4961_v37 = vld [vmem:[%s5264_s2] ss:$0 sm:$0xff] }
 0x19e   : > { %2434 = vmatmul.mubr.bf16.gmra.mrb[92].mxu1 %v4285_v29  ;;  %3589 = vmatmul.mubr.msk.bf16.gmra.mrb[88].mxu0 %vm1733_vm1, %v4286_v31  ;;  %v4303_v31 = vld [vmem:[%s4493_s26 + $0x46c] ss:$20 sps:$4 sm:$0xff]  }
 0x19f   : > { %2441 = vmatprep.mubr.bf16.mxu1 %v4287_v36  ;;  %3592 = vmatprep.mubr.msk.bf16.mxu0 %vm4366_vm0, %v4365_v39 }
 0x1a1   : > { %v4921_v38 = vpop.f32.mrb[68].mxu1 }
 0x1a2   : > { %v2029_v42 = vpop.f32.mrb[69].mxu1 }
 0x1a3   : > { %v4925_v48 = vpop.f32.mrb[70].mxu1  ;;  %v1892_v42 = vadd.f32 %v4961_v37, %v4752_v15 }
 0x1a4   : > { %v2032_v51 = vpop.f32.mrb[71].mxu1 }
 0x1a6   : > { %2442 = vmatmul.mubr.bf16.gmra.mrb[96].mxu1 %v4289_v44  ;;  %3593 = vmatmul.mubr.msk.bf16.gmra.mrb[92].mxu0 %vm1733_vm1, %v4290_v45  ;;  %v4305_v45 = vld [vmem:[%s4493_s26 + $0x468] ss:$20 sps:$4 sm:$0xff]  }
 0x1a7   : > { %2449 = vmatprep.mubr.bf16.mxu1 %v4291_v49  ;;  %3596 = vmatprep.mubr.msk.bf16.mxu0 %vm4366_vm0, %v4365_v39  ;;  %v1895_v49 = vadd.f32 %v4961_v37, %v4756_v18 }
 0x1a9   : > { %v4931_v53 = vpop.f32.mrb[72].mxu1 }
 0x1aa   : > { %v2037_v55 = vpop.f32.mrb[73].mxu1 }
 0x1ab   : > { %v4935_v60 = vpop.f32.mrb[74].mxu1 }
 0x1ac   : > { %v2040_v2 = vpop.f32.mrb[75].mxu1 }
 0x1ae   : > { %2450 = vmatmul.mubr.bf16.gmra.mrb[100].mxu1 %v4293_v58  ;;  %3597 = vmatmul.mubr.msk.bf16.gmra.mrb[96].mxu0 %vm1733_vm1, %v4294_v59  ;;  %v4306_v58 = vld [vmem:[%s4493_s26 + $0x448] ss:$20 sps:$4 sm:$0xff]  }
 0x1af   : > { %2457 = vmatprep.mubr.bf16.mxu1 %v4295_v63  ;;  %3600 = vmatprep.mubr.msk.bf16.mxu0 %vm4366_vm0, %v4365_v39  ;;  %v4307_v59 = vld [vmem:[%s4493_s26 + $0x494] ss:$20 sps:$4 sm:$0xff]  }
 0x1b1   : > { %v4941_v4 = vpop.f32.mrb[76].mxu1 }
 0x1b2   : > { %v2045_v6 = vpop.f32.mrb[77].mxu1 }
 0x1b3   : > { %v4945_v11 = vpop.f32.mrb[78].mxu1 }
 0x1b4   : > { %v2048_v1 = vpop.f32.mrb[79].mxu1 }
 0x1b5   : > { %v1903_v1 = vadd.f32 %v4961_v37, %v4766_v25  ;;  %v1908_v25 = vadd.f32 %v4961_v37, %v4772_v28 }
 0x1b6   : > { %2458 = vmatmul.mubr.bf16.gmra.mrb[104].mxu1 %v4297_v7  ;;  %3601 = vmatmul.mubr.msk.bf16.gmra.mrb[100].mxu0 %vm1733_vm1, %v4298_v10  ;;  %v1900_v7 = vadd.f32 %v4961_v37, %v4762_v21 }
 0x1b7   : > { %2465 = vmatprep.mubr.bf16.mxu1 %v4299_v14  ;;  %3604 = vmatprep.mubr.msk.bf16.mxu0 %vm4366_vm0, %v4365_v39  ;;  %v4309_v14 = vld [vmem:[%s4493_s26 + $0x490] ss:$20 sps:$4 sm:$0xff]  }
 0x1b9   : > { %v4951_v17 = vpop.f32.mrb[80].mxu1 }
 0x1ba   : > { %v2053_v22 = vpop.f32.mrb[81].mxu1 }
 0x1bb   : > { %v4955_v29 = vpop.f32.mrb[82].mxu1 }
 0x1bc   : > { %v2056_v36 = vpop.f32.mrb[83].mxu1 }
 0x1be   : > { %2466 = vmatmul.mubr.bf16.gmra.mrb[108].mxu1 %v4301_v23  ;;  %3605 = vmatmul.mubr.msk.bf16.gmra.mrb[104].mxu0 %vm1733_vm1, %v4302_v27  ;;  %v4310_v27 = vld [vmem:[%s4493_s26 + $0x470] ss:$20 sps:$4 sm:$0xff]  }
 0x1bf   : > { %2473 = vmatprep.mubr.bf16.mxu1 %v4303_v31  ;;  %3608 = vmatprep.mubr.msk.bf16.mxu0 %vm4366_vm0, %v4365_v39  ;;  %v4311_v31 = vld [vmem:[%s4493_s26 + $0x4bc] ss:$20 sps:$4 sm:$0xff]  }
 0x1c1   : > { %v2611_v44 = vpop.f32.mrb[0].mxu0 }
 0x1c2   : > { %v3697_v51 = vadd.f32 %v2611_v44, %v1892_v42  ;;  %v3502_v55 = vpop.f32.mrb[1].mxu0 }
 0x1c3   : > { %v2614_v63 = vpop.f32.mrb[2].mxu0  ;;  %v1911_v55 = vadd.f32 %v4961_v37, %v4776_v32  ;;  %v1916_v32 = vadd.f32 %v4961_v37, %v4782_v35 }
 0x1c4   : > { %v2937_v15 = vmax.f32 %v3697_v51, 0.0  ;;  %v3699_v2 = vadd.f32 %v2614_v63, %v1895_v49  ;;  %v3503_v6 = vpop.f32.mrb[3].mxu0  ;;  %v4313_v51 = vld [vmem:[%s4493_s26 + $0x4b8] ss:$20 sps:$4 sm:$0xff]  }
 0x1c5   : > { %v4314_v63 = vld [vmem:[%s4493_s26 + $0x498] ss:$20 sps:$4 sm:$0xff]  }
 0x1c6   : > { %2474 = vmatmul.mubr.bf16.gmra.mrb[112].mxu1 %v4305_v45  ;;  %3018 = vst [vmem:[%s4977_s21] sm:$0xff] %v2937_v15  ;;  %v2938_v18 = vmax.f32 %v3699_v2, 0.0  ;;  %3609 = vmatmul.mubr.msk.bf16.gmra.mrb[108].mxu0 %vm1733_vm1, %v4306_v58  ;;  %v4315_v15 = vld [vmem:[%s4493_s26 + $0x4e4] ss:$20 sps:$4 sm:$0xff]  }
 0x1c7   : > { %2481 = vmatprep.mubr.bf16.mxu1 %v4307_v59  ;;  %3612 = vmatprep.mubr.msk.bf16.mxu0 %vm4366_vm0, %v4365_v39 }
 0x1c8   : > { %3019 = vst [vmem:[%s4977_s21 + $0x8] sm:$0xff] %v2938_v18 }
 0x1c9   : > { %v2619_v10 = vpop.f32.mrb[4].mxu0 }
 0x1ca   : > { %v3701_v22 = vadd.f32 %v2619_v10, %v1900_v7  ;;  %v3506_v23 = vpop.f32.mrb[5].mxu0 }
 0x1cb   : > { %v2622_v36 = vpop.f32.mrb[6].mxu0 }
 0x1cc   : > { %v2939_v42 = vmax.f32 %v3701_v22, 0.0  ;;  %v3703_v44 = vadd.f32 %v2622_v36, %v1903_v1  ;;  %v3507_v45 = vpop.f32.mrb[7].mxu0  ;;  %v1919_v1 = vadd.f32 %v4961_v37, %v4786_v40  ;;  %v1924_v40 = vadd.f32 %v4961_v37, %v4792_v43 }
 0x1ce   : > { %2482 = vmatmul.mubr.bf16.gmra.mrb[116].mxu1 %v4309_v14  ;;  %3020 = vst [vmem:[%s4977_s21 + $0x10] sm:$0xff] %v2939_v42  ;;  %v2940_v21 = vmax.f32 %v3703_v44, 0.0  ;;  %3613 = vmatmul.mubr.msk.bf16.gmra.mrb[112].mxu0 %vm1733_vm1, %v4310_v27  ;;  %v4317_v14 = vld [vmem:[%s4493_s26 + $0x4e0] ss:$20 sps:$4 sm:$0xff]  }
 0x1cf   : > { %2489 = vmatprep.mubr.bf16.mxu1 %v4311_v31  ;;  %3616 = vmatprep.mubr.msk.bf16.mxu0 %vm4366_vm0, %v4365_v39  ;;  %v4318_v27 = vld [vmem:[%s4493_s26 + $0x4c0] ss:$20 sps:$4 sm:$0xff]  }
 0x1d0   : > { %3021 = vst [vmem:[%s4977_s21 + $0x18] sm:$0xff] %v2940_v21  ;;  %v4319_v31 = vld [vmem:[%s4493_s26 + $0x50c] ss:$20 sps:$4 sm:$0xff]  }
 0x1d1   : > { %v2627_v49 = vpop.f32.mrb[8].mxu0 }
 0x1d2   : > { %v3705_v58 = vadd.f32 %v2627_v49, %v1908_v25  ;;  %v3510_v59 = vpop.f32.mrb[9].mxu0  ;;  %v4321_v25 = vld [vmem:[%s4493_s26 + $0x508] ss:$20 sps:$4 sm:$0xff]   ;;  %v1927_v49 = vadd.f32 %v4961_v37, %v4796_v47  ;;  %v1932_v47 = vadd.f32 %v4961_v37, %v4802_v50 }
 0x1d3   : > { %v2630_v2 = vpop.f32.mrb[10].mxu0  ;;  %v4323_v59 = vld [vmem:[%s4493_s26 + $0x534] ss:$20 sps:$4 sm:$0xff]  }
 0x1d4   : > { %v2941_v6 = vmax.f32 %v3705_v58, 0.0  ;;  %v3707_v18 = vadd.f32 %v2630_v2, %v1911_v55  ;;  %v3511_v7 = vpop.f32.mrb[11].mxu0  ;;  %v4322_v58 = vld [vmem:[%s4493_s26 + $0x4e8] ss:$20 sps:$4 sm:$0xff]  }
 0x1d5   : > { %v4325_v7 = vld [vmem:[%s4493_s26 + $0x530] ss:$20 sps:$4 sm:$0xff]  }
 0x1d6   : > { %2490 = vmatmul.mubr.bf16.gmra.mrb[120].mxu1 %v4313_v51  ;;  %3022 = vst [vmem:[%s4977_s21 + $0x20] sm:$0xff] %v2941_v6  ;;  %v2942_v28 = vmax.f32 %v3707_v18, 0.0  ;;  %3617 = vmatmul.mubr.msk.bf16.gmra.mrb[116].mxu0 %vm1733_vm1, %v4314_v63 }
 0x1d7   : > { %2497 = vmatprep.mubr.bf16.mxu1 %v4315_v15  ;;  %3620 = vmatprep.mubr.msk.bf16.mxu0 %vm4366_vm0, %v4365_v39 }
 0x1d8   : > { %3023 = vst [vmem:[%s4977_s21 + $0x28] sm:$0xff] %v2942_v28  ;;  %v1935_v28 = vadd.f32 %v4961_v37, %v4806_v54  ;;  %v1940_v54 = vadd.f32 %v4961_v37, %v4812_v57 }
 0x1d9   : > { %v2635_v10 = vpop.f32.mrb[12].mxu0 }
 0x1da   : > { %v3709_v22 = vadd.f32 %v2635_v10, %v1916_v32  ;;  %v3514_v23 = vpop.f32.mrb[13].mxu0 }
 0x1db   : > { %v2638_v36 = vpop.f32.mrb[14].mxu0 }
 0x1dc   : > { %v2943_v42 = vmax.f32 %v3709_v22, 0.0  ;;  %v3711_v44 = vadd.f32 %v2638_v36, %v1919_v1  ;;  %v3515_v45 = vpop.f32.mrb[15].mxu0  ;;  %v4327_v1 = vld [vmem:[%s4493_s26 + $0x55c] ss:$20 sps:$4 sm:$0xff]  }
 0x1de   : > { %2498 = vmatmul.mubr.bf16.gmra.mrb[124].mxu1 %v4317_v14  ;;  %3024 = vst [vmem:[%s4977_s21 + $0x30] sm:$0xff] %v2943_v42  ;;  %v2944_v35 = vmax.f32 %v3711_v44, 0.0  ;;  %3621 = vmatmul.mubr.msk.bf16.gmra.mrb[120].mxu0 %vm1733_vm1, %v4318_v27  ;;  %v4326_v14 = vld [vmem:[%s4493_s26 + $0x510] ss:$20 sps:$4 sm:$0xff]   ;;  %v4329_v42 = vld [vmem:[%s4493_s26 + $0x558] ss:$20 sps:$4 sm:$0xff]   ;;  %v1943_v44 = vadd.f32 %v4961_v37, %v4816_v61  ;;  %v1948_v61 = vadd.f32 %v4961_v37, %v4822_v0 }
 0x1df   : > { %2505 = vmatprep.mubr.bf16.mxu1 %v4319_v31  ;;  %3624 = vmatprep.mubr.msk.bf16.mxu0 %vm4366_vm0, %v4365_v39 }
 0x1e0   : > { %3025 = vst [vmem:[%s4977_s21 + $0x38] sm:$0xff] %v2944_v35 }
 0x1e1   : > { %v2643_v21 = vpop.f32.mrb[16].mxu0 }
 0x1e2   : > { %v3713_v51 = vadd.f32 %v2643_v21, %v1924_v40  ;;  %v3518_v55 = vpop.f32.mrb[17].mxu0  ;;  %v4330_v40 = vld [vmem:[%s4493_s26 + $0x538] ss:$20 sps:$4 sm:$0xff]  }
 0x1e3   : > { %v2646_v63 = vpop.f32.mrb[18].mxu0  ;;  %v4331_v21 = vld [vmem:[%s4493_s26 + $0x584] ss:$20 sps:$4 sm:$0xff]  }
 0x1e4   : > { %v2945_v15 = vmax.f32 %v3713_v51, 0.0  ;;  %v3715_v2 = vadd.f32 %v2646_v63, %v1927_v49  ;;  %v3519_v6 = vpop.f32.mrb[19].mxu0  ;;  %v1951_v63 = vadd.f32 %v4961_v37, %v4826_v5  ;;  %v1956_v5 = vadd.f32 %v4961_v37, %v4832_v8 }
 0x1e5   : > { %v4334_v6 = vld [vmem:[%s4493_s26 + $0x560] ss:$20 sps:$4 sm:$0xff]  }
 0x1e6   : > { %2506 = vmatmul.mubr.bf16.gmra.mrb[128].mxu1 %v4321_v25  ;;  %3026 = vst [vmem:[%s4977_s21 + $0x40] sm:$0xff] %v2945_v15  ;;  %v2946_v43 = vmax.f32 %v3715_v2, 0.0  ;;  %3625 = vmatmul.mubr.msk.bf16.gmra.mrb[124].mxu0 %vm1733_vm1, %v4322_v58 }
 0x1e7   : > { %2513 = vmatprep.mubr.bf16.mxu1 %v4323_v59  ;;  %3628 = vmatprep.mubr.msk.bf16.mxu0 %vm4366_vm0, %v4365_v39  ;;  %v4333_v59 = vld [vmem:[%s4493_s26 + $0x580] ss:$20 sps:$4 sm:$0xff]  }
 0x1e8   : > { %3027 = vst [vmem:[%s4977_s21 + $0x48] sm:$0xff] %v2946_v43  ;;  %v4335_v43 = vld [vmem:[%s4493_s26 + $0x5ac] ss:$20 sps:$4 sm:$0xff]  }
 0x1e9   : > { %v2651_v18 = vpop.f32.mrb[20].mxu0 }
 0x1ea   : > { %v3717_v32 = vadd.f32 %v2651_v18, %v1932_v47  ;;  %v3522_v10 = vpop.f32.mrb[21].mxu0 }
 0x1eb   : > { %v2654_v22 = vpop.f32.mrb[22].mxu0  ;;  %v4337_v10 = vld [vmem:[%s4493_s26 + $0x5a8] ss:$20 sps:$4 sm:$0xff]  }
 0x1ec   : > { %v2947_v23 = vmax.f32 %v3717_v32, 0.0  ;;  %v3719_v27 = vadd.f32 %v2654_v22, %v1935_v28  ;;  %v3523_v31 = vpop.f32.mrb[23].mxu0 }
 0x1ee   : > { %2514 = vmatmul.mubr.bf16.gmra.mrb[132].mxu1 %v4325_v7  ;;  %3028 = vst [vmem:[%s4977_s21 + $0x50] sm:$0xff] %v2947_v23  ;;  %v2948_v50 = vmax.f32 %v3719_v27, 0.0  ;;  %3629 = vmatmul.mubr.msk.bf16.gmra.mrb[128].mxu0 %vm1733_vm1, %v4326_v14  ;;  %v1959_v14 = vadd.f32 %v4961_v37, %v4836_v12  ;;  %v4338_v23 = vld [vmem:[%s4493_s26 + $0x588] ss:$20 sps:$4 sm:$0xff]   ;;  %v1964_v12 = vadd.f32 %v4961_v37, %v4842_v16 }
 0x1ef   : > { %2521 = vmatprep.mubr.bf16.mxu1 %v4327_v1  ;;  %3632 = vmatprep.mubr.msk.bf16.mxu0 %vm4366_vm0, %v4365_v39  ;;  %v4339_v27 = vld [vmem:[%s4493_s26 + $0x5d4] ss:$20 sps:$4 sm:$0xff]  }
 0x1f0   : > { %3029 = vst [vmem:[%s4977_s21 + $0x58] sm:$0xff] %v2948_v50 }
 0x1f1   : > { %v2659_v36 = vpop.f32.mrb[24].mxu0 }
 0x1f2   : > { %v3721_v45 = vadd.f32 %v2659_v36, %v1940_v54  ;;  %v3526_v35 = vpop.f32.mrb[25].mxu0 }
 0x1f3   : > { %v2662_v25 = vpop.f32.mrb[26].mxu0 }
 0x1f4   : > { %v2949_v49 = vmax.f32 %v3721_v45, 0.0  ;;  %v3723_v51 = vadd.f32 %v2662_v25, %v1943_v44  ;;  %v3527_v55 = vpop.f32.mrb[27].mxu0  ;;  %v4341_v44 = vld [vmem:[%s4493_s26 + $0x5d0] ss:$20 sps:$4 sm:$0xff]   ;;  %v1967_v45 = vadd.f32 %v4961_v37, %v4846_v20  ;;  %v1972_v20 = vadd.f32 %v4961_v37, %v4852_v24 }
 0x1f5   : > { %v4343_v25 = vld [vmem:[%s4493_s26 + $0x5fc] ss:$20 sps:$4 sm:$0xff]  }
 0x1f6   : > { %2522 = vmatmul.mubr.bf16.gmra.mrb[136].mxu1 %v4329_v42  ;;  %3030 = vst [vmem:[%s4977_s21 + $0x60] sm:$0xff] %v2949_v49  ;;  %v2950_v57 = vmax.f32 %v3723_v51, 0.0  ;;  %3633 = vmatmul.mubr.msk.bf16.gmra.mrb[132].mxu0 %vm1733_vm1, %v4330_v40 }
 0x1f7   : > { %2529 = vmatprep.mubr.bf16.mxu1 %v4331_v21  ;;  %3636 = vmatprep.mubr.msk.bf16.mxu0 %vm4366_vm0, %v4365_v39  ;;  %v4342_v21 = vld [vmem:[%s4493_s26 + $0x5b0] ss:$20 sps:$4 sm:$0xff]  }
 0x1f8   : > { %3031 = vst [vmem:[%s4977_s21 + $0x68] sm:$0xff] %v2950_v57 }
 0x1f9   : > { %v2667_v58 = vpop.f32.mrb[28].mxu0 }
 0x1fa   : > { %v3725_v15 = vadd.f32 %v2667_v58, %v1948_v61  ;;  %v3530_v2 = vpop.f32.mrb[29].mxu0  ;;  %v4345_v58 = vld [vmem:[%s4493_s26 + $0x5f8] ss:$20 sps:$4 sm:$0xff]  }
 0x1fb   : > { %v2670_v47 = vpop.f32.mrb[30].mxu0  ;;  %v4346_v2 = vld [vmem:[%s4493_s26 + $0x5d8] ss:$20 sps:$4 sm:$0xff]  }
 0x1fc   : > { %v2951_v18 = vmax.f32 %v3725_v15, 0.0  ;;  %v3727_v7 = vadd.f32 %v2670_v47, %v1951_v63  ;;  %v3531_v28 = vpop.f32.mrb[31].mxu0 }
 0x1fd   : > { %v1980_v28 = vadd.f32 %v4961_v37, %v4862_v34  ;;  %v1988_v34 = vadd.f32 %v4961_v37, %v4873_v46  ;;  %v1996_v46 = vadd.f32 %v4961_v37, %v4882_v56  ;;  %v2004_v56 = vadd.f32 %v4961_v37, %v4891_v3 }
 0x1fe   : > { %2530 = vmatmul.mubr.bf16.gmra.mrb[140].mxu1 %v4333_v59  ;;  %3032 = vst [vmem:[%s4977_s21 + $0x70] sm:$0xff] %v2951_v18  ;;  %v2952_v0 = vmax.f32 %v3727_v7, 0.0  ;;  %3637 = vmatmul.mubr.msk.bf16.gmra.mrb[136].mxu0 %vm1733_vm1, %v4334_v6  ;;  %v1975_v59 = vadd.f32 %v4961_v37, %v4856_v30  ;;  %v4347_v6 = vld [vmem:[%s4493_s26 + $0x624] ss:$20 sps:$4 sm:$0xff]   ;;  %v419_v30 = vld [vmem:[%s4493_s26 + $0x648] sm:$0xff] }
 0x1ff   : > { %2537 = vmatprep.mubr.bf16.mxu1 %v4335_v43  ;;  %3640 = vmatprep.mubr.msk.bf16.mxu0 %vm4366_vm0, %v4365_v39 }
 0x200   : > { %3033 = vst [vmem:[%s4977_s21 + $0x78] sm:$0xff] %v2952_v0 }
 0x201   : > { %v2675_v32 = vpop.f32.mrb[32].mxu0 }
 0x202   : > { %v3729_v1 = vadd.f32 %v2675_v32, %v1956_v5  ;;  %v3534_v22 = vpop.f32.mrb[33].mxu0  ;;  %v4349_v5 = vld [vmem:[%s4493_s26 + $0x620] ss:$20 sps:$4 sm:$0xff]   ;;  %v1983_v32 = vadd.f32 %v4961_v37, %v4866_v41 }
 0x203   : > { %v2678_v31 = vpop.f32.mrb[34].mxu0  ;;  %v3366_v22 = vcombine.high %v419_v30, %v419_v30 }
 0x204   : > { %v2953_v50 = vmax.f32 %v3729_v1, 0.0  ;;  %v3731_v54 = vadd.f32 %v2678_v31, %v1959_v14  ;;  %v3535_v36 = vpop.f32.mrb[35].mxu0  ;;  %v4350_v1 = vld [vmem:[%s4493_s26 + $0x600] ss:$20 sps:$4 sm:$0xff]  }
 0x205   : > { %v3365_v36 = vcombine.low %v419_v30, %v419_v30 }
 0x206   : > { %2538 = vmatmul.mubr.bf16.gmra.mrb[144].mxu1 %v4337_v10  ;;  %3034 = vst [vmem:[%s4977_s21 + $0x80] sm:$0xff] %v2953_v50  ;;  %v2954_v8 = vmax.f32 %v3731_v54, 0.0  ;;  %3641 = vmatmul.mubr.msk.bf16.gmra.mrb[140].mxu0 %vm1733_vm1, %v4338_v23 }
 0x207   : > { %2545 = vmatprep.mubr.bf16.mxu1 %v4339_v27  ;;  %3644 = vmatprep.mubr.msk.bf16.mxu0 %vm4366_vm0, %v4365_v39 }
 0x208   : > { %3035 = vst [vmem:[%s4977_s21 + $0x88] sm:$0xff] %v2954_v8  ;;  %v1991_v8 = vadd.f32 %v4961_v37, %v4877_v52 }
 0x209   : > { %v2683_v42 = vpop.f32.mrb[36].mxu0 }
 0x20a   : > { %v3733_v35 = vadd.f32 %v2683_v42, %v1964_v12  ;;  %v3538_v40 = vpop.f32.mrb[37].mxu0 }
 0x20b   : > { %v2686_v49 = vpop.f32.mrb[38].mxu0 }
 0x20c   : > { %v2955_v51 = vmax.f32 %v3733_v35, 0.0  ;;  %v3735_v55 = vadd.f32 %v2686_v49, %v1967_v45  ;;  %v3539_v57 = vpop.f32.mrb[39].mxu0  ;;  %v1999_v49 = vadd.f32 %v4961_v37, %v4885_v62  ;;  %v2007_v62 = vadd.f32 %v4961_v37, %v4895_v9 }
 0x20d   : > { %v4354_v57 = vld [vmem:[%s4493_s26 + $0x650] ss:$0 sps:$4 sm:$0xff]  }
 0x20e   : > { %2546 = vmatmul.mubr.bf16.gmra.mrb[148].mxu1 %v4341_v44  ;;  %3036 = vst [vmem:[%s4977_s21 + $0x90] sm:$0xff] %v2955_v51  ;;  %v2956_v16 = vmax.f32 %v3735_v55, 0.0  ;;  %3645 = vmatmul.mubr.msk.bf16.gmra.mrb[144].mxu0 %vm1733_vm1, %v4342_v21  ;;  %v4353_v44 = vld [vmem:[%s4493_s26 + $0x628] ss:$20 sps:$4 sm:$0xff]  }
 0x20f   : > { %2553 = vmatprep.mubr.bf16.mxu1 %v4343_v25  ;;  %3648 = vmatprep.mubr.msk.bf16.mxu0 %vm4366_vm0, %v4365_v39 }
 0x210   : > { %3037 = vst [vmem:[%s4977_s21 + $0x98] sm:$0xff] %v2956_v16 }
 0x211   : > { %v2691_v61 = vpop.f32.mrb[40].mxu0 }
 0x212   : > { %v3737_v63 = vadd.f32 %v2691_v61, %v1972_v20  ;;  %v3542_v15 = vpop.f32.mrb[41].mxu0 }
 0x213   : > { %v2694_v43 = vpop.f32.mrb[42].mxu0 }
 0x214   : > { %v2957_v47 = vmax.f32 %v3737_v63, 0.0  ;;  %v3739_v18 = vadd.f32 %v2694_v43, %v1975_v59  ;;  %v3543_v7 = vpop.f32.mrb[43].mxu0 }
 0x215   : > { %v2012_v7 = vadd.f32 %v4961_v37, %v4901_v13 }
 0x216   : > { %2554 = vmatmul.mubr.bf16.gmra.mrb[152].mxu1 %v4345_v58  ;;  %3038 = vst [vmem:[%s4977_s21 + $0xa0] sm:$0xff] %v2957_v47  ;;  %v2958_v24 = vmax.f32 %v3739_v18, 0.0  ;;  %3649 = vmatmul.mubr.msk.bf16.gmra.mrb[148].mxu0 %vm1733_vm1, %v4346_v2 }
 0x217   : > { %2561 = vmatprep.mubr.bf16.mxu1 %v4347_v6  ;;  %3652 = vmatprep.mubr.msk.bf16.mxu0 %vm4366_vm0, %v4365_v39 }
 0x218   : > { %3039 = vst [vmem:[%s4977_s21 + $0xa8] sm:$0xff] %v2958_v24  ;;  %v2015_v24 = vadd.f32 %v4961_v37, %v4905_v19 }
 0x219   : > { %v2699_v0 = vpop.f32.mrb[44].mxu0 }
 0x21a   : > { %v3741_v10 = vadd.f32 %v2699_v0, %v1980_v28  ;;  %v3546_v14 = vpop.f32.mrb[45].mxu0 }
 0x21b   : > { %v2702_v23 = vpop.f32.mrb[46].mxu0  ;;  %v2020_v14 = vadd.f32 %v4961_v37, %v4911_v26 }
 0x21c   : > { %v2959_v27 = vmax.f32 %v3741_v10, 0.0  ;;  %v3743_v31 = vadd.f32 %v2702_v23, %v1983_v32  ;;  %v3547_v50 = vpop.f32.mrb[47].mxu0 }
 0x21e   : > { %2562 = vmatmul.mubr.bf16.gmra.mrb[156].mxu1 %v4349_v5  ;;  %3040 = vst [vmem:[%s4977_s21 + $0xb0] sm:$0xff] %v2959_v27  ;;  %v2960_v54 = vmax.f32 %v3743_v31, 0.0  ;;  %3653 = vmatmul.mubr.msk.bf16.gmra.mrb[152].mxu0 %vm1733_vm1, %v4350_v1  ;;  %v2023_v1 = vadd.f32 %v4961_v37, %v4915_v33 }
 0x21f   : > { %2569 = vmatprep.mubr.bf16.mxu1 %v3366_v22  ;;  %3656 = vmatprep.mubr.msk.bf16.mxu0 %vm4366_vm0, %v4365_v39 }
 0x220   : > { %3041 = vst [vmem:[%s4977_s21 + $0xb8] sm:$0xff] %v2960_v54 }
 0x221   : > { %v2707_v41 = vpop.f32.mrb[48].mxu0 }
 0x222   : > { %v3745_v12 = vadd.f32 %v2707_v41, %v1988_v34  ;;  %v3550_v42 = vpop.f32.mrb[49].mxu0  ;;  %v2028_v34 = vadd.f32 %v4961_v37, %v4921_v38  ;;  %v2031_v41 = vadd.f32 %v4961_v37, %v4925_v48 }
 0x223   : > { %v2710_v45 = vpop.f32.mrb[50].mxu0 }
 0x224   : > { %v2961_v35 = vmax.f32 %v3745_v12, 0.0  ;;  %v3747_v40 = vadd.f32 %v2710_v45, %v1991_v8  ;;  %v3551_v21 = vpop.f32.mrb[51].mxu0 }
 0x226   : > { %2570 = vmatmul.mubr.bf16.gmra.mrb[160].mxu1 %v3365_v36  ;;  %3042 = vst [vmem:[%s4977_s21 + $0xc0] sm:$0xff] %v2961_v35  ;;  %v2962_v25 = vmax.f32 %v3747_v40, 0.0  ;;  %3657 = vmatmul.mubr.msk.bf16.gmra.mrb[156].mxu0 %vm1733_vm1, %v4353_v44  ;;  %v2036_v35 = vadd.f32 %v4961_v37, %v4931_v53  ;;  %v2039_v40 = vadd.f32 %v4961_v37, %v4935_v60 }
 0x227   : > { %3660 = vmatprep.mubr.msk.bf16.mxu0 %vm4366_vm0, %v4365_v39 }
 0x228   : > { %3043 = vst [vmem:[%s4977_s21 + $0xc8] sm:$0xff] %v2962_v25 }
 0x229   : > { %v2715_v52 = vpop.f32.mrb[52].mxu0 }
 0x22a   : > { %v3749_v51 = vadd.f32 %v2715_v52, %v1996_v46  ;;  %v3554_v55 = vpop.f32.mrb[53].mxu0 }
 0x22b   : > { %v2718_v16 = vpop.f32.mrb[54].mxu0  ;;  %v2044_v55 = vadd.f32 %v4961_v37, %v4941_v4 }
 0x22c   : > { %v2963_v20 = vmax.f32 %v3749_v51, 0.0  ;;  %v3751_v61 = vadd.f32 %v2718_v16, %v1999_v49  ;;  %v3555_v58 = vpop.f32.mrb[55].mxu0 }
 0x22e   : > { %3044 = vst [vmem:[%s4977_s21 + $0xd0] sm:$0xff] %v2963_v20  ;;  %v2964_v39 = vmax.f32 %v3751_v61, 0.0  ;;  %3661 = vmatmul.mubr.msk.bf16.gmra.mrb[160].mxu0 %vm1733_vm1, %v4354_v57  ;;  %v2047_v57 = vadd.f32 %v4961_v37, %v4945_v11  ;;  %v2055_v11 = vadd.f32 %v4961_v37, %v4955_v29 }
 0x230   : > { %3045 = vst [vmem:[%s4977_s21 + $0xd8] sm:$0xff] %v2964_v39 }
 0x231   : > { %v2723_v59 = vpop.f32.mrb[56].mxu0 }
 0x232   : > { %v3753_v63 = vadd.f32 %v2723_v59, %v2004_v56  ;;  %v3558_v15 = vpop.f32.mrb[57].mxu0  ;;  %v2052_v59 = vadd.f32 %v4961_v37, %v4951_v17 }
 0x233   : > { %v2726_v2 = vpop.f32.mrb[58].mxu0 }
 0x234   : > { %v2965_v6 = vmax.f32 %v3753_v63, 0.0  ;;  %v3755_v43 = vadd.f32 %v2726_v2, %v2007_v62  ;;  %v3559_v47 = vpop.f32.mrb[59].mxu0 }
 0x236   : > { %3046 = vst [vmem:[%s4977_s21 + $0xe0] sm:$0xff] %v2965_v6  ;;  %v2966_v18 = vmax.f32 %v3755_v43, 0.0 }
 0x238   : > { %3047 = vst [vmem:[%s4977_s21 + $0xe8] sm:$0xff] %v2966_v18 }
 0x239   : > { %v2731_v3 = vpop.f32.mrb[60].mxu0 }
 0x23a   : > { %v3757_v30 = vadd.f32 %v2731_v3, %v2012_v7  ;;  %v3562_v9 = vpop.f32.mrb[61].mxu0 }
 0x23b   : > { %v2734_v28 = vpop.f32.mrb[62].mxu0 }
 0x23c   : > { %v2967_v0 = vmax.f32 %v3757_v30, 0.0  ;;  %v3759_v5 = vadd.f32 %v2734_v28, %v2015_v24  ;;  %v3563_v32 = vpop.f32.mrb[63].mxu0 }
 0x23e   : > { %3048 = vst [vmem:[%s4977_s21 + $0xf0] sm:$0xff] %v2967_v0  ;;  %v2968_v10 = vmax.f32 %v3759_v5, 0.0 }
 0x240   : > { %3049 = vst [vmem:[%s4977_s21 + $0xf8] sm:$0xff] %v2968_v10 }
 0x241   : > { %v2739_v13 = vpop.f32.mrb[64].mxu0 }
 0x242   : > { %v3761_v22 = vadd.f32 %v2739_v13, %v2020_v14  ;;  %v3566_v19 = vpop.f32.mrb[65].mxu0 }
 0x243   : > { %v2742_v23 = vpop.f32.mrb[66].mxu0 }
 0x244   : > { %v2969_v27 = vmax.f32 %v3761_v22, 0.0  ;;  %v3763_v31 = vadd.f32 %v2742_v23, %v2023_v1  ;;  %v3567_v50 = vpop.f32.mrb[67].mxu0 }
 0x246   : > { %3050 = vst [vmem:[%s4977_s21 + $0x100] sm:$0xff] %v2969_v27  ;;  %v2970_v54 = vmax.f32 %v3763_v31, 0.0 }
 0x248   : > { %3051 = vst [vmem:[%s4977_s21 + $0x108] sm:$0xff] %v2970_v54 }
 0x249   : > { %v2747_v26 = vpop.f32.mrb[68].mxu0 }
 0x24a   : > { %v3765_v36 = vadd.f32 %v2747_v26, %v2028_v34  ;;  %v3570_v33 = vpop.f32.mrb[69].mxu0 }
 0x24b   : > { %v2750_v8 = vpop.f32.mrb[70].mxu0 }
 0x24c   : > { %v2971_v12 = vmax.f32 %v3765_v36, 0.0  ;;  %v3767_v42 = vadd.f32 %v2750_v8, %v2031_v41  ;;  %v3571_v44 = vpop.f32.mrb[71].mxu0 }
 0x24e   : > { %3052 = vst [vmem:[%s4977_s21 + $0x110] sm:$0xff] %v2971_v12  ;;  %v2972_v45 = vmax.f32 %v3767_v42, 0.0 }
 0x250   : > { %3053 = vst [vmem:[%s4977_s21 + $0x118] sm:$0xff] %v2972_v45 }
 0x251   : > { %v2755_v38 = vpop.f32.mrb[72].mxu0 }
 0x252   : > { %v3769_v21 = vadd.f32 %v2755_v38, %v2036_v35  ;;  %v3574_v48 = vpop.f32.mrb[73].mxu0 }
 0x253   : > { %v2758_v25 = vpop.f32.mrb[74].mxu0 }
 0x254   : > { %v2973_v46 = vmax.f32 %v3769_v21, 0.0  ;;  %v3771_v52 = vadd.f32 %v2758_v25, %v2039_v40  ;;  %v3575_v49 = vpop.f32.mrb[75].mxu0 }
 0x256   : > { %3054 = vst [vmem:[%s4977_s21 + $0x120] sm:$0xff] %v2973_v46  ;;  %v2974_v51 = vmax.f32 %v3771_v52, 0.0 }
 0x258   : > { %3055 = vst [vmem:[%s4977_s21 + $0x128] sm:$0xff] %v2974_v51 }
 0x259   : > { %v2763_v53 = vpop.f32.mrb[76].mxu0 }
 0x25a   : > { %v3773_v16 = vadd.f32 %v2763_v53, %v2044_v55  ;;  %v3578_v60 = vpop.f32.mrb[77].mxu0 }
 0x25b   : > { %v2766_v20 = vpop.f32.mrb[78].mxu0 }
 0x25c   : > { %v2975_v61 = vmax.f32 %v3773_v16, 0.0  ;;  %v3775_v58 = vadd.f32 %v2766_v20, %v2047_v57  ;;  %v3579_v39 = vpop.f32.mrb[79].mxu0 }
 0x25e   : > { %3056 = vst [vmem:[%s4977_s21 + $0x130] sm:$0xff] %v2975_v61  ;;  %v2976_v56 = vmax.f32 %v3775_v58, 0.0 }
 0x260   : > { %3057 = vst [vmem:[%s4977_s21 + $0x138] sm:$0xff] %v2976_v56 }
 0x261   : > { %v2419_v4 = vpop.f32.mrb[84].mxu1  ;;  %v2771_v62 = vpop.f32.mrb[80].mxu0 }
 0x262   : > { %v2421_v63 = vpop.f32.mrb[85].mxu1  ;;  %v3777_v15 = vadd.f32 %v2771_v62, %v2052_v59  ;;  %v3582_v2 = vpop.f32.mrb[81].mxu0  ;;  %v3780_v17 = vadd.f32 %v4961_v37, %v2419_v4 }
 0x263   : > { %v2422_v6 = vpop.f32.mrb[86].mxu1  ;;  %v2774_v43 = vpop.f32.mrb[82].mxu0 }
 0x264   : > { %v2424_v47 = vpop.f32.mrb[87].mxu1  ;;  %v2977_v18 = vmax.f32 %v3777_v15, 0.0  ;;  %v3779_v7 = vadd.f32 %v2774_v43, %v2055_v11  ;;  %v3583_v3 = vpop.f32.mrb[83].mxu0  ;;  %v3782_v29 = vadd.f32 %v4961_v37, %v2422_v6 }
 0x266   : > { %3058 = vst [vmem:[%s4977_s21 + $0x140] sm:$0xff] %v2977_v18  ;;  %v2978_v24 = vmax.f32 %v3779_v7, 0.0 }
 0x268   : > { %3059 = vst [vmem:[%s4977_s21 + $0x148] sm:$0xff] %v2978_v24 }
 0x269   : > { %v2427_v30 = vpop.f32.mrb[88].mxu1  ;;  %v2779_v9 = vpop.f32.mrb[84].mxu0 }
 0x26a   : > { %v2429_v28 = vpop.f32.mrb[89].mxu1  ;;  %v3781_v0 = vadd.f32 %v3780_v17, %v2779_v9  ;;  %v3586_v5 = vpop.f32.mrb[85].mxu0  ;;  %v3784_v23 = vadd.f32 %v4961_v37, %v2427_v30 }
 0x26b   : > { %v2430_v32 = vpop.f32.mrb[90].mxu1  ;;  %v2782_v10 = vpop.f32.mrb[86].mxu0 }
 0x26c   : > { %v2432_v14 = vpop.f32.mrb[91].mxu1  ;;  %v2979_v13 = vmax.f32 %v3781_v0, 0.0  ;;  %v3783_v1 = vadd.f32 %v3782_v29, %v2782_v10  ;;  %v3587_v22 = vpop.f32.mrb[87].mxu0  ;;  %v3786_v54 = vadd.f32 %v4961_v37, %v2430_v32 }
 0x26e   : > { %3060 = vst [vmem:[%s4977_s21 + $0x150] sm:$0xff] %v2979_v13  ;;  %v2980_v19 = vmax.f32 %v3783_v1, 0.0 }
 0x270   : > { %3061 = vst [vmem:[%s4977_s21 + $0x158] sm:$0xff] %v2980_v19 }
 0x271   : > { %v2435_v27 = vpop.f32.mrb[92].mxu1  ;;  %v2787_v31 = vpop.f32.mrb[88].mxu0 }
 0x272   : > { %v2437_v50 = vpop.f32.mrb[93].mxu1  ;;  %v3785_v34 = vadd.f32 %v3784_v23, %v2787_v31  ;;  %v3590_v26 = vpop.f32.mrb[89].mxu0  ;;  %v3788_v45 = vadd.f32 %v4961_v37, %v2435_v27 }
 0x273   : > { %v2438_v41 = vpop.f32.mrb[94].mxu1  ;;  %v2790_v36 = vpop.f32.mrb[90].mxu0 }
 0x274   : > { %v2440_v33 = vpop.f32.mrb[95].mxu1  ;;  %v2981_v8 = vmax.f32 %v3785_v34, 0.0  ;;  %v3787_v12 = vadd.f32 %v3786_v54, %v2790_v36  ;;  %v3591_v42 = vpop.f32.mrb[91].mxu0  ;;  %v3790_v21 = vadd.f32 %v4961_v37, %v2438_v41 }
 0x276   : > { %3062 = vst [vmem:[%s4977_s21 + $0x160] sm:$0xff] %v2981_v8  ;;  %v2982_v44 = vmax.f32 %v3787_v12, 0.0 }
 0x278   : > { %3063 = vst [vmem:[%s4977_s21 + $0x168] sm:$0xff] %v2982_v44 }
 0x279   : > { %v2443_v35 = vpop.f32.mrb[96].mxu1  ;;  %v2795_v38 = vpop.f32.mrb[92].mxu0 }
 0x27a   : > { %v2445_v40 = vpop.f32.mrb[97].mxu1  ;;  %v3789_v48 = vadd.f32 %v3788_v45, %v2795_v38  ;;  %v3594_v25 = vpop.f32.mrb[93].mxu0  ;;  %v3792_v16 = vadd.f32 %v4961_v37, %v2443_v35 }
 0x27b   : > { %v2446_v46 = vpop.f32.mrb[98].mxu1  ;;  %v2798_v52 = vpop.f32.mrb[94].mxu0 }
 0x27c   : > { %v2448_v49 = vpop.f32.mrb[99].mxu1  ;;  %v2983_v51 = vmax.f32 %v3789_v48, 0.0  ;;  %v3791_v55 = vadd.f32 %v3790_v21, %v2798_v52  ;;  %v3595_v53 = vpop.f32.mrb[95].mxu0  ;;  %v3794_v58 = vadd.f32 %v4961_v37, %v2446_v46 }
 0x27e   : > { %3064 = vst [vmem:[%s4977_s21 + $0x170] sm:$0xff] %v2983_v51  ;;  %v2984_v57 = vmax.f32 %v3791_v55, 0.0 }
 0x280   : > { %3065 = vst [vmem:[%s4977_s21 + $0x178] sm:$0xff] %v2984_v57 }
 0x281   : > { %v2451_v60 = vpop.f32.mrb[100].mxu1  ;;  %v2803_v20 = vpop.f32.mrb[96].mxu0 }
 0x282   : > { %v2453_v61 = vpop.f32.mrb[101].mxu1  ;;  %v3793_v39 = vadd.f32 %v3792_v16, %v2803_v20  ;;  %v3598_v56 = vpop.f32.mrb[97].mxu0  ;;  %v3796_v6 = vadd.f32 %v4961_v37, %v2451_v60 }
 0x283   : > { %v2454_v59 = vpop.f32.mrb[102].mxu1  ;;  %v2806_v4 = vpop.f32.mrb[98].mxu0 }
 0x284   : > { %v2456_v62 = vpop.f32.mrb[103].mxu1  ;;  %v2985_v63 = vmax.f32 %v3793_v39, 0.0  ;;  %v3795_v11 = vadd.f32 %v3794_v58, %v2806_v4  ;;  %v3599_v15 = vpop.f32.mrb[99].mxu0  ;;  %v3798_v7 = vadd.f32 %v4961_v37, %v2454_v59 }
 0x286   : > { %3066 = vst [vmem:[%s4977_s21 + $0x180] sm:$0xff] %v2985_v63  ;;  %v2986_v2 = vmax.f32 %v3795_v11, 0.0 }
 0x288   : > { %3067 = vst [vmem:[%s4977_s21 + $0x188] sm:$0xff] %v2986_v2 }
 0x289   : > { %v2459_v43 = vpop.f32.mrb[104].mxu1  ;;  %v2811_v47 = vpop.f32.mrb[100].mxu0 }
 0x28a   : > { %v2461_v18 = vpop.f32.mrb[105].mxu1  ;;  %v3797_v3 = vadd.f32 %v3796_v6, %v2811_v47  ;;  %v3602_v24 = vpop.f32.mrb[101].mxu0  ;;  %v3800_v32 = vadd.f32 %v4961_v37, %v2459_v43 }
 0x28b   : > { %v2462_v17 = vpop.f32.mrb[106].mxu1  ;;  %v2814_v30 = vpop.f32.mrb[102].mxu0 }
 0x28c   : > { %v2464_v9 = vpop.f32.mrb[107].mxu1  ;;  %v2987_v28 = vmax.f32 %v3797_v3, 0.0  ;;  %v3799_v29 = vadd.f32 %v3798_v7, %v2814_v30  ;;  %v3603_v0 = vpop.f32.mrb[103].mxu0  ;;  %v3802_v1 = vadd.f32 %v4961_v37, %v2462_v17 }
 0x28e   : > { %3068 = vst [vmem:[%s4977_s21 + $0x190] sm:$0xff] %v2987_v28  ;;  %v2988_v5 = vmax.f32 %v3799_v29, 0.0 }
 0x290   : > { %3069 = vst [vmem:[%s4977_s21 + $0x198] sm:$0xff] %v2988_v5 }
 0x291   : > { %v2467_v10 = vpop.f32.mrb[108].mxu1  ;;  %v2819_v14 = vpop.f32.mrb[104].mxu0 }
 0x292   : > { %v2469_v13 = vpop.f32.mrb[109].mxu1  ;;  %v3801_v22 = vadd.f32 %v3800_v32, %v2819_v14  ;;  %v3606_v19 = vpop.f32.mrb[105].mxu0  ;;  %v3804_v41 = vadd.f32 %v4961_v37, %v2467_v10 }
 0x293   : > { %v2470_v23 = vpop.f32.mrb[110].mxu1  ;;  %v2822_v27 = vpop.f32.mrb[106].mxu0 }
 0x294   : > { %v2472_v31 = vpop.f32.mrb[111].mxu1  ;;  %v2989_v50 = vmax.f32 %v3801_v22, 0.0  ;;  %v3803_v54 = vadd.f32 %v3802_v1, %v2822_v27  ;;  %v3607_v34 = vpop.f32.mrb[107].mxu0  ;;  %v3806_v12 = vadd.f32 %v4961_v37, %v2470_v23  ;;  %v5218_v23 = vld [vmem:[%s5264_s2] ss:$0 sm:$0xff] }
 0x296   : > { %3070 = vst [vmem:[%s4977_s21 + $0x1a0] sm:$0xff] %v2989_v50  ;;  %v2990_v26 = vmax.f32 %v3803_v54, 0.0 }
 0x298   : > { %3071 = vst [vmem:[%s4977_s21 + $0x1a8] sm:$0xff] %v2990_v26 }
 0x299   : > { %v2475_v36 = vpop.f32.mrb[112].mxu1  ;;  %v2827_v33 = vpop.f32.mrb[108].mxu0 }
 0x29a   : > { %v2477_v8 = vpop.f32.mrb[113].mxu1  ;;  %v3805_v42 = vadd.f32 %v3804_v41, %v2827_v33  ;;  %v3610_v44 = vpop.f32.mrb[109].mxu0  ;;  %v3808_v46 = vadd.f32 %v4961_v37, %v2475_v36 }
 0x29b   : > { %v2478_v45 = vpop.f32.mrb[114].mxu1  ;;  %v2830_v35 = vpop.f32.mrb[110].mxu0 }
 0x29c   : > { %v2480_v38 = vpop.f32.mrb[115].mxu1  ;;  %v2991_v40 = vmax.f32 %v3805_v42, 0.0  ;;  %v3807_v21 = vadd.f32 %v3806_v12, %v2830_v35  ;;  %v3611_v48 = vpop.f32.mrb[111].mxu0  ;;  %v3810_v55 = vadd.f32 %v4961_v37, %v2478_v45 }
 0x29e   : > { %3072 = vst [vmem:[%s4977_s21 + $0x1b0] sm:$0xff] %v2991_v40  ;;  %v2992_v25 = vmax.f32 %v3807_v21, 0.0 }
 0x2a0   : > { %3073 = vst [vmem:[%s4977_s21 + $0x1b8] sm:$0xff] %v2992_v25 }
 0x2a1   : > { %v2483_v52 = vpop.f32.mrb[116].mxu1  ;;  %v2835_v49 = vpop.f32.mrb[112].mxu0 }
 0x2a2   : > { %v2485_v51 = vpop.f32.mrb[117].mxu1  ;;  %v3809_v53 = vadd.f32 %v3808_v46, %v2835_v49  ;;  %v3614_v57 = vpop.f32.mrb[113].mxu0  ;;  %v3812_v59 = vadd.f32 %v4961_v37, %v2483_v52 }
 0x2a3   : > { %v2486_v16 = vpop.f32.mrb[118].mxu1  ;;  %v2838_v60 = vpop.f32.mrb[114].mxu0 }
 0x2a4   : > { %v2488_v20 = vpop.f32.mrb[119].mxu1  ;;  %v2993_v61 = vmax.f32 %v3809_v53, 0.0  ;;  %v3811_v58 = vadd.f32 %v3810_v55, %v2838_v60  ;;  %v3615_v39 = vpop.f32.mrb[115].mxu0  ;;  %v3814_v11 = vadd.f32 %v4961_v37, %v2486_v16 }
 0x2a6   : > { %3074 = vst [vmem:[%s4977_s21 + $0x1c0] sm:$0xff] %v2993_v61  ;;  %v2994_v56 = vmax.f32 %v3811_v58, 0.0 }
 0x2a8   : > { %3075 = vst [vmem:[%s4977_s21 + $0x1c8] sm:$0xff] %v2994_v56 }
 0x2a9   : > { %v2491_v4 = vpop.f32.mrb[120].mxu1  ;;  %v2843_v62 = vpop.f32.mrb[116].mxu0 }
 0x2aa   : > { %v2493_v63 = vpop.f32.mrb[121].mxu1  ;;  %v3813_v15 = vadd.f32 %v3812_v59, %v2843_v62  ;;  %v3618_v2 = vpop.f32.mrb[117].mxu0  ;;  %v3816_v17 = vadd.f32 %v4961_v37, %v2491_v4 }
 0x2ab   : > { %v2494_v6 = vpop.f32.mrb[122].mxu1  ;;  %v2846_v43 = vpop.f32.mrb[118].mxu0 }
 0x2ac   : > { %v2496_v47 = vpop.f32.mrb[123].mxu1  ;;  %v2995_v18 = vmax.f32 %v3813_v15, 0.0  ;;  %v3815_v7 = vadd.f32 %v3814_v11, %v2846_v43  ;;  %v3619_v3 = vpop.f32.mrb[119].mxu0  ;;  %v3818_v29 = vadd.f32 %v4961_v37, %v2494_v6 }
 0x2ae   : > { %3076 = vst [vmem:[%s4977_s21 + $0x1d0] sm:$0xff] %v2995_v18  ;;  %v2996_v24 = vmax.f32 %v3815_v7, 0.0 }
 0x2b0   : > { %3077 = vst [vmem:[%s4977_s21 + $0x1d8] sm:$0xff] %v2996_v24 }
 0x2b1   : > { %v2499_v30 = vpop.f32.mrb[124].mxu1  ;;  %v2851_v9 = vpop.f32.mrb[120].mxu0 }
 0x2b2   : > { %v2501_v28 = vpop.f32.mrb[125].mxu1  ;;  %v3817_v0 = vadd.f32 %v3816_v17, %v2851_v9  ;;  %v3622_v5 = vpop.f32.mrb[121].mxu0  ;;  %v3820_v27 = vadd.f32 %v5218_v23, %v2499_v30 }
 0x2b3   : > { %v2502_v32 = vpop.f32.mrb[126].mxu1  ;;  %v2854_v10 = vpop.f32.mrb[122].mxu0 }
 0x2b4   : > { %v2504_v14 = vpop.f32.mrb[127].mxu1  ;;  %v2997_v13 = vmax.f32 %v3817_v0, 0.0  ;;  %v3819_v1 = vadd.f32 %v3818_v29, %v2854_v10  ;;  %v3623_v22 = vpop.f32.mrb[123].mxu0  ;;  %v3822_v54 = vadd.f32 %v5218_v23, %v2502_v32 }
 0x2b6   : > { %3078 = vst [vmem:[%s4977_s21 + $0x1e0] sm:$0xff] %v2997_v13  ;;  %v2998_v19 = vmax.f32 %v3819_v1, 0.0 }
 0x2b8   : > { %3079 = vst [vmem:[%s4977_s21 + $0x1e8] sm:$0xff] %v2998_v19 }
 0x2b9   : > { %v2507_v37 = vpop.f32.mrb[128].mxu1  ;;  %v2859_v31 = vpop.f32.mrb[124].mxu0 }
 0x2ba   : > { %v2509_v50 = vpop.f32.mrb[129].mxu1  ;;  %v3821_v34 = vadd.f32 %v3820_v27, %v2859_v31  ;;  %v3626_v26 = vpop.f32.mrb[125].mxu0  ;;  %v3824_v45 = vadd.f32 %v5218_v23, %v2507_v37 }
 0x2bb   : > { %v2510_v41 = vpop.f32.mrb[130].mxu1  ;;  %v2862_v36 = vpop.f32.mrb[126].mxu0 }
 0x2bc   : > { %v2512_v33 = vpop.f32.mrb[131].mxu1  ;;  %v2999_v8 = vmax.f32 %v3821_v34, 0.0  ;;  %v3823_v12 = vadd.f32 %v3822_v54, %v2862_v36  ;;  %v3627_v42 = vpop.f32.mrb[127].mxu0  ;;  %v3826_v21 = vadd.f32 %v5218_v23, %v2510_v41 }
 0x2be   : > { %3080 = vst [vmem:[%s4977_s21 + $0x1f0] sm:$0xff] %v2999_v8  ;;  %v3000_v44 = vmax.f32 %v3823_v12, 0.0 }
 0x2c0   : > { %3081 = vst [vmem:[%s4977_s21 + $0x1f8] sm:$0xff] %v3000_v44 }
 0x2c1   : > { %v2515_v35 = vpop.f32.mrb[132].mxu1  ;;  %v2867_v38 = vpop.f32.mrb[128].mxu0 }
 0x2c2   : > { %v2517_v40 = vpop.f32.mrb[133].mxu1  ;;  %v3825_v48 = vadd.f32 %v3824_v45, %v2867_v38  ;;  %v3630_v25 = vpop.f32.mrb[129].mxu0  ;;  %v3828_v16 = vadd.f32 %v5218_v23, %v2515_v35 }
 0x2c3   : > { %v2518_v46 = vpop.f32.mrb[134].mxu1  ;;  %v2870_v52 = vpop.f32.mrb[130].mxu0 }
 0x2c4   : > { %v2520_v49 = vpop.f32.mrb[135].mxu1  ;;  %v3001_v51 = vmax.f32 %v3825_v48, 0.0  ;;  %v3827_v55 = vadd.f32 %v3826_v21, %v2870_v52  ;;  %v3631_v53 = vpop.f32.mrb[131].mxu0  ;;  %v3830_v58 = vadd.f32 %v5218_v23, %v2518_v46 }
 0x2c6   : > { %3082 = vst [vmem:[%s4977_s21 + $0x200] sm:$0xff] %v3001_v51  ;;  %v3002_v57 = vmax.f32 %v3827_v55, 0.0 }
 0x2c8   : > { %3083 = vst [vmem:[%s4977_s21 + $0x208] sm:$0xff] %v3002_v57 }
 0x2c9   : > { %v2523_v60 = vpop.f32.mrb[136].mxu1  ;;  %v2875_v20 = vpop.f32.mrb[132].mxu0 }
 0x2ca   : > { %v2525_v61 = vpop.f32.mrb[137].mxu1  ;;  %v3829_v39 = vadd.f32 %v3828_v16, %v2875_v20  ;;  %v3634_v56 = vpop.f32.mrb[133].mxu0  ;;  %v3832_v6 = vadd.f32 %v5218_v23, %v2523_v60 }
 0x2cb   : > { %v2526_v59 = vpop.f32.mrb[138].mxu1  ;;  %v2878_v4 = vpop.f32.mrb[134].mxu0 }
 0x2cc   : > { %v2528_v62 = vpop.f32.mrb[139].mxu1  ;;  %v3003_v63 = vmax.f32 %v3829_v39, 0.0  ;;  %v3831_v11 = vadd.f32 %v3830_v58, %v2878_v4  ;;  %v3635_v15 = vpop.f32.mrb[135].mxu0  ;;  %v3834_v7 = vadd.f32 %v5218_v23, %v2526_v59 }
 0x2ce   : > { %3084 = vst [vmem:[%s4977_s21 + $0x210] sm:$0xff] %v3003_v63  ;;  %v3004_v2 = vmax.f32 %v3831_v11, 0.0 }
 0x2d0   : > { %3085 = vst [vmem:[%s4977_s21 + $0x218] sm:$0xff] %v3004_v2 }
 0x2d1   : > { %v2531_v43 = vpop.f32.mrb[140].mxu1  ;;  %v2883_v47 = vpop.f32.mrb[136].mxu0 }
 0x2d2   : > { %v2533_v18 = vpop.f32.mrb[141].mxu1  ;;  %v3833_v3 = vadd.f32 %v3832_v6, %v2883_v47  ;;  %v3638_v24 = vpop.f32.mrb[137].mxu0  ;;  %v3836_v32 = vadd.f32 %v5218_v23, %v2531_v43 }
 0x2d3   : > { %v2534_v17 = vpop.f32.mrb[142].mxu1  ;;  %v2886_v30 = vpop.f32.mrb[138].mxu0 }
 0x2d4   : > { %v2536_v9 = vpop.f32.mrb[143].mxu1  ;;  %v3005_v28 = vmax.f32 %v3833_v3, 0.0  ;;  %v3835_v29 = vadd.f32 %v3834_v7, %v2886_v30  ;;  %v3639_v0 = vpop.f32.mrb[139].mxu0  ;;  %v3838_v1 = vadd.f32 %v5218_v23, %v2534_v17 }
 0x2d6   : > { %3086 = vst [vmem:[%s4977_s21 + $0x220] sm:$0xff] %v3005_v28  ;;  %v3006_v5 = vmax.f32 %v3835_v29, 0.0 }
 0x2d8   : > { %3087 = vst [vmem:[%s4977_s21 + $0x228] sm:$0xff] %v3006_v5 }
 0x2d9   : > { %v2539_v10 = vpop.f32.mrb[144].mxu1  ;;  %v2891_v14 = vpop.f32.mrb[140].mxu0 }
 0x2da   : > { %v2541_v13 = vpop.f32.mrb[145].mxu1  ;;  %v3837_v22 = vadd.f32 %v3836_v32, %v2891_v14  ;;  %v3642_v19 = vpop.f32.mrb[141].mxu0  ;;  %v3840_v41 = vadd.f32 %v5218_v23, %v2539_v10 }
 0x2db   : > { %v2542_v27 = vpop.f32.mrb[146].mxu1  ;;  %v2894_v37 = vpop.f32.mrb[142].mxu0 }
 0x2dc   : > { %v2544_v31 = vpop.f32.mrb[147].mxu1  ;;  %v3007_v50 = vmax.f32 %v3837_v22, 0.0  ;;  %v3839_v54 = vadd.f32 %v3838_v1, %v2894_v37  ;;  %v3643_v34 = vpop.f32.mrb[143].mxu0  ;;  %v3842_v12 = vadd.f32 %v5218_v23, %v2542_v27 }
 0x2de   : > { %3088 = vst [vmem:[%s4977_s21 + $0x230] sm:$0xff] %v3007_v50  ;;  %v3008_v26 = vmax.f32 %v3839_v54, 0.0 }
 0x2e0   : > { %3089 = vst [vmem:[%s4977_s21 + $0x238] sm:$0xff] %v3008_v26 }
 0x2e1   : > { %v2547_v36 = vpop.f32.mrb[148].mxu1  ;;  %v2899_v33 = vpop.f32.mrb[144].mxu0 }
 0x2e2   : > { %v2549_v8 = vpop.f32.mrb[149].mxu1  ;;  %v3841_v42 = vadd.f32 %v3840_v41, %v2899_v33  ;;  %v3646_v44 = vpop.f32.mrb[145].mxu0  ;;  %v3844_v46 = vadd.f32 %v5218_v23, %v2547_v36 }
 0x2e3   : > { %v2550_v45 = vpop.f32.mrb[150].mxu1  ;;  %v2902_v35 = vpop.f32.mrb[146].mxu0 }
 0x2e4   : > { %v2552_v38 = vpop.f32.mrb[151].mxu1  ;;  %v3009_v40 = vmax.f32 %v3841_v42, 0.0  ;;  %v3843_v21 = vadd.f32 %v3842_v12, %v2902_v35  ;;  %v3647_v48 = vpop.f32.mrb[147].mxu0  ;;  %v3846_v55 = vadd.f32 %v5218_v23, %v2550_v45 }
 0x2e6   : > { %3090 = vst [vmem:[%s4977_s21 + $0x240] sm:$0xff] %v3009_v40  ;;  %v3010_v25 = vmax.f32 %v3843_v21, 0.0 }
 0x2e8   : > { %3091 = vst [vmem:[%s4977_s21 + $0x248] sm:$0xff] %v3010_v25 }
 0x2e9   : > { %v2555_v52 = vpop.f32.mrb[152].mxu1  ;;  %v2907_v49 = vpop.f32.mrb[148].mxu0 }
 0x2ea   : > { %v2557_v51 = vpop.f32.mrb[153].mxu1  ;;  %v3845_v53 = vadd.f32 %v3844_v46, %v2907_v49  ;;  %v3650_v57 = vpop.f32.mrb[149].mxu0  ;;  %v3848_v59 = vadd.f32 %v5218_v23, %v2555_v52 }
 0x2eb   : > { %v2558_v16 = vpop.f32.mrb[154].mxu1  ;;  %v2910_v60 = vpop.f32.mrb[150].mxu0 }
 0x2ec   : > { %v2560_v20 = vpop.f32.mrb[155].mxu1  ;;  %v3011_v61 = vmax.f32 %v3845_v53, 0.0  ;;  %v3847_v58 = vadd.f32 %v3846_v55, %v2910_v60  ;;  %v3651_v39 = vpop.f32.mrb[151].mxu0  ;;  %v3850_v11 = vadd.f32 %v5218_v23, %v2558_v16 }
 0x2ee   : > { %3092 = vst [vmem:[%s4977_s21 + $0x250] sm:$0xff] %v3011_v61  ;;  %v3012_v56 = vmax.f32 %v3847_v58, 0.0 }
 0x2f0   : > { %3093 = vst [vmem:[%s4977_s21 + $0x258] sm:$0xff] %v3012_v56 }
 0x2f1   : > { %v2563_v4 = vpop.f32.mrb[156].mxu1  ;;  %v2915_v62 = vpop.f32.mrb[152].mxu0 }
 0x2f2   : > { %v2565_v63 = vpop.f32.mrb[157].mxu1  ;;  %v3849_v15 = vadd.f32 %v3848_v59, %v2915_v62  ;;  %v3654_v2 = vpop.f32.mrb[153].mxu0  ;;  %v3852_v17 = vadd.f32 %v5218_v23, %v2563_v4 }
 0x2f3   : > { %v2566_v6 = vpop.f32.mrb[158].mxu1  ;;  %v2918_v43 = vpop.f32.mrb[154].mxu0 }
 0x2f4   : > { %v2568_v47 = vpop.f32.mrb[159].mxu1  ;;  %v3013_v18 = vmax.f32 %v3849_v15, 0.0  ;;  %v3851_v7 = vadd.f32 %v3850_v11, %v2918_v43  ;;  %v3655_v3 = vpop.f32.mrb[155].mxu0  ;;  %v3854_v29 = vadd.f32 %v5218_v23, %v2566_v6 }
 0x2f6   : > { %3094 = vst [vmem:[%s4977_s21 + $0x260] sm:$0xff] %v3013_v18  ;;  %v3014_v24 = vmax.f32 %v3851_v7, 0.0 }
 0x2f8   : > { %3095 = vst [vmem:[%s4977_s21 + $0x268] sm:$0xff] %v3014_v24 }
 0x2f9   : > { %v2571_v30 = vpop.f32.mrb[160].mxu1  ;;  %v2923_v9 = vpop.f32.mrb[156].mxu0 }
 0x2fa   : > { %v2573_v28 = vpop.f32.mrb[161].mxu1  ;;  %v3853_v0 = vadd.f32 %v3852_v17, %v2923_v9  ;;  %v3658_v5 = vpop.f32.mrb[157].mxu0  ;;  %v3856_v27 = vadd.f32 %v5218_v23, %v2571_v30 }
 0x2fb   : > { %v2574_v32 = vpop.f32.mrb[162].mxu1  ;;  %v2926_v10 = vpop.f32.mrb[158].mxu0 }
 0x2fc   : > { %v2575_v14 = vpop.f32.mrb[163].mxu1  ;;  %v3015_v13 = vmax.f32 %v3853_v0, 0.0  ;;  %v3855_v1 = vadd.f32 %v3854_v29, %v2926_v10  ;;  %v3659_v22 = vpop.f32.mrb[159].mxu0 }
 0x2fe   : > { %3096 = vst [vmem:[%s4977_s21 + $0x270] sm:$0xff] %v3015_v13  ;;  %v3016_v19 = vmax.f32 %v3855_v1, 0.0 }
 0x300   : > { %3097 = vst [vmem:[%s4977_s21 + $0x278] sm:$0xff] %v3016_v19 }
 0x301   : > { %v2931_v37 = vpop.f32.mrb[160].mxu0 }
 0x302   : > { %v3857_v31 = vadd.f32 %v3856_v27, %v2931_v37  ;;  %v3662_v50 = vpop.f32.mrb[161].mxu0 }
 0x303   : > { %v2934_v54 = vpop.f32.mrb[162].mxu0 }
 0x304   : > { %v3017_v34 = vmax.f32 %v3857_v31, 0.0  ;;  %v3663_v26 = vpop.f32.mrb[163].mxu0 }
 0x306   : > { %3098 = vst [vmem:[%s4977_s21 + $0x280] sm:$0xff] %v3017_v34 }
 0x307 PF: > { %s13_s12 = sadd.s32 1, %s4362_s12  }
 0x308   : > { %p10_p4 = scmp.ge.s32.totalorder %s13_s12, 4  }
 0x30a   :  { %12 = sbr.rel (!%p10_p4) target bundleno = 1 (0x1), region = 62 }

// kernel: cnn_forward.8
= control target key start
LH: loop header
LB: loop body
LE: loop exit
PB: predicated region body
PF: predicated region fallthrough
CT: control target
= control target key end

     0   :  { %s1081_s0 = inlined_call_operand.vmem [shape: f32[36,1152], index: 0, kind: input, shape index: {}]   ;;  %s1082_s1 = inlined_call_operand.vmem [shape: f32[36,1152], index: 1, kind: input, shape index: {}]   ;;  %s1083_s2 = inlined_call_operand.vmem [shape: f32[36,1152], index: 2, kind: input, shape index: {}]   ;;  %s1084_s3 = inlined_call_operand.vmem [shape: f32[36,1152], index: 3, kind: input, shape index: {}]   ;;  %s1085_s4 = inlined_call_operand.vmem [shape: f32[36,1152], index: 4, kind: output, shape index: {}]  }
   0x1   :  { %v17_v0 = vld [vmem:[%s1081_s0] sm:$0xff]  ;;  %v18_v5 = vld [vmem:[%s1081_s0 + $0x8] sm:$0xff]  ;;  %v19_v11 = vld [vmem:[%s1081_s0 + $0x10] sm:$0xff] }
   0x2   :  { %v62_v1 = vld [vmem:[%s1082_s1] sm:$0xff]  ;;  %v63_v6 = vld [vmem:[%s1082_s1 + $0x8] sm:$0xff]  ;;  %v64_v13 = vld [vmem:[%s1082_s1 + $0x10] sm:$0xff] }
   0x3   :  { %v152_v2 = vld [vmem:[%s1083_s2] sm:$0xff]  ;;  %v107_v3 = vmax.f32 %v17_v0, %v62_v1  ;;  %v108_v8 = vmax.f32 %v18_v5, %v63_v6  ;;  %v153_v9 = vld [vmem:[%s1083_s2 + $0x8] sm:$0xff]  ;;  %v154_v14 = vld [vmem:[%s1083_s2 + $0x10] sm:$0xff]  ;;  %v109_v17 = vmax.f32 %v19_v11, %v64_v13 }
   0x4   :  { %v197_v4 = vld [vmem:[%s1084_s3] sm:$0xff]  ;;  %v198_v10 = vld [vmem:[%s1084_s3 + $0x8] sm:$0xff]  ;;  %v199_v15 = vld [vmem:[%s1084_s3 + $0x10] sm:$0xff] }
   0x5   :  { %v242_v7 = vmax.f32 %v152_v2, %v197_v4  ;;  %v243_v12 = vmax.f32 %v153_v9, %v198_v10  ;;  %v244_v18 = vmax.f32 %v154_v14, %v199_v15  ;;  %v20_v19 = vld [vmem:[%s1081_s0 + $0x18] sm:$0xff]  ;;  %v21_v25 = vld [vmem:[%s1081_s0 + $0x20] sm:$0xff]  ;;  %v22_v32 = vld [vmem:[%s1081_s0 + $0x28] sm:$0xff] }
   0x6   :  { %v65_v20 = vld [vmem:[%s1082_s1 + $0x18] sm:$0xff]  ;;  %v66_v26 = vld [vmem:[%s1082_s1 + $0x20] sm:$0xff]  ;;  %v67_v34 = vld [vmem:[%s1082_s1 + $0x28] sm:$0xff] }
   0x7   :  { %v287_v16 = vmax.f32 %v107_v3, %v242_v7  ;;  %v155_v21 = vld [vmem:[%s1083_s2 + $0x18] sm:$0xff]  ;;  %v288_v22 = vmax.f32 %v108_v8, %v243_v12  ;;  %v110_v23 = vmax.f32 %v20_v19, %v65_v20  ;;  %v289_v27 = vmax.f32 %v109_v17, %v244_v18  ;;  %v156_v30 = vld [vmem:[%s1083_s2 + $0x20] sm:$0xff]  ;;  %v157_v35 = vld [vmem:[%s1083_s2 + $0x28] sm:$0xff] }
   0x8   :  { %v200_v24 = vld [vmem:[%s1084_s3 + $0x18] sm:$0xff]  ;;  %v111_v29 = vmax.f32 %v21_v25, %v66_v26  ;;  %v201_v31 = vld [vmem:[%s1084_s3 + $0x20] sm:$0xff]  ;;  %v202_v36 = vld [vmem:[%s1084_s3 + $0x28] sm:$0xff]  ;;  %v112_v38 = vmax.f32 %v22_v32, %v67_v34 }
   0x9   :  { %332 = vst [vmem:[%s1085_s4] sm:$0xff] %v287_v16  ;;  %v245_v28 = vmax.f32 %v155_v21, %v200_v24  ;;  %333 = vst [vmem:[%s1085_s4 + $0x8] sm:$0xff] %v288_v22  ;;  %v246_v33 = vmax.f32 %v156_v30, %v201_v31  ;;  %v247_v39 = vmax.f32 %v157_v35, %v202_v36  ;;  %v23_v40 = vld [vmem:[%s1081_s0 + $0x30] sm:$0xff]  ;;  %v24_v46 = vld [vmem:[%s1081_s0 + $0x38] sm:$0xff] }
   0xa   :  { %334 = vst [vmem:[%s1085_s4 + $0x10] sm:$0xff] %v289_v27  ;;  %v68_v41 = vld [vmem:[%s1082_s1 + $0x30] sm:$0xff]  ;;  %v69_v47 = vld [vmem:[%s1082_s1 + $0x38] sm:$0xff]  ;;  %v25_v53 = vld [vmem:[%s1081_s0 + $0x40] sm:$0xff] }
   0xb   :  { %v290_v37 = vmax.f32 %v110_v23, %v245_v28  ;;  %v158_v42 = vld [vmem:[%s1083_s2 + $0x30] sm:$0xff]  ;;  %v291_v43 = vmax.f32 %v111_v29, %v246_v33  ;;  %v113_v44 = vmax.f32 %v23_v40, %v68_v41  ;;  %v292_v48 = vmax.f32 %v112_v38, %v247_v39  ;;  %v159_v51 = vld [vmem:[%s1083_s2 + $0x38] sm:$0xff]  ;;  %v70_v55 = vld [vmem:[%s1082_s1 + $0x40] sm:$0xff] }
   0xc   :  { %v203_v45 = vld [vmem:[%s1084_s3 + $0x30] sm:$0xff]  ;;  %v114_v50 = vmax.f32 %v24_v46, %v69_v47  ;;  %v204_v52 = vld [vmem:[%s1084_s3 + $0x38] sm:$0xff]  ;;  %v160_v56 = vld [vmem:[%s1083_s2 + $0x40] sm:$0xff]  ;;  %v115_v59 = vmax.f32 %v25_v53, %v70_v55 }
   0xd   :  { %335 = vst [vmem:[%s1085_s4 + $0x18] sm:$0xff] %v290_v37  ;;  %v248_v49 = vmax.f32 %v158_v42, %v203_v45  ;;  %336 = vst [vmem:[%s1085_s4 + $0x20] sm:$0xff] %v291_v43  ;;  %v249_v54 = vmax.f32 %v159_v51, %v204_v52  ;;  %v205_v57 = vld [vmem:[%s1084_s3 + $0x40] sm:$0xff]  ;;  %v26_v61 = vld [vmem:[%s1081_s0 + $0x48] sm:$0xff] }
   0xe   :  { %337 = vst [vmem:[%s1085_s4 + $0x28] sm:$0xff] %v292_v48  ;;  %v250_v60 = vmax.f32 %v160_v56, %v205_v57  ;;  %v71_v62 = vld [vmem:[%s1082_s1 + $0x48] sm:$0xff]  ;;  %v27_v3 = vld [vmem:[%s1081_s0 + $0x50] sm:$0xff]  ;;  %v28_v10 = vld [vmem:[%s1081_s0 + $0x58] sm:$0xff] }
   0xf   :  { %v293_v58 = vmax.f32 %v113_v44, %v248_v49  ;;  %v161_v63 = vld [vmem:[%s1083_s2 + $0x48] sm:$0xff]  ;;  %v294_v0 = vmax.f32 %v114_v50, %v249_v54  ;;  %v116_v1 = vmax.f32 %v26_v61, %v71_v62  ;;  %v72_v4 = vld [vmem:[%s1082_s1 + $0x50] sm:$0xff]  ;;  %v73_v12 = vld [vmem:[%s1082_s1 + $0x58] sm:$0xff] }
  0x10   :  { %v206_v2 = vld [vmem:[%s1084_s3 + $0x48] sm:$0xff]  ;;  %v295_v5 = vmax.f32 %v115_v59, %v250_v60  ;;  %v117_v7 = vmax.f32 %v27_v3, %v72_v4  ;;  %v162_v8 = vld [vmem:[%s1083_s2 + $0x50] sm:$0xff]  ;;  %v163_v13 = vld [vmem:[%s1083_s2 + $0x58] sm:$0xff]  ;;  %v118_v16 = vmax.f32 %v28_v10, %v73_v12 }
  0x11   :  { %338 = vst [vmem:[%s1085_s4 + $0x30] sm:$0xff] %v293_v58  ;;  %v251_v6 = vmax.f32 %v161_v63, %v206_v2  ;;  %v207_v9 = vld [vmem:[%s1084_s3 + $0x50] sm:$0xff]  ;;  %339 = vst [vmem:[%s1085_s4 + $0x38] sm:$0xff] %v294_v0  ;;  %v208_v14 = vld [vmem:[%s1084_s3 + $0x58] sm:$0xff] }
  0x12   :  { %v252_v11 = vmax.f32 %v162_v8, %v207_v9  ;;  %340 = vst [vmem:[%s1085_s4 + $0x40] sm:$0xff] %v295_v5  ;;  %v253_v17 = vmax.f32 %v163_v13, %v208_v14  ;;  %v29_v18 = vld [vmem:[%s1081_s0 + $0x60] sm:$0xff]  ;;  %v30_v24 = vld [vmem:[%s1081_s0 + $0x68] sm:$0xff]  ;;  %v31_v31 = vld [vmem:[%s1081_s0 + $0x70] sm:$0xff] }
  0x13   :  { %v296_v15 = vmax.f32 %v116_v1, %v251_v6  ;;  %v74_v19 = vld [vmem:[%s1082_s1 + $0x60] sm:$0xff]  ;;  %v75_v25 = vld [vmem:[%s1082_s1 + $0x68] sm:$0xff]  ;;  %v76_v33 = vld [vmem:[%s1082_s1 + $0x70] sm:$0xff] }
  0x14   :  { %v164_v20 = vld [vmem:[%s1083_s2 + $0x60] sm:$0xff]  ;;  %v297_v21 = vmax.f32 %v117_v7, %v252_v11  ;;  %v119_v22 = vmax.f32 %v29_v18, %v74_v19  ;;  %v298_v26 = vmax.f32 %v118_v16, %v253_v17  ;;  %v120_v28 = vmax.f32 %v30_v24, %v75_v25  ;;  %v165_v29 = vld [vmem:[%s1083_s2 + $0x68] sm:$0xff]  ;;  %v166_v34 = vld [vmem:[%s1083_s2 + $0x70] sm:$0xff] }
  0x15   :  { %v209_v23 = vld [vmem:[%s1084_s3 + $0x60] sm:$0xff]  ;;  %341 = vst [vmem:[%s1085_s4 + $0x48] sm:$0xff] %v296_v15  ;;  %v210_v30 = vld [vmem:[%s1084_s3 + $0x68] sm:$0xff]  ;;  %v211_v35 = vld [vmem:[%s1084_s3 + $0x70] sm:$0xff]  ;;  %v121_v37 = vmax.f32 %v31_v31, %v76_v33 }
  0x16   :  { %v254_v27 = vmax.f32 %v164_v20, %v209_v23  ;;  %342 = vst [vmem:[%s1085_s4 + $0x50] sm:$0xff] %v297_v21  ;;  %v255_v32 = vmax.f32 %v165_v29, %v210_v30  ;;  %343 = vst [vmem:[%s1085_s4 + $0x58] sm:$0xff] %v298_v26  ;;  %v256_v38 = vmax.f32 %v166_v34, %v211_v35  ;;  %v32_v39 = vld [vmem:[%s1081_s0 + $0x78] sm:$0xff]  ;;  %v33_v45 = vld [vmem:[%s1081_s0 + $0x80] sm:$0xff] }
  0x17   :  { %v77_v40 = vld [vmem:[%s1082_s1 + $0x78] sm:$0xff]  ;;  %v78_v46 = vld [vmem:[%s1082_s1 + $0x80] sm:$0xff]  ;;  %v34_v52 = vld [vmem:[%s1081_s0 + $0x88] sm:$0xff] }
  0x18   :  { %v299_v36 = vmax.f32 %v119_v22, %v254_v27  ;;  %v167_v41 = vld [vmem:[%s1083_s2 + $0x78] sm:$0xff]  ;;  %v300_v42 = vmax.f32 %v120_v28, %v255_v32  ;;  %v122_v43 = vmax.f32 %v32_v39, %v77_v40  ;;  %v301_v47 = vmax.f32 %v121_v37, %v256_v38  ;;  %v168_v50 = vld [vmem:[%s1083_s2 + $0x80] sm:$0xff]  ;;  %v79_v54 = vld [vmem:[%s1082_s1 + $0x88] sm:$0xff] }
  0x19   :  { %v212_v44 = vld [vmem:[%s1084_s3 + $0x78] sm:$0xff]  ;;  %v123_v49 = vmax.f32 %v33_v45, %v78_v46  ;;  %v213_v51 = vld [vmem:[%s1084_s3 + $0x80] sm:$0xff]  ;;  %v169_v55 = vld [vmem:[%s1083_s2 + $0x88] sm:$0xff]  ;;  %v124_v58 = vmax.f32 %v34_v52, %v79_v54 }
  0x1a   :  { %344 = vst [vmem:[%s1085_s4 + $0x60] sm:$0xff] %v299_v36  ;;  %v257_v48 = vmax.f32 %v167_v41, %v212_v44  ;;  %345 = vst [vmem:[%s1085_s4 + $0x68] sm:$0xff] %v300_v42  ;;  %v258_v53 = vmax.f32 %v168_v50, %v213_v51  ;;  %v214_v56 = vld [vmem:[%s1084_s3 + $0x88] sm:$0xff]  ;;  %v35_v60 = vld [vmem:[%s1081_s0 + $0x90] sm:$0xff] }
  0x1b   :  { %346 = vst [vmem:[%s1085_s4 + $0x70] sm:$0xff] %v301_v47  ;;  %v259_v59 = vmax.f32 %v169_v55, %v214_v56  ;;  %v80_v61 = vld [vmem:[%s1082_s1 + $0x90] sm:$0xff]  ;;  %v36_v2 = vld [vmem:[%s1081_s0 + $0x98] sm:$0xff]  ;;  %v37_v9 = vld [vmem:[%s1081_s0 + $0xa0] sm:$0xff] }
  0x1c   :  { %v302_v57 = vmax.f32 %v122_v43, %v257_v48  ;;  %v170_v62 = vld [vmem:[%s1083_s2 + $0x90] sm:$0xff]  ;;  %v303_v63 = vmax.f32 %v123_v49, %v258_v53  ;;  %v125_v0 = vmax.f32 %v35_v60, %v80_v61  ;;  %v81_v3 = vld [vmem:[%s1082_s1 + $0x98] sm:$0xff]  ;;  %v82_v11 = vld [vmem:[%s1082_s1 + $0xa0] sm:$0xff] }
  0x1d   :  { %v215_v1 = vld [vmem:[%s1084_s3 + $0x90] sm:$0xff]  ;;  %v304_v4 = vmax.f32 %v124_v58, %v259_v59  ;;  %v126_v6 = vmax.f32 %v36_v2, %v81_v3  ;;  %v171_v7 = vld [vmem:[%s1083_s2 + $0x98] sm:$0xff]  ;;  %v172_v12 = vld [vmem:[%s1083_s2 + $0xa0] sm:$0xff]  ;;  %v127_v15 = vmax.f32 %v37_v9, %v82_v11 }
  0x1e   :  { %347 = vst [vmem:[%s1085_s4 + $0x78] sm:$0xff] %v302_v57  ;;  %v260_v5 = vmax.f32 %v170_v62, %v215_v1  ;;  %v216_v8 = vld [vmem:[%s1084_s3 + $0x98] sm:$0xff]  ;;  %348 = vst [vmem:[%s1085_s4 + $0x80] sm:$0xff] %v303_v63  ;;  %v217_v13 = vld [vmem:[%s1084_s3 + $0xa0] sm:$0xff] }
  0x1f   :  { %v261_v10 = vmax.f32 %v171_v7, %v216_v8  ;;  %349 = vst [vmem:[%s1085_s4 + $0x88] sm:$0xff] %v304_v4  ;;  %v262_v16 = vmax.f32 %v172_v12, %v217_v13  ;;  %v38_v17 = vld [vmem:[%s1081_s0 + $0xa8] sm:$0xff]  ;;  %v39_v23 = vld [vmem:[%s1081_s0 + $0xb0] sm:$0xff]  ;;  %v40_v30 = vld [vmem:[%s1081_s0 + $0xb8] sm:$0xff] }
  0x20   :  { %v305_v14 = vmax.f32 %v125_v0, %v260_v5  ;;  %v83_v18 = vld [vmem:[%s1082_s1 + $0xa8] sm:$0xff]  ;;  %v84_v24 = vld [vmem:[%s1082_s1 + $0xb0] sm:$0xff]  ;;  %v85_v32 = vld [vmem:[%s1082_s1 + $0xb8] sm:$0xff] }
  0x21   :  { %v173_v19 = vld [vmem:[%s1083_s2 + $0xa8] sm:$0xff]  ;;  %v306_v20 = vmax.f32 %v126_v6, %v261_v10  ;;  %v128_v21 = vmax.f32 %v38_v17, %v83_v18  ;;  %v307_v25 = vmax.f32 %v127_v15, %v262_v16  ;;  %v129_v27 = vmax.f32 %v39_v23, %v84_v24  ;;  %v174_v28 = vld [vmem:[%s1083_s2 + $0xb0] sm:$0xff]  ;;  %v175_v33 = vld [vmem:[%s1083_s2 + $0xb8] sm:$0xff] }
  0x22   :  { %v218_v22 = vld [vmem:[%s1084_s3 + $0xa8] sm:$0xff]  ;;  %350 = vst [vmem:[%s1085_s4 + $0x90] sm:$0xff] %v305_v14  ;;  %v219_v29 = vld [vmem:[%s1084_s3 + $0xb0] sm:$0xff]  ;;  %v220_v34 = vld [vmem:[%s1084_s3 + $0xb8] sm:$0xff]  ;;  %v130_v36 = vmax.f32 %v40_v30, %v85_v32 }
  0x23   :  { %v263_v26 = vmax.f32 %v173_v19, %v218_v22  ;;  %351 = vst [vmem:[%s1085_s4 + $0x98] sm:$0xff] %v306_v20  ;;  %v264_v31 = vmax.f32 %v174_v28, %v219_v29  ;;  %352 = vst [vmem:[%s1085_s4 + $0xa0] sm:$0xff] %v307_v25  ;;  %v265_v37 = vmax.f32 %v175_v33, %v220_v34  ;;  %v41_v38 = vld [vmem:[%s1081_s0 + $0xc0] sm:$0xff]  ;;  %v42_v44 = vld [vmem:[%s1081_s0 + $0xc8] sm:$0xff] }
  0x24   :  { %v86_v39 = vld [vmem:[%s1082_s1 + $0xc0] sm:$0xff]  ;;  %v87_v45 = vld [vmem:[%s1082_s1 + $0xc8] sm:$0xff]  ;;  %v43_v51 = vld [vmem:[%s1081_s0 + $0xd0] sm:$0xff] }
  0x25   :  { %v308_v35 = vmax.f32 %v128_v21, %v263_v26  ;;  %v176_v40 = vld [vmem:[%s1083_s2 + $0xc0] sm:$0xff]  ;;  %v309_v41 = vmax.f32 %v129_v27, %v264_v31  ;;  %v131_v42 = vmax.f32 %v41_v38, %v86_v39  ;;  %v310_v46 = vmax.f32 %v130_v36, %v265_v37  ;;  %v177_v49 = vld [vmem:[%s1083_s2 + $0xc8] sm:$0xff]  ;;  %v88_v53 = vld [vmem:[%s1082_s1 + $0xd0] sm:$0xff] }
  0x26   :  { %v221_v43 = vld [vmem:[%s1084_s3 + $0xc0] sm:$0xff]  ;;  %v132_v48 = vmax.f32 %v42_v44, %v87_v45  ;;  %v222_v50 = vld [vmem:[%s1084_s3 + $0xc8] sm:$0xff]  ;;  %v178_v54 = vld [vmem:[%s1083_s2 + $0xd0] sm:$0xff]  ;;  %v133_v57 = vmax.f32 %v43_v51, %v88_v53 }
  0x27   :  { %353 = vst [vmem:[%s1085_s4 + $0xa8] sm:$0xff] %v308_v35  ;;  %v266_v47 = vmax.f32 %v176_v40, %v221_v43  ;;  %354 = vst [vmem:[%s1085_s4 + $0xb0] sm:$0xff] %v309_v41  ;;  %v267_v52 = vmax.f32 %v177_v49, %v222_v50  ;;  %v223_v55 = vld [vmem:[%s1084_s3 + $0xd0] sm:$0xff]  ;;  %v44_v59 = vld [vmem:[%s1081_s0 + $0xd8] sm:$0xff] }
  0x28   :  { %355 = vst [vmem:[%s1085_s4 + $0xb8] sm:$0xff] %v310_v46  ;;  %v268_v58 = vmax.f32 %v178_v54, %v223_v55  ;;  %v89_v60 = vld [vmem:[%s1082_s1 + $0xd8] sm:$0xff]  ;;  %v45_v1 = vld [vmem:[%s1081_s0 + $0xe0] sm:$0xff]  ;;  %v46_v8 = vld [vmem:[%s1081_s0 + $0xe8] sm:$0xff] }
  0x29   :  { %v311_v56 = vmax.f32 %v131_v42, %v266_v47  ;;  %v179_v61 = vld [vmem:[%s1083_s2 + $0xd8] sm:$0xff]  ;;  %v312_v62 = vmax.f32 %v132_v48, %v267_v52  ;;  %v134_v63 = vmax.f32 %v44_v59, %v89_v60  ;;  %v90_v2 = vld [vmem:[%s1082_s1 + $0xe0] sm:$0xff]  ;;  %v91_v10 = vld [vmem:[%s1082_s1 + $0xe8] sm:$0xff] }
  0x2a   :  { %v224_v0 = vld [vmem:[%s1084_s3 + $0xd8] sm:$0xff]  ;;  %v313_v3 = vmax.f32 %v133_v57, %v268_v58  ;;  %v135_v5 = vmax.f32 %v45_v1, %v90_v2  ;;  %v180_v6 = vld [vmem:[%s1083_s2 + $0xe0] sm:$0xff]  ;;  %v181_v11 = vld [vmem:[%s1083_s2 + $0xe8] sm:$0xff]  ;;  %v136_v14 = vmax.f32 %v46_v8, %v91_v10 }
  0x2b   :  { %356 = vst [vmem:[%s1085_s4 + $0xc0] sm:$0xff] %v311_v56  ;;  %v269_v4 = vmax.f32 %v179_v61, %v224_v0  ;;  %v225_v7 = vld [vmem:[%s1084_s3 + $0xe0] sm:$0xff]  ;;  %357 = vst [vmem:[%s1085_s4 + $0xc8] sm:$0xff] %v312_v62  ;;  %v226_v12 = vld [vmem:[%s1084_s3 + $0xe8] sm:$0xff] }
  0x2c   :  { %v270_v9 = vmax.f32 %v180_v6, %v225_v7  ;;  %358 = vst [vmem:[%s1085_s4 + $0xd0] sm:$0xff] %v313_v3  ;;  %v271_v15 = vmax.f32 %v181_v11, %v226_v12  ;;  %v47_v16 = vld [vmem:[%s1081_s0 + $0xf0] sm:$0xff]  ;;  %v48_v22 = vld [vmem:[%s1081_s0 + $0xf8] sm:$0xff]  ;;  %v49_v29 = vld [vmem:[%s1081_s0 + $0x100] sm:$0xff] }
  0x2d   :  { %v314_v13 = vmax.f32 %v134_v63, %v269_v4  ;;  %v92_v17 = vld [vmem:[%s1082_s1 + $0xf0] sm:$0xff]  ;;  %v93_v23 = vld [vmem:[%s1082_s1 + $0xf8] sm:$0xff]  ;;  %v94_v31 = vld [vmem:[%s1082_s1 + $0x100] sm:$0xff] }
  0x2e   :  { %v182_v18 = vld [vmem:[%s1083_s2 + $0xf0] sm:$0xff]  ;;  %v315_v19 = vmax.f32 %v135_v5, %v270_v9  ;;  %v137_v20 = vmax.f32 %v47_v16, %v92_v17  ;;  %v316_v24 = vmax.f32 %v136_v14, %v271_v15  ;;  %v138_v26 = vmax.f32 %v48_v22, %v93_v23  ;;  %v183_v27 = vld [vmem:[%s1083_s2 + $0xf8] sm:$0xff]  ;;  %v184_v32 = vld [vmem:[%s1083_s2 + $0x100] sm:$0xff] }
  0x2f   :  { %v227_v21 = vld [vmem:[%s1084_s3 + $0xf0] sm:$0xff]  ;;  %359 = vst [vmem:[%s1085_s4 + $0xd8] sm:$0xff] %v314_v13  ;;  %v228_v28 = vld [vmem:[%s1084_s3 + $0xf8] sm:$0xff]  ;;  %v229_v33 = vld [vmem:[%s1084_s3 + $0x100] sm:$0xff]  ;;  %v139_v35 = vmax.f32 %v49_v29, %v94_v31 }
  0x30   :  { %v272_v25 = vmax.f32 %v182_v18, %v227_v21  ;;  %360 = vst [vmem:[%s1085_s4 + $0xe0] sm:$0xff] %v315_v19  ;;  %v273_v30 = vmax.f32 %v183_v27, %v228_v28  ;;  %361 = vst [vmem:[%s1085_s4 + $0xe8] sm:$0xff] %v316_v24  ;;  %v274_v36 = vmax.f32 %v184_v32, %v229_v33  ;;  %v50_v37 = vld [vmem:[%s1081_s0 + $0x108] sm:$0xff]  ;;  %v51_v43 = vld [vmem:[%s1081_s0 + $0x110] sm:$0xff] }
  0x31   :  { %v95_v38 = vld [vmem:[%s1082_s1 + $0x108] sm:$0xff]  ;;  %v96_v44 = vld [vmem:[%s1082_s1 + $0x110] sm:$0xff]  ;;  %v52_v50 = vld [vmem:[%s1081_s0 + $0x118] sm:$0xff] }
  0x32   :  { %v317_v34 = vmax.f32 %v137_v20, %v272_v25  ;;  %v185_v39 = vld [vmem:[%s1083_s2 + $0x108] sm:$0xff]  ;;  %v318_v40 = vmax.f32 %v138_v26, %v273_v30  ;;  %v140_v41 = vmax.f32 %v50_v37, %v95_v38  ;;  %v319_v45 = vmax.f32 %v139_v35, %v274_v36  ;;  %v186_v48 = vld [vmem:[%s1083_s2 + $0x110] sm:$0xff]  ;;  %v97_v52 = vld [vmem:[%s1082_s1 + $0x118] sm:$0xff] }
  0x33   :  { %v230_v42 = vld [vmem:[%s1084_s3 + $0x108] sm:$0xff]  ;;  %v141_v47 = vmax.f32 %v51_v43, %v96_v44  ;;  %v231_v49 = vld [vmem:[%s1084_s3 + $0x110] sm:$0xff]  ;;  %v187_v53 = vld [vmem:[%s1083_s2 + $0x118] sm:$0xff]  ;;  %v142_v56 = vmax.f32 %v52_v50, %v97_v52 }
  0x34   :  { %362 = vst [vmem:[%s1085_s4 + $0xf0] sm:$0xff] %v317_v34  ;;  %v275_v46 = vmax.f32 %v185_v39, %v230_v42  ;;  %363 = vst [vmem:[%s1085_s4 + $0xf8] sm:$0xff] %v318_v40  ;;  %v276_v51 = vmax.f32 %v186_v48, %v231_v49  ;;  %v232_v54 = vld [vmem:[%s1084_s3 + $0x118] sm:$0xff]  ;;  %v53_v58 = vld [vmem:[%s1081_s0 + $0x120] sm:$0xf] }
  0x35   :  { %364 = vst [vmem:[%s1085_s4 + $0x100] sm:$0xff] %v319_v45  ;;  %v277_v57 = vmax.f32 %v187_v53, %v232_v54  ;;  %v98_v59 = vld [vmem:[%s1082_s1 + $0x120] sm:$0xf]  ;;  %v54_v0 = vld [vmem:[%s1081_s0 + $0x128] sm:$0xf] }
  0x36   :  { %v320_v55 = vmax.f32 %v140_v41, %v275_v46  ;;  %v188_v60 = vld [vmem:[%s1083_s2 + $0x120] sm:$0xf]  ;;  %v321_v61 = vmax.f32 %v141_v47, %v276_v51  ;;  %v143_v62 = vmax.f32 %v53_v58, %v98_v59  ;;  %v99_v1 = vld [vmem:[%s1082_s1 + $0x128] sm:$0xf]  ;;  %v55_v7 = vld [vmem:[%s1081_s0 + $0x130] sm:$0xf] }
  0x37   :  { %v233_v63 = vld [vmem:[%s1084_s3 + $0x120] sm:$0xf]  ;;  %v322_v2 = vmax.f32 %v142_v56, %v277_v57  ;;  %v144_v4 = vmax.f32 %v54_v0, %v99_v1  ;;  %v189_v5 = vld [vmem:[%s1083_s2 + $0x128] sm:$0xf]  ;;  %v100_v9 = vld [vmem:[%s1082_s1 + $0x130] sm:$0xf] }
  0x38   :  { %365 = vst [vmem:[%s1085_s4 + $0x108] sm:$0xff] %v320_v55  ;;  %v278_v3 = vmax.f32 %v188_v60, %v233_v63  ;;  %v234_v6 = vld [vmem:[%s1084_s3 + $0x128] sm:$0xf]  ;;  %366 = vst [vmem:[%s1085_s4 + $0x110] sm:$0xff] %v321_v61  ;;  %v190_v10 = vld [vmem:[%s1083_s2 + $0x130] sm:$0xf]  ;;  %v145_v13 = vmax.f32 %v55_v7, %v100_v9 }
  0x39   :  { %v279_v8 = vmax.f32 %v189_v5, %v234_v6  ;;  %v235_v11 = vld [vmem:[%s1084_s3 + $0x130] sm:$0xf]  ;;  %367 = vst [vmem:[%s1085_s4 + $0x118] sm:$0xff] %v322_v2  ;;  %v56_v15 = vld [vmem:[%s1081_s0 + $0x138] sm:$0xf] }
  0x3a   :  { %v323_v12 = vmax.f32 %v143_v62, %v278_v3  ;;  %v280_v14 = vmax.f32 %v190_v10, %v235_v11  ;;  %v101_v16 = vld [vmem:[%s1082_s1 + $0x138] sm:$0xf]  ;;  %v57_v21 = vld [vmem:[%s1081_s0 + $0x140] sm:$0xf]  ;;  %v58_v28 = vld [vmem:[%s1081_s0 + $0x148] sm:$0xf] }
  0x3b   :  { %v191_v17 = vld [vmem:[%s1083_s2 + $0x138] sm:$0xf]  ;;  %v324_v18 = vmax.f32 %v144_v4, %v279_v8  ;;  %v146_v19 = vmax.f32 %v56_v15, %v101_v16  ;;  %v102_v22 = vld [vmem:[%s1082_s1 + $0x140] sm:$0xf]  ;;  %v103_v30 = vld [vmem:[%s1082_s1 + $0x148] sm:$0xf] }
  0x3c   :  { %v236_v20 = vld [vmem:[%s1084_s3 + $0x138] sm:$0xf]  ;;  %368 = vst [vmem:[%s1085_s4 + $0x120] sm:$0xf] %v323_v12  ;;  %v325_v23 = vmax.f32 %v145_v13, %v280_v14  ;;  %v147_v25 = vmax.f32 %v57_v21, %v102_v22  ;;  %v192_v26 = vld [vmem:[%s1083_s2 + $0x140] sm:$0xf]  ;;  %v148_v34 = vmax.f32 %v58_v28, %v103_v30 }
  0x3d   :  { %v281_v24 = vmax.f32 %v191_v17, %v236_v20  ;;  %v237_v27 = vld [vmem:[%s1084_s3 + $0x140] sm:$0xf]  ;;  %369 = vst [vmem:[%s1085_s4 + $0x128] sm:$0xf] %v324_v18  ;;  %v193_v31 = vld [vmem:[%s1083_s2 + $0x148] sm:$0xf] }
  0x3e   :  { %v282_v29 = vmax.f32 %v192_v26, %v237_v27  ;;  %v238_v32 = vld [vmem:[%s1084_s3 + $0x148] sm:$0xf]  ;;  %370 = vst [vmem:[%s1085_s4 + $0x130] sm:$0xf] %v325_v23  ;;  %v59_v36 = vld [vmem:[%s1081_s0 + $0x150] sm:$0xf] }
  0x3f   :  { %v326_v33 = vmax.f32 %v146_v19, %v281_v24  ;;  %v283_v35 = vmax.f32 %v193_v31, %v238_v32  ;;  %v104_v37 = vld [vmem:[%s1082_s1 + $0x150] sm:$0xf]  ;;  %v60_v42 = vld [vmem:[%s1081_s0 + $0x158] sm:$0xf]  ;;  %v61_v49 = vld [vmem:[%s1081_s0 + $0x160] sm:$0xf] }
  0x40   :  { %v194_v38 = vld [vmem:[%s1083_s2 + $0x150] sm:$0xf]  ;;  %v327_v39 = vmax.f32 %v147_v25, %v282_v29  ;;  %v149_v40 = vmax.f32 %v59_v36, %v104_v37  ;;  %v105_v43 = vld [vmem:[%s1082_s1 + $0x158] sm:$0xf]  ;;  %v106_v51 = vld [vmem:[%s1082_s1 + $0x160] sm:$0xf] }
  0x41   :  { %v239_v41 = vld [vmem:[%s1084_s3 + $0x150] sm:$0xf]  ;;  %371 = vst [vmem:[%s1085_s4 + $0x138] sm:$0xf] %v326_v33  ;;  %v328_v44 = vmax.f32 %v148_v34, %v283_v35  ;;  %v150_v46 = vmax.f32 %v60_v42, %v105_v43  ;;  %v195_v47 = vld [vmem:[%s1083_s2 + $0x158] sm:$0xf]  ;;  %v151_v55 = vmax.f32 %v61_v49, %v106_v51 }
  0x42   :  { %v284_v45 = vmax.f32 %v194_v38, %v239_v41  ;;  %v240_v48 = vld [vmem:[%s1084_s3 + $0x158] sm:$0xf]  ;;  %372 = vst [vmem:[%s1085_s4 + $0x140] sm:$0xf] %v327_v39  ;;  %v196_v52 = vld [vmem:[%s1083_s2 + $0x160] sm:$0xf] }
  0x43   :  { %v285_v50 = vmax.f32 %v195_v47, %v240_v48  ;;  %v241_v53 = vld [vmem:[%s1084_s3 + $0x160] sm:$0xf]  ;;  %373 = vst [vmem:[%s1085_s4 + $0x148] sm:$0xf] %v328_v44 }
  0x44   :  { %v329_v54 = vmax.f32 %v149_v40, %v284_v45  ;;  %v286_v56 = vmax.f32 %v196_v52, %v241_v53 }
  0x45   :  { %v330_v57 = vmax.f32 %v150_v46, %v285_v50 }
  0x46   :  { %374 = vst [vmem:[%s1085_s4 + $0x150] sm:$0xf] %v329_v54  ;;  %v331_v58 = vmax.f32 %v151_v55, %v286_v56 }
  0x47   :  { %375 = vst [vmem:[%s1085_s4 + $0x158] sm:$0xf] %v330_v57 }
  0x48   :  { %376 = vst [vmem:[%s1085_s4 + $0x160] sm:$0xf] %v331_v58 }

// kernel: cnn_forward.9
= control target key start
LH: loop header
LB: loop body
LE: loop exit
PB: predicated region body
PF: predicated region fallthrough
CT: control target
= control target key end

     0   :  { %10 = vsyncpa [#allocation3], 0  ;;  %s3812_s18 = smov 0   ;;  %s4131_s0 = inlined_call_operand.vmem [shape: f32[2,20736], index: 0, kind: input, shape index: {}]   ;;  %s4132_s1 = inlined_call_operand.vmem [shape: bf16[20736,128], index: 1, kind: input, shape index: {}]   ;;  %s4133_s2 = inlined_call_operand.vmem [shape: f32[1,128], index: 2, kind: input, shape index: {}]   ;;  %s4134_s3 = inlined_call_operand.vmem [shape: bf16[128,128], index: 3, kind: input, shape index: {}]   ;;  %s4135_s4 = inlined_call_operand.vmem [shape: f32[1,128], index: 4, kind: input, shape index: {}]   ;;  %s4136_s5 = inlined_call_operand.hbm [shape: f32[2,128], index: 5, kind: output, shape index: {}]  }
   0x1 LB: > { %s3818_s19 = sadd.s32 4294967295, %s3773_s18   ;;  %p2906_p0 = scmp.ge.s32.totalorder %s3773_s18, 1  ;;  %s3773_s18 = sphi %s3812_s18, %s16_s18  }
   0x2   : > { %p195_p1 = scmp.lt.s32.totalorder %s3773_s18, 7 }
   0x4   : > { %p196_p2 = pnand %p2906_p0, %p195_p1 }
   0x5   : > { %s223_s20 = smul.u32 (!%p196_p2), 27, %s3818_s19  ;;  %p2909_p5 = scmp.ne.s32.totalorder (!%p196_p2), %s3818_s19, 0 }
   0x6   : > { %199 = sbr.rel (%p196_p2) target bundleno = 724 (0x2d4), region = 40 }
   0x7   : > { %s229_s21 = smul.u32 (!%p196_p2), 432, %s3818_s19  ;;  %p224_p3 = scmp.lt.s32.totalorder (!%p196_p2), %s223_s20, 161 }
   0x9   : > { %p230_p4 = scmp.lt.s32.totalorder (!%p196_p2), %s229_s21, 2591 }
   0xd   : > { %s4138_s20 = smov (!%p224_p3, %s223_s20), 161  ;;  %s4140_s21 = smov (!%p230_p4, %s229_s21), 2591 }
   0xe   : > { %s2907_s22 = sshll.u32 %s4138_s20, 1  ;;  %s2908_s26 = sshll.u32 %s4140_s21, 2  ;;  %v3775_v0 = vmov (!%p2909_p5), 0.0  }
   0xf   : > { %s3827_s25 = scalar_lea.vmem %s4131_s0, %s2907_s22  ;;  %s3832_s29 = scalar_lea.vmem %s4132_s1, %s2908_s26  ;;  %240 = vst [vmem:[#allocation2] sm:$0x3] (!%p2909_p5), %v3775_v0 }
  0x10   : > { %239 = sbr.rel (%p2909_p5) target bundleno = 23 (0x17), region = 44 }
  0x17 PF: > { %v3506_v1 = vld [vmem:[%s3832_s29 + $0x40] sm:$0xff]   ;;  %v3510_v5 = vld [vmem:[%s3832_s29 + $0x48] sm:$0xff]   ;;  %v3514_v9 = vld [vmem:[%s3832_s29 + $0x50] sm:$0xff]   ;;  %v260_v29 = vlaneseq  ;;  %v3776_v37 = vmov 1983009808   ;;  %vm3778_vm0 = vmmov 0  }
  0x18   : > { %v3507_v2 = vld [vmem:[%s3832_s29 + $0xc0] sm:$0xff]   ;;  %3141 = vmatprep.subr.bf16.mxu0 %v3506_v1  ;;  %v3511_v6 = vld [vmem:[%s3832_s29 + $0xc8] sm:$0xff]   ;;  %v3515_v10 = vld [vmem:[%s3832_s29 + $0xd0] sm:$0xff]   ;;  %v258_v38 = vunpack.c.l.s4 %v3776_v37  ;;  %p3126_p6 = scmp.ne.s32.totalorder %s3818_s19, 5 }
  0x19   : > { %v3508_v3 = vld [vmem:[%s3832_s29] sm:$0xff]   ;;  %3163 = vmatprep.subr.bf16.mxu1 %v3507_v2  ;;  %v3512_v7 = vld [vmem:[%s3832_s29 + $0x8] sm:$0xff]   ;;  %v3516_v11 = vld [vmem:[%s3832_s29 + $0x10] sm:$0xff]   ;;  %v261_v34 = vshrl.u32 %v260_v29, 7  ;;  %vm3780_vm1 = vmmov (!%p3126_p6), 0  }
  0x1a   : > { %v3509_v4 = vld [vmem:[%s3832_s29 + $0x80] sm:$0xff]   ;;  %3142 = vmatpush3.bf16.msra.mxu0 %v3508_v3  ;;  %v3513_v8 = vld [vmem:[%s3832_s29 + $0x88] sm:$0xff]   ;;  %v3517_v12 = vld [vmem:[%s3832_s29 + $0x90] sm:$0xff]   ;;  %v259_v39 = vunpack.c.0.s8 %v258_v38 }
  0x1b   : > { %3164 = vmatpush3.bf16.msra.mxu1 %v3509_v4  ;;  %3143 = vmatprep.subr.bf16.mxu0 %v3510_v5  ;;  %v3518_v13 = vld [vmem:[%s3832_s29 + $0x58] sm:$0xff]   ;;  %v3522_v17 = vld [vmem:[%s3832_s29 + $0x60] sm:$0xff]   ;;  %v3526_v21 = vld [vmem:[%s3832_s29 + $0x68] sm:$0xff]  }
  0x1c   : > { %3165 = vmatprep.subr.bf16.mxu1 %v3511_v6  ;;  %v3519_v14 = vld [vmem:[%s3832_s29 + $0xd8] sm:$0xff]   ;;  %v3523_v18 = vld [vmem:[%s3832_s29 + $0xe0] sm:$0xff]   ;;  %v3527_v22 = vld [vmem:[%s3832_s29 + $0xe8] sm:$0xff]   ;;  %v3870_v42 = vsub.s32 %v259_v39, %v261_v34 }
  0x1d   : > { %v3520_v15 = vld [vmem:[%s3832_s29 + $0x18] sm:$0xff]   ;;  %v3524_v19 = vld [vmem:[%s3832_s29 + $0x20] sm:$0xff]   ;;  %v3528_v23 = vld [vmem:[%s3832_s29 + $0x28] sm:$0xff]  }
  0x1e   : > { %3144 = vmatpush3.bf16.msra.mxu0 %v3512_v7  ;;  %v3521_v16 = vld [vmem:[%s3832_s29 + $0x98] sm:$0xff]   ;;  %v3525_v20 = vld [vmem:[%s3832_s29 + $0xa0] sm:$0xff]   ;;  %v3529_v24 = vld [vmem:[%s3832_s29 + $0xa8] sm:$0xff]  }
  0x1f   : > { %3166 = vmatpush3.bf16.msra.mxu1 %v3513_v8  ;;  %3145 = vmatprep.subr.bf16.mxu0 %v3514_v9  ;;  %v3530_v25 = vld [vmem:[%s3832_s29 + $0x70] sm:$0xff]   ;;  %v3534_v30 = vld [vmem:[%s3832_s29 + $0x78] sm:$0xff]   ;;  %v242_v35 = vld [vmem:[%s3827_s25] sm:$0xff] }
  0x20   : > { %3167 = vmatprep.subr.bf16.mxu1 %v3515_v10  ;;  %v3531_v26 = vld [vmem:[%s3832_s29 + $0xf0] sm:$0xff]   ;;  %v3535_v31 = vld [vmem:[%s3832_s29 + $0xf8] sm:$0xff]   ;;  %v3539_v36 = vld [vmem:[%s3832_s29 + $0x140] sm:$0xff]   ;;  %v256_v40 = vcombine.high %v242_v35, %v242_v35  ;;  %v263_v43 = vrot.slane %v242_v35, %v3870_v42 }
  0x21   : > { %v3532_v27 = vld [vmem:[%s3832_s29 + $0x30] sm:$0xff]   ;;  %v3536_v32 = vld [vmem:[%s3832_s29 + $0x38] sm:$0xff]   ;;  %v3541_v41 = vld [vmem:[%s3832_s29 + $0x1c0] sm:$0xff]  }
  0x22   : > { %3146 = vmatpush3.bf16.msra.mxu0 %v3516_v11  ;;  %v3533_v28 = vld [vmem:[%s3832_s29 + $0xb0] sm:$0xff]   ;;  %v3537_v33 = vld [vmem:[%s3832_s29 + $0xb8] sm:$0xff]   ;;  %v270_v44 = vrot.slane %v256_v40, %v3870_v42  ;;  %v271_v45 = vcombine.high %v263_v43, %v263_v43  ;;  %v3540_v47 = vld [vmem:[%s3832_s29 + $0x100] sm:$0xff]   ;;  %v401_v48 = vpack.c.bf16 %v263_v43, %v263_v43 }
  0x23   : > { %3168 = vmatpush3.bf16.msra.mxu1 %v3517_v12  ;;  %3147 = vmatprep.subr.bf16.mxu0 %v3518_v13  ;;  %v3542_v50 = vld [vmem:[%s3832_s29 + $0x180] sm:$0xff]   ;;  %v3543_v53 = vld [vmem:[%s3832_s29 + $0x148] sm:$0xff]   ;;  %v3547_v57 = vld [vmem:[%s3832_s29 + $0x150] sm:$0xff]  }
  0x24   : > { %3169 = vmatprep.subr.bf16.mxu1 %v3519_v14  ;;  %v272_v46 = vcombine.high %v270_v44, %v270_v44  ;;  %v403_v49 = vpack.c.bf16 %v270_v44, %v270_v44  ;;  %v402_v51 = vpack.c.bf16 %v271_v45, %v271_v45  ;;  %v3545_v54 = vld [vmem:[%s3832_s29 + $0x1c8] sm:$0xff]   ;;  %v3549_v58 = vld [vmem:[%s3832_s29 + $0x1d0] sm:$0xff]   ;;  %v3551_v61 = vld [vmem:[%s3832_s29 + $0x158] sm:$0xff]  }
  0x25   : > { %v3544_v55 = vld [vmem:[%s3832_s29 + $0x108] sm:$0xff]   ;;  %v3548_v59 = vld [vmem:[%s3832_s29 + $0x110] sm:$0xff]   ;;  %v3553_v62 = vld [vmem:[%s3832_s29 + $0x1d8] sm:$0xff]  }
  0x26   : > { %3148 = vmatpush3.bf16.msra.mxu0 %v3520_v15  ;;  %v404_v52 = vpack.c.bf16 %v272_v46, %v272_v46  ;;  %2188 = vmatprep.mubr.bf16.mxu0 %v402_v51  ;;  %v3546_v56 = vld [vmem:[%s3832_s29 + $0x188] sm:$0xff]   ;;  %v3550_v60 = vld [vmem:[%s3832_s29 + $0x190] sm:$0xff]   ;;  %v3552_v63 = vld [vmem:[%s3832_s29 + $0x118] sm:$0xff]  }
  0x27   : > { %3170 = vmatpush3.bf16.msra.mxu1 %v3521_v16  ;;  %3149 = vmatprep.subr.bf16.mxu0 %v3522_v17  ;;  %v3554_v0 = vld [vmem:[%s3832_s29 + $0x198] sm:$0xff]   ;;  %v3555_v1 = vld [vmem:[%s3832_s29 + $0x160] sm:$0xff]   ;;  %v3559_v5 = vld [vmem:[%s3832_s29 + $0x168] sm:$0xff]  }
  0x28   : > { %3171 = vmatprep.subr.bf16.mxu1 %v3523_v18  ;;  %2228 = vmatprep.mubr.bf16.mxu1 %v404_v52  ;;  %v3557_v2 = vld [vmem:[%s3832_s29 + $0x1e0] sm:$0xff]   ;;  %v3561_v6 = vld [vmem:[%s3832_s29 + $0x1e8] sm:$0xff]   ;;  %v3563_v9 = vld [vmem:[%s3832_s29 + $0x170] sm:$0xff]  }
  0x29   : > { %v3556_v3 = vld [vmem:[%s3832_s29 + $0x120] sm:$0xff]   ;;  %v3560_v7 = vld [vmem:[%s3832_s29 + $0x128] sm:$0xff]   ;;  %v3565_v11 = vld [vmem:[%s3832_s29 + $0x1f0] sm:$0xff]  }
  0x2a   : > { %3150 = vmatpush3.bf16.msra.mxu0 %v3524_v19  ;;  %v3558_v4 = vld [vmem:[%s3832_s29 + $0x1a0] sm:$0xff]   ;;  %v3562_v8 = vld [vmem:[%s3832_s29 + $0x1a8] sm:$0xff]   ;;  %v3564_v14 = vld [vmem:[%s3832_s29 + $0x130] sm:$0xff]  }
  0x2b   : > { %3172 = vmatpush3.bf16.msra.mxu1 %v3525_v20  ;;  %3151 = vmatprep.subr.bf16.mxu0 %v3526_v21  ;;  %v243_v10 = vld [vmem:[%s3827_s25 + $0x8] sm:$0xff]  ;;  %v3566_v15 = vld [vmem:[%s3832_s29 + $0x1b0] sm:$0xff]   ;;  %v3567_v18 = vld [vmem:[%s3832_s29 + $0x178] sm:$0xff]  }
  0x2c   : > { %3173 = vmatprep.subr.bf16.mxu1 %v3527_v22  ;;  %v280_v12 = vrot.slane %v243_v10, %v3870_v42  ;;  %v273_v13 = vcombine.high %v243_v10, %v243_v10  ;;  %v3569_v19 = vld [vmem:[%s3832_s29 + $0x1f8] sm:$0xff]   ;;  %v3579_v34 = vld [vmem:[%s3832_s29 + $0x288] sm:$0xff]   ;;  %v3580_v35 = vld [vmem:[%s3832_s29 + $0x250] sm:$0xff]  }
  0x2d   : > { %v3568_v22 = vld [vmem:[%s3832_s29 + $0x138] sm:$0xff]   ;;  %v3581_v37 = vld [vmem:[%s3832_s29 + $0x210] sm:$0xff]   ;;  %v3588_v44 = vld [vmem:[%s3832_s29 + $0x260] sm:$0xff]  }
  0x2e   : > { %3152 = vmatpush3.bf16.msra.mxu0 %v3528_v23  ;;  %v288_v16 = vcombine.high %v280_v12, %v280_v12  ;;  %v287_v17 = vrot.slane %v273_v13, %v3870_v42  ;;  %v3570_v23 = vld [vmem:[%s3832_s29 + $0x1b8] sm:$0xff]   ;;  %v3583_v38 = vld [vmem:[%s3832_s29 + $0x290] sm:$0xff]   ;;  %v3590_v45 = vld [vmem:[%s3832_s29 + $0x2e0] sm:$0xff]  }
  0x2f   : > { %3174 = vmatpush3.bf16.msra.mxu1 %v3529_v24  ;;  %3153 = vmatprep.subr.bf16.mxu0 %v3530_v25  ;;  %v3571_v25 = vld [vmem:[%s3832_s29 + $0x240] sm:$0xff]   ;;  %v3584_v39 = vld [vmem:[%s3832_s29 + $0x258] sm:$0xff]   ;;  %v3595_v51 = vld [vmem:[%s3832_s29 + $0x2a8] sm:$0xff]  }
  0x30   : > { %3175 = vmatprep.subr.bf16.mxu1 %v3531_v26  ;;  %v406_v20 = vpack.c.bf16 %v288_v16, %v288_v16  ;;  %v289_v21 = vcombine.high %v287_v17, %v287_v17  ;;  %v3574_v26 = vld [vmem:[%s3832_s29 + $0x2c0] sm:$0xff]   ;;  %v407_v29 = vpack.c.bf16 %v287_v17, %v287_v17  ;;  %v3586_v40 = vld [vmem:[%s3832_s29 + $0x2d8] sm:$0xff]   ;;  %v3596_v52 = vld [vmem:[%s3832_s29 + $0x270] sm:$0xff]  }
  0x31   : > { %v3587_v43 = vld [vmem:[%s3832_s29 + $0x298] sm:$0xff]   ;;  %v3589_v46 = vld [vmem:[%s3832_s29 + $0x220] sm:$0xff]   ;;  %v3609_v10 = vld [vmem:[%s3832_s29 + $0x348] sm:$0xff]  }
  0x32   : > { %3154 = vmatpush3.bf16.msra.mxu0 %v3532_v27  ;;  %v408_v24 = vpack.c.bf16 %v289_v21, %v289_v21  ;;  %v3573_v27 = vld [vmem:[%s3832_s29 + $0x200] sm:$0xff]   ;;  %v3612_v13 = vld [vmem:[%s3832_s29 + $0x388] sm:$0xff]   ;;  %v3614_v16 = vld [vmem:[%s3832_s29 + $0x310] sm:$0xff]  }
  0x33   : > { %3176 = vmatpush3.bf16.msra.mxu1 %v3533_v28  ;;  %3155 = vmatprep.subr.bf16.mxu0 %v3534_v30  ;;  %v405_v28 = vpack.c.bf16 %v280_v12, %v280_v12  ;;  %v3575_v30 = vld [vmem:[%s3832_s29 + $0x280] sm:$0xff]   ;;  %v3610_v12 = vld [vmem:[%s3832_s29 + $0x308] sm:$0xff]   ;;  %v3616_v17 = vld [vmem:[%s3832_s29 + $0x390] sm:$0xff]  }
  0x34   : > { %3177 = vmatprep.subr.bf16.mxu1 %v3535_v31  ;;  %v3576_v31 = vld [vmem:[%s3832_s29 + $0x248] sm:$0xff]   ;;  %v3620_v21 = vld [vmem:[%s3832_s29 + $0x398] sm:$0xff]  }
  0x36   : > { %3156 = vmatpush3.bf16.msra.mxu0 %v3536_v32  ;;  %v3578_v32 = vld [vmem:[%s3832_s29 + $0x2c8] sm:$0xff]  }
  0x37   : > { %3178 = vmatpush3.bf16.msra.mxu1 %v3537_v33  ;;  %3185 = vmatprep.subr.bf16.mxu0 %v3539_v36  ;;  %v3577_v33 = vld [vmem:[%s3832_s29 + $0x208] sm:$0xff]   ;;  %v3582_v36 = vld [vmem:[%s3832_s29 + $0x2d0] sm:$0xff]  }
  0x38   : > { %3207 = vmatprep.subr.bf16.mxu1 %v3541_v41  ;;  %v3585_v41 = vld [vmem:[%s3832_s29 + $0x218] sm:$0xff]  }
  0x39   : > { %2189 = vmatmul.mubr.bf16.vlgmr.msra.gmra.mrb[0].mxu0 %v401_v48  ;;  %v3592_v48 = vld [vmem:[%s3832_s29 + $0x268] sm:$0xff]  }
  0x3a   : > { %2229 = vmatmul.mubr.bf16.vlgmr.msra.gmra.mrb[0].mxu1 %v403_v49  ;;  %3186 = vmatpush3.bf16.msra.mxu0 %v3540_v47  ;;  %v3591_v47 = vld [vmem:[%s3832_s29 + $0x2a0] sm:$0xff]   ;;  %v3594_v49 = vld [vmem:[%s3832_s29 + $0x2e8] sm:$0xff]  }
  0x3b   : > { %3208 = vmatpush3.bf16.msra.mxu1 %v3542_v50  ;;  %3187 = vmatprep.subr.bf16.mxu0 %v3543_v53  ;;  %v3593_v50 = vld [vmem:[%s3832_s29 + $0x228] sm:$0xff]   ;;  %v244_v53 = vld [vmem:[%s3827_s25 + $0x10] sm:$0xff] }
  0x3c   : > { %3209 = vmatprep.subr.bf16.mxu1 %v3545_v54  ;;  %2268 = vmatprep.mubr.bf16.mxu0 %v406_v20  ;;  %v3598_v54 = vld [vmem:[%s3832_s29 + $0x2f0] sm:$0xff]   ;;  %v3618_v20 = vld [vmem:[%s3832_s29 + $0x318] sm:$0xff]  }
  0x3d   : > { %2308 = vmatprep.mubr.bf16.mxu1 %v408_v24  ;;  %v3622_v24 = vld [vmem:[%s3832_s29 + $0x320] sm:$0xff]  }
  0x3e   : > { %3188 = vmatpush3.bf16.msra.mxu0 %v3544_v55  ;;  %v297_v55 = vrot.slane %v244_v53, %v3870_v42 }
  0x3f   : > { %3210 = vmatpush3.bf16.msra.mxu1 %v3546_v56  ;;  %3189 = vmatprep.subr.bf16.mxu0 %v3547_v57  ;;  %v290_v56 = vcombine.high %v244_v53, %v244_v53  ;;  %v3597_v57 = vld [vmem:[%s3832_s29 + $0x230] sm:$0xff]   ;;  %v3642_v53 = vld [vmem:[%s3832_s29 + $0x448] sm:$0xff]  }
  0x40   : > { %3211 = vmatprep.subr.bf16.mxu1 %v3549_v58  ;;  %v3599_v58 = vld [vmem:[%s3832_s29 + $0x2b0] sm:$0xff]  }
  0x42   : > { %3190 = vmatpush3.bf16.msra.mxu0 %v3548_v59  ;;  %v305_v59 = vcombine.high %v297_v55, %v297_v55 }
  0x43   : > { %3212 = vmatpush3.bf16.msra.mxu1 %v3550_v60  ;;  %3191 = vmatprep.subr.bf16.mxu0 %v3551_v61  ;;  %v304_v60 = vrot.slane %v290_v56, %v3870_v42  ;;  %v3600_v61 = vld [vmem:[%s3832_s29 + $0x278] sm:$0xff]   ;;  %v3645_v56 = vld [vmem:[%s3832_s29 + $0x488] sm:$0xff]  }
  0x44   : > { %3213 = vmatprep.subr.bf16.mxu1 %v3553_v62  ;;  %v3602_v62 = vld [vmem:[%s3832_s29 + $0x2f8] sm:$0xff]  }
  0x46   : > { %3192 = vmatpush3.bf16.msra.mxu0 %v3552_v63  ;;  %v410_v63 = vpack.c.bf16 %v305_v59, %v305_v59  ;;  %v3647_v59 = vld [vmem:[%s3832_s29 + $0x410] sm:$0xff]  }
  0x47   : > { %3214 = vmatpush3.bf16.msra.mxu1 %v3554_v0  ;;  %3193 = vmatprep.subr.bf16.mxu0 %v3555_v1  ;;  %v306_v0 = vcombine.high %v304_v60, %v304_v60  ;;  %v3601_v1 = vld [vmem:[%s3832_s29 + $0x238] sm:$0xff]  }
  0x48   : > { %3215 = vmatprep.subr.bf16.mxu1 %v3557_v2  ;;  %v3603_v2 = vld [vmem:[%s3832_s29 + $0x2b8] sm:$0xff]  }
  0x4a   : > { %3194 = vmatpush3.bf16.msra.mxu0 %v3556_v3  ;;  %v412_v3 = vpack.c.bf16 %v306_v0, %v306_v0  ;;  %v3653_v0 = vld [vmem:[%s3832_s29 + $0x498] sm:$0xff]  }
  0x4b   : > { %3216 = vmatpush3.bf16.msra.mxu1 %v3558_v4  ;;  %3195 = vmatprep.subr.bf16.mxu0 %v3559_v5  ;;  %v3604_v4 = vld [vmem:[%s3832_s29 + $0x340] sm:$0xff]  }
  0x4c   : > { %3217 = vmatprep.subr.bf16.mxu1 %v3561_v6  ;;  %v3607_v5 = vld [vmem:[%s3832_s29 + $0x3c0] sm:$0xff]  }
  0x4d   : > { %v3606_v6 = vld [vmem:[%s3832_s29 + $0x300] sm:$0xff]  }
  0x4e   : > { %3196 = vmatpush3.bf16.msra.mxu0 %v3560_v7  ;;  %v409_v7 = vpack.c.bf16 %v297_v55, %v297_v55  ;;  %v3643_v55 = vld [vmem:[%s3832_s29 + $0x408] sm:$0xff]  }
  0x4f   : > { %3218 = vmatpush3.bf16.msra.mxu1 %v3562_v8  ;;  %3197 = vmatprep.subr.bf16.mxu0 %v3563_v9  ;;  %v411_v8 = vpack.c.bf16 %v304_v60, %v304_v60  ;;  %v3608_v9 = vld [vmem:[%s3832_s29 + $0x380] sm:$0xff]   ;;  %v3649_v60 = vld [vmem:[%s3832_s29 + $0x490] sm:$0xff]  }
  0x50   : > { %3219 = vmatprep.subr.bf16.mxu1 %v3565_v11  ;;  %v3611_v11 = vld [vmem:[%s3832_s29 + $0x3c8] sm:$0xff]  }
  0x52   : > { %3198 = vmatpush3.bf16.msra.mxu0 %v3564_v14  ;;  %v3613_v14 = vld [vmem:[%s3832_s29 + $0x350] sm:$0xff]  }
  0x53   : > { %3220 = vmatpush3.bf16.msra.mxu1 %v3566_v15  ;;  %3199 = vmatprep.subr.bf16.mxu0 %v3567_v18  ;;  %v3615_v15 = vld [vmem:[%s3832_s29 + $0x3d0] sm:$0xff]   ;;  %v3617_v18 = vld [vmem:[%s3832_s29 + $0x358] sm:$0xff]  }
  0x54   : > { %3221 = vmatprep.subr.bf16.mxu1 %v3569_v19  ;;  %v3619_v19 = vld [vmem:[%s3832_s29 + $0x3d8] sm:$0xff]  }
  0x56   : > { %3200 = vmatpush3.bf16.msra.mxu0 %v3568_v22  ;;  %v3621_v22 = vld [vmem:[%s3832_s29 + $0x360] sm:$0xff]  }
  0x57   : > { %3222 = vmatpush3.bf16.msra.mxu1 %v3570_v23  ;;  %3229 = vmatprep.subr.bf16.mxu0 %v3571_v25  ;;  %v3623_v23 = vld [vmem:[%s3832_s29 + $0x3e0] sm:$0xff]  }
  0x58   : > { %3251 = vmatprep.subr.bf16.mxu1 %v3574_v26  ;;  %v3624_v25 = vld [vmem:[%s3832_s29 + $0x3a0] sm:$0xff]   ;;  %v3625_v26 = vld [vmem:[%s3832_s29 + $0x368] sm:$0xff]  }
  0x59   : > { %2269 = vmatmul.mubr.bf16.vlgmr.msra.gmra.mrb[4].mxu0 %v405_v28  ;;  %v3626_v28 = vld [vmem:[%s3832_s29 + $0x328] sm:$0xff]  }
  0x5a   : > { %2309 = vmatmul.mubr.bf16.vlgmr.msra.gmra.mrb[4].mxu1 %v407_v29  ;;  %3230 = vmatpush3.bf16.msra.mxu0 %v3573_v27  ;;  %v3627_v27 = vld [vmem:[%s3832_s29 + $0x3e8] sm:$0xff]  }
  0x5b   : > { %3252 = vmatpush3.bf16.msra.mxu1 %v3575_v30  ;;  %3231 = vmatprep.subr.bf16.mxu0 %v3576_v31  ;;  %v3628_v29 = vld [vmem:[%s3832_s29 + $0x3a8] sm:$0xff]   ;;  %v3629_v30 = vld [vmem:[%s3832_s29 + $0x370] sm:$0xff]  }
  0x5c   : > { %3253 = vmatprep.subr.bf16.mxu1 %v3578_v32  ;;  %2348 = vmatprep.mubr.bf16.mxu0 %v410_v63  ;;  %v3631_v31 = vld [vmem:[%s3832_s29 + $0x3f0] sm:$0xff]   ;;  %v245_v32 = vld [vmem:[%s3827_s25 + $0x18] sm:$0xff] }
  0x5d   : > { %2388 = vmatprep.mubr.bf16.mxu1 %v412_v3  ;;  %v3651_v63 = vld [vmem:[%s3832_s29 + $0x418] sm:$0xff]   ;;  %v3655_v3 = vld [vmem:[%s3832_s29 + $0x420] sm:$0xff]  }
  0x5e   : > { %3232 = vmatpush3.bf16.msra.mxu0 %v3577_v33  ;;  %v3630_v33 = vld [vmem:[%s3832_s29 + $0x330] sm:$0xff]  }
  0x5f   : > { %3254 = vmatpush3.bf16.msra.mxu1 %v3579_v34  ;;  %3233 = vmatprep.subr.bf16.mxu0 %v3580_v35  ;;  %v314_v34 = vrot.slane %v245_v32, %v3870_v42  ;;  %v307_v35 = vcombine.high %v245_v32, %v245_v32  ;;  %v3677_v32 = vld [vmem:[%s3832_s29 + $0x5c8] sm:$0xff]  }
  0x60   : > { %3255 = vmatprep.subr.bf16.mxu1 %v3582_v36  ;;  %v3632_v36 = vld [vmem:[%s3832_s29 + $0x3b0] sm:$0xff]  }
  0x62   : > { %3234 = vmatpush3.bf16.msra.mxu0 %v3581_v37  ;;  %v3633_v37 = vld [vmem:[%s3832_s29 + $0x378] sm:$0xff]  }
  0x63   : > { %3256 = vmatpush3.bf16.msra.mxu1 %v3583_v38  ;;  %3235 = vmatprep.subr.bf16.mxu0 %v3584_v39  ;;  %v322_v38 = vcombine.high %v314_v34, %v314_v34  ;;  %v321_v39 = vrot.slane %v307_v35, %v3870_v42  ;;  %v3679_v35 = vld [vmem:[%s3832_s29 + $0x550] sm:$0xff]  }
  0x64   : > { %3257 = vmatprep.subr.bf16.mxu1 %v3586_v40  ;;  %v3635_v40 = vld [vmem:[%s3832_s29 + $0x3f8] sm:$0xff]  }
  0x66   : > { %3236 = vmatpush3.bf16.msra.mxu0 %v3585_v41  ;;  %v3634_v41 = vld [vmem:[%s3832_s29 + $0x338] sm:$0xff]  }
  0x67   : > { %3258 = vmatpush3.bf16.msra.mxu1 %v3587_v43  ;;  %3237 = vmatprep.subr.bf16.mxu0 %v3588_v44  ;;  %v414_v43 = vpack.c.bf16 %v322_v38, %v322_v38  ;;  %v323_v44 = vcombine.high %v321_v39, %v321_v39  ;;  %v3682_v38 = vld [vmem:[%s3832_s29 + $0x590] sm:$0xff]  }
  0x68   : > { %3259 = vmatprep.subr.bf16.mxu1 %v3590_v45  ;;  %v3636_v45 = vld [vmem:[%s3832_s29 + $0x3b8] sm:$0xff]  }
  0x6a   : > { %3238 = vmatpush3.bf16.msra.mxu0 %v3589_v46  ;;  %v3637_v46 = vld [vmem:[%s3832_s29 + $0x440] sm:$0xff]  }
  0x6b   : > { %3260 = vmatpush3.bf16.msra.mxu1 %v3591_v47  ;;  %3239 = vmatprep.subr.bf16.mxu0 %v3592_v48  ;;  %v416_v47 = vpack.c.bf16 %v323_v44, %v323_v44  ;;  %v3640_v48 = vld [vmem:[%s3832_s29 + $0x4c0] sm:$0xff]  }
  0x6c   : > { %3261 = vmatprep.subr.bf16.mxu1 %v3594_v49  ;;  %v3639_v49 = vld [vmem:[%s3832_s29 + $0x400] sm:$0xff]  }
  0x6d   : > { %v3687_v44 = vld [vmem:[%s3832_s29 + $0x560] sm:$0xff]  }
  0x6e   : > { %3240 = vmatpush3.bf16.msra.mxu0 %v3593_v50  ;;  %v413_v50 = vpack.c.bf16 %v314_v34, %v314_v34  ;;  %v3678_v34 = vld [vmem:[%s3832_s29 + $0x588] sm:$0xff]  }
  0x6f   : > { %3262 = vmatpush3.bf16.msra.mxu1 %v3595_v51  ;;  %3241 = vmatprep.subr.bf16.mxu0 %v3596_v52  ;;  %v415_v51 = vpack.c.bf16 %v321_v39, %v321_v39  ;;  %v3641_v52 = vld [vmem:[%s3832_s29 + $0x480] sm:$0xff]   ;;  %v3683_v39 = vld [vmem:[%s3832_s29 + $0x558] sm:$0xff]  }
  0x70   : > { %3263 = vmatprep.subr.bf16.mxu1 %v3598_v54  ;;  %v3644_v54 = vld [vmem:[%s3832_s29 + $0x4c8] sm:$0xff]  }
  0x72   : > { %3242 = vmatpush3.bf16.msra.mxu0 %v3597_v57  ;;  %v3646_v57 = vld [vmem:[%s3832_s29 + $0x450] sm:$0xff]  }
  0x73   : > { %3264 = vmatpush3.bf16.msra.mxu1 %v3599_v58  ;;  %3243 = vmatprep.subr.bf16.mxu0 %v3600_v61  ;;  %v3648_v58 = vld [vmem:[%s3832_s29 + $0x4d0] sm:$0xff]   ;;  %v3650_v61 = vld [vmem:[%s3832_s29 + $0x458] sm:$0xff]  }
  0x74   : > { %3265 = vmatprep.subr.bf16.mxu1 %v3602_v62  ;;  %v3652_v62 = vld [vmem:[%s3832_s29 + $0x4d8] sm:$0xff]  }
  0x76   : > { %3244 = vmatpush3.bf16.msra.mxu0 %v3601_v1  ;;  %v3654_v1 = vld [vmem:[%s3832_s29 + $0x460] sm:$0xff]  }
  0x77   : > { %3266 = vmatpush3.bf16.msra.mxu1 %v3603_v2  ;;  %3273 = vmatprep.subr.bf16.mxu0 %v3604_v4  ;;  %v3656_v2 = vld [vmem:[%s3832_s29 + $0x4e0] sm:$0xff]  }
  0x78   : > { %3295 = vmatprep.subr.bf16.mxu1 %v3607_v5  ;;  %v3657_v4 = vld [vmem:[%s3832_s29 + $0x4a0] sm:$0xff]   ;;  %v3658_v5 = vld [vmem:[%s3832_s29 + $0x468] sm:$0xff]  }
  0x79   : > { %2349 = vmatmul.mubr.bf16.vlgmr.msra.gmra.mrb[8].mxu0 %v409_v7  ;;  %v3659_v7 = vld [vmem:[%s3832_s29 + $0x428] sm:$0xff]  }
  0x7a   : > { %2389 = vmatmul.mubr.bf16.vlgmr.msra.gmra.mrb[8].mxu1 %v411_v8  ;;  %3274 = vmatpush3.bf16.msra.mxu0 %v3606_v6  ;;  %v3660_v6 = vld [vmem:[%s3832_s29 + $0x4e8] sm:$0xff]  }
  0x7b   : > { %3296 = vmatpush3.bf16.msra.mxu1 %v3608_v9  ;;  %3275 = vmatprep.subr.bf16.mxu0 %v3609_v10  ;;  %v3661_v8 = vld [vmem:[%s3832_s29 + $0x4a8] sm:$0xff]   ;;  %v3662_v9 = vld [vmem:[%s3832_s29 + $0x470] sm:$0xff]  }
  0x7c   : > { %3297 = vmatprep.subr.bf16.mxu1 %v3611_v11  ;;  %2428 = vmatprep.mubr.bf16.mxu0 %v414_v43  ;;  %v3664_v10 = vld [vmem:[%s3832_s29 + $0x4f0] sm:$0xff]   ;;  %v246_v11 = vld [vmem:[%s3827_s25 + $0x20] sm:$0xff]  ;;  %v3686_v43 = vld [vmem:[%s3832_s29 + $0x598] sm:$0xff]  }
  0x7d   : > { %2468 = vmatprep.mubr.bf16.mxu1 %v416_v47  ;;  %v3690_v47 = vld [vmem:[%s3832_s29 + $0x5a0] sm:$0xff]  }
  0x7e   : > { %3276 = vmatpush3.bf16.msra.mxu0 %v3610_v12  ;;  %v3663_v12 = vld [vmem:[%s3832_s29 + $0x430] sm:$0xff]  }
  0x7f   : > { %3298 = vmatpush3.bf16.msra.mxu1 %v3612_v13  ;;  %3277 = vmatprep.subr.bf16.mxu0 %v3613_v14  ;;  %v331_v13 = vrot.slane %v246_v11, %v3870_v42  ;;  %v324_v14 = vcombine.high %v246_v11, %v246_v11  ;;  %v3708_v11 = vld [vmem:[%s3832_s29 + $0x608] sm:$0xff]  }
  0x80   : > { %3299 = vmatprep.subr.bf16.mxu1 %v3615_v15  ;;  %v3665_v15 = vld [vmem:[%s3832_s29 + $0x4b0] sm:$0xff]  }
  0x82   : > { %3278 = vmatpush3.bf16.msra.mxu0 %v3614_v16  ;;  %v3666_v16 = vld [vmem:[%s3832_s29 + $0x478] sm:$0xff]  }
  0x83   : > { %3300 = vmatpush3.bf16.msra.mxu1 %v3616_v17  ;;  %3279 = vmatprep.subr.bf16.mxu0 %v3617_v18  ;;  %v339_v17 = vcombine.high %v331_v13, %v331_v13  ;;  %v338_v18 = vrot.slane %v324_v14, %v3870_v42  ;;  %v3711_v14 = vld [vmem:[%s3832_s29 + $0x610] sm:$0xff]  }
  0x84   : > { %3301 = vmatprep.subr.bf16.mxu1 %v3619_v19  ;;  %v3668_v19 = vld [vmem:[%s3832_s29 + $0x4f8] sm:$0xff]  }
  0x86   : > { %3280 = vmatpush3.bf16.msra.mxu0 %v3618_v20  ;;  %v3667_v20 = vld [vmem:[%s3832_s29 + $0x438] sm:$0xff]  }
  0x87   : > { %3302 = vmatpush3.bf16.msra.mxu1 %v3620_v21  ;;  %3281 = vmatprep.subr.bf16.mxu0 %v3621_v22  ;;  %v418_v21 = vpack.c.bf16 %v339_v17, %v339_v17  ;;  %v340_v22 = vcombine.high %v338_v18, %v338_v18  ;;  %v3714_v17 = vld [vmem:[%s3832_s29 + $0x618] sm:$0xff]  }
  0x88   : > { %3303 = vmatprep.subr.bf16.mxu1 %v3623_v23  ;;  %v3669_v23 = vld [vmem:[%s3832_s29 + $0x4b8] sm:$0xff]  }
  0x8a   : > { %3282 = vmatpush3.bf16.msra.mxu0 %v3622_v24  ;;  %v3670_v24 = vld [vmem:[%s3832_s29 + $0x540] sm:$0xff]  }
  0x8b   : > { %3304 = vmatpush3.bf16.msra.mxu1 %v3624_v25  ;;  %3283 = vmatprep.subr.bf16.mxu0 %v3625_v26  ;;  %v420_v25 = vpack.c.bf16 %v340_v22, %v340_v22  ;;  %v3673_v26 = vld [vmem:[%s3832_s29 + $0x5c0] sm:$0xff]  }
  0x8c   : > { %3305 = vmatprep.subr.bf16.mxu1 %v3627_v27  ;;  %v3672_v27 = vld [vmem:[%s3832_s29 + $0x500] sm:$0xff]  }
  0x8d   : > { %v3717_v22 = vld [vmem:[%s3832_s29 + $0x620] sm:$0xff]  }
  0x8e   : > { %3284 = vmatpush3.bf16.msra.mxu0 %v3626_v28  ;;  %v417_v28 = vpack.c.bf16 %v331_v13, %v331_v13  ;;  %v3710_v13 = vld [vmem:[%s3832_s29 + $0x650] sm:$0xff]  }
  0x8f   : > { %3306 = vmatpush3.bf16.msra.mxu1 %v3628_v29  ;;  %3285 = vmatprep.subr.bf16.mxu0 %v3629_v30  ;;  %v419_v29 = vpack.c.bf16 %v338_v18, %v338_v18  ;;  %v3674_v30 = vld [vmem:[%s3832_s29 + $0x580] sm:$0xff]   ;;  %v3715_v18 = vld [vmem:[%s3832_s29 + $0x698] sm:$0xff]  }
  0x90   : > { %3307 = vmatprep.subr.bf16.mxu1 %v3631_v31  ;;  %v3675_v31 = vld [vmem:[%s3832_s29 + $0x548] sm:$0xff]  }
  0x92   : > { %3286 = vmatpush3.bf16.msra.mxu0 %v3630_v33  ;;  %v3676_v33 = vld [vmem:[%s3832_s29 + $0x508] sm:$0xff]  }
  0x93   : > { %3308 = vmatpush3.bf16.msra.mxu1 %v3632_v36  ;;  %3287 = vmatprep.subr.bf16.mxu0 %v3633_v37  ;;  %v3681_v36 = vld [vmem:[%s3832_s29 + $0x5d0] sm:$0xff]  }
  0x94   : > { %3309 = vmatprep.subr.bf16.mxu1 %v3635_v40  ;;  %v3680_v37 = vld [vmem:[%s3832_s29 + $0x510] sm:$0xff]   ;;  %v3685_v40 = vld [vmem:[%s3832_s29 + $0x5d8] sm:$0xff]  }
  0x96   : > { %3288 = vmatpush3.bf16.msra.mxu0 %v3634_v41  ;;  %v3684_v41 = vld [vmem:[%s3832_s29 + $0x518] sm:$0xff]  }
  0x97   : > { %3310 = vmatpush3.bf16.msra.mxu1 %v3636_v45  ;;  %3317 = vmatprep.subr.bf16.mxu0 %v3637_v46  ;;  %v3689_v45 = vld [vmem:[%s3832_s29 + $0x5e0] sm:$0xff]  }
  0x98   : > { %3339 = vmatprep.subr.bf16.mxu1 %v3640_v48  ;;  %v3688_v46 = vld [vmem:[%s3832_s29 + $0x520] sm:$0xff]   ;;  %v3691_v48 = vld [vmem:[%s3832_s29 + $0x568] sm:$0xff]  }
  0x99   : > { %2429 = vmatmul.mubr.bf16.vlgmr.msra.gmra.mrb[12].mxu0 %v413_v50  ;;  %v3692_v50 = vld [vmem:[%s3832_s29 + $0x528] sm:$0xff]  }
  0x9a   : > { %2469 = vmatmul.mubr.bf16.vlgmr.msra.gmra.mrb[12].mxu1 %v415_v51  ;;  %3318 = vmatpush3.bf16.msra.mxu0 %v3639_v49  ;;  %v3693_v49 = vld [vmem:[%s3832_s29 + $0x5e8] sm:$0xff]  }
  0x9b   : > { %3340 = vmatpush3.bf16.msra.mxu1 %v3641_v52  ;;  %3319 = vmatprep.subr.bf16.mxu0 %v3642_v53  ;;  %v3694_v51 = vld [vmem:[%s3832_s29 + $0x5a8] sm:$0xff]   ;;  %v3695_v52 = vld [vmem:[%s3832_s29 + $0x570] sm:$0xff]  }
  0x9c   : > { %3341 = vmatprep.subr.bf16.mxu1 %v3644_v54  ;;  %2508 = vmatprep.mubr.bf16.mxu0 %v418_v21  ;;  %v3697_v53 = vld [vmem:[%s3832_s29 + $0x5f0] sm:$0xff]   ;;  %v247_v54 = vld [vmem:[%s3827_s25 + $0x28] sm:$0xff] }
  0x9d   : > { %2548 = vmatprep.mubr.bf16.mxu1 %v420_v25 }
  0x9e   : > { %3320 = vmatpush3.bf16.msra.mxu0 %v3643_v55  ;;  %v3696_v55 = vld [vmem:[%s3832_s29 + $0x530] sm:$0xff]  }
  0x9f   : > { %3342 = vmatpush3.bf16.msra.mxu1 %v3645_v56  ;;  %3321 = vmatprep.subr.bf16.mxu0 %v3646_v57  ;;  %v348_v56 = vrot.slane %v247_v54, %v3870_v42  ;;  %v341_v57 = vcombine.high %v247_v54, %v247_v54 }
  0xa0   : > { %3343 = vmatprep.subr.bf16.mxu1 %v3648_v58  ;;  %v3698_v58 = vld [vmem:[%s3832_s29 + $0x5b0] sm:$0xff]  }
  0xa2   : > { %3322 = vmatpush3.bf16.msra.mxu0 %v3647_v59  ;;  %v3699_v59 = vld [vmem:[%s3832_s29 + $0x578] sm:$0xff]  }
  0xa3   : > { %3344 = vmatpush3.bf16.msra.mxu1 %v3649_v60  ;;  %3323 = vmatprep.subr.bf16.mxu0 %v3650_v61  ;;  %v356_v60 = vcombine.high %v348_v56, %v348_v56  ;;  %v355_v61 = vrot.slane %v341_v57, %v3870_v42 }
  0xa4   : > { %3345 = vmatprep.subr.bf16.mxu1 %v3652_v62  ;;  %v3701_v62 = vld [vmem:[%s3832_s29 + $0x5f8] sm:$0xff]  }
  0xa6   : > { %3324 = vmatpush3.bf16.msra.mxu0 %v3651_v63  ;;  %v422_v63 = vpack.c.bf16 %v356_v60, %v356_v60 }
  0xa7   : > { %3346 = vmatpush3.bf16.msra.mxu1 %v3653_v0  ;;  %3325 = vmatprep.subr.bf16.mxu0 %v3654_v1  ;;  %v357_v0 = vcombine.high %v355_v61, %v355_v61  ;;  %v3700_v1 = vld [vmem:[%s3832_s29 + $0x538] sm:$0xff]  }
  0xa8   : > { %3347 = vmatprep.subr.bf16.mxu1 %v3656_v2  ;;  %v3702_v2 = vld [vmem:[%s3832_s29 + $0x5b8] sm:$0xff]  }
  0xaa   : > { %3326 = vmatpush3.bf16.msra.mxu0 %v3655_v3  ;;  %v424_v3 = vpack.c.bf16 %v357_v0, %v357_v0 }
  0xab   : > { %3348 = vmatpush3.bf16.msra.mxu1 %v3657_v4  ;;  %3327 = vmatprep.subr.bf16.mxu0 %v3658_v5  ;;  %v3703_v4 = vld [vmem:[%s3832_s29 + $0x640] sm:$0xff]   ;;  %v421_v5 = vpack.c.bf16 %v348_v56, %v348_v56 }
  0xac   : > { %3349 = vmatprep.subr.bf16.mxu1 %v3660_v6  ;;  %v3705_v6 = vld [vmem:[%s3832_s29 + $0x600] sm:$0xff]  }
  0xae   : > { %3328 = vmatpush3.bf16.msra.mxu0 %v3659_v7  ;;  %v423_v7 = vpack.c.bf16 %v355_v61, %v355_v61 }
  0xaf   : > { %3350 = vmatpush3.bf16.msra.mxu1 %v3661_v8  ;;  %3329 = vmatprep.subr.bf16.mxu0 %v3662_v9  ;;  %v3706_v8 = vld [vmem:[%s3832_s29 + $0x680] sm:$0xff]   ;;  %v3777_v9 = vmov 0.0  }
  0xb0   : > { %3351 = vmatprep.subr.bf16.mxu1 %v3664_v10  ;;  %v3707_v10 = vld [vmem:[%s3832_s29 + $0x648] sm:$0xff]  }
  0xb2   : > { %3330 = vmatpush3.bf16.msra.mxu0 %v3663_v12  ;;  %v3709_v12 = vld [vmem:[%s3832_s29 + $0x688] sm:$0xff]  }
  0xb3   : > { %3352 = vmatpush3.bf16.msra.mxu1 %v3665_v15  ;;  %3331 = vmatprep.subr.bf16.mxu0 %v3666_v16  ;;  %v3712_v15 = vld [vmem:[%s3832_s29 + $0x690] sm:$0xff]   ;;  %v3713_v16 = vld [vmem:[%s3832_s29 + $0x658] sm:$0xff]  }
  0xb4   : > { %3353 = vmatprep.subr.bf16.mxu1 %v3668_v19  ;;  %v3716_v19 = vld [vmem:[%s3832_s29 + $0x660] sm:$0xff]  }
  0xb6   : > { %3332 = vmatpush3.bf16.msra.mxu0 %v3667_v20  ;;  %v248_v20 = vld [vmem:[%s3827_s25 + $0x30] sm:$0x3f] }
  0xb7   : > { %3354 = vmatpush3.bf16.msra.mxu1 %v3669_v23  ;;  %3361 = vmatprep.subr.bf16.mxu0 %v3670_v24  ;;  %v365_v21 = vrot.slane %v248_v20, %v3870_v42  ;;  %v3718_v23 = vld [vmem:[%s3832_s29 + $0x6a0] sm:$0xff]   ;;  %v3719_v24 = vld [vmem:[%s3832_s29 + $0x668] sm:$0xff]  }
  0xb8   : > { %3383 = vmatprep.subr.bf16.mxu1 %v3673_v26 }
  0xb9   : > { %2509 = vmatmul.mubr.bf16.vlgmr.msra.gmra.mrb[16].mxu0 %v417_v28  ;;  %v373_v25 = vcombine.high %v365_v21, %v365_v21  ;;  %v3721_v28 = vld [vmem:[%s3832_s29 + $0x6a8] sm:$0xff]  }
  0xba   : > { %2549 = vmatmul.mubr.bf16.vlgmr.msra.gmra.mrb[16].mxu1 %v419_v29  ;;  %3362 = vmatpush3.bf16.msra.mxu0 %v3672_v27  ;;  %v3720_v27 = vld [vmem:[%s3832_s29 + $0x628] sm:$0xff]   ;;  %v3722_v29 = vld [vmem:[%s3832_s29 + $0x670] sm:$0xff]  }
  0xbb   : > { %3384 = vmatpush3.bf16.msra.mxu1 %v3674_v30  ;;  %3363 = vmatprep.subr.bf16.mxu0 %v3675_v31  ;;  %v426_v26 = vpack.c.bf16 %v373_v25, %v373_v25  ;;  %v358_v30 = vcombine.high %v248_v20, %v248_v20  ;;  %v3723_v31 = vld [vmem:[%s3832_s29 + $0x630] sm:$0xff]  }
  0xbc   : > { %3385 = vmatprep.subr.bf16.mxu1 %v3677_v32  ;;  %2588 = vmatprep.mubr.bf16.mxu0 %v422_v63  ;;  %v3724_v32 = vld [vmem:[%s3832_s29 + $0x6b0] sm:$0xff]  }
  0xbd   : > { %2628 = vmatprep.mubr.bf16.mxu1 %v424_v3 }
  0xbe   : > { %3364 = vmatpush3.bf16.msra.mxu0 %v3676_v33  ;;  %v3725_v33 = vld [vmem:[%s3832_s29 + $0x678] sm:$0xff]  }
  0xbf   : > { %3386 = vmatpush3.bf16.msra.mxu1 %v3678_v34  ;;  %3365 = vmatprep.subr.bf16.mxu0 %v3679_v35  ;;  %v372_v34 = vrot.slane %v358_v30, %v3870_v42  ;;  %v3726_v35 = vld [vmem:[%s3832_s29 + $0x638] sm:$0xff]  }
  0xc0   : > { %3387 = vmatprep.subr.bf16.mxu1 %v3681_v36  ;;  %v3728_v36 = vld [vmem:[%s3832_s29 + $0x6b8] sm:$0xff]  }
  0xc2   : > { %3366 = vmatpush3.bf16.msra.mxu0 %v3680_v37  ;;  %v425_v37 = vpack.c.bf16 %v365_v21, %v365_v21 }
  0xc3   : > { %3388 = vmatpush3.bf16.msra.mxu1 %v3682_v38  ;;  %3367 = vmatprep.subr.bf16.mxu0 %v3683_v39  ;;  %v427_v38 = vpack.c.bf16 %v372_v34, %v372_v34 }
  0xc4   : > { %3389 = vmatprep.subr.bf16.mxu1 %v3685_v40 }
  0xc6   : > { %3368 = vmatpush3.bf16.msra.mxu0 %v3684_v41 }
  0xc7   : > { %3390 = vmatpush3.bf16.msra.mxu1 %v3686_v43  ;;  %3369 = vmatprep.subr.bf16.mxu0 %v3687_v44 }
  0xc8   : > { %3391 = vmatprep.subr.bf16.mxu1 %v3689_v45 }
  0xca   : > { %3370 = vmatpush3.bf16.msra.mxu0 %v3688_v46 }
  0xcb   : > { %3392 = vmatpush3.bf16.msra.mxu1 %v3690_v47  ;;  %3371 = vmatprep.subr.bf16.mxu0 %v3691_v48 }
  0xcc   : > { %3393 = vmatprep.subr.bf16.mxu1 %v3693_v49 }
  0xce   : > { %3372 = vmatpush3.bf16.msra.mxu0 %v3692_v50 }
  0xcf   : > { %3394 = vmatpush3.bf16.msra.mxu1 %v3694_v51  ;;  %3373 = vmatprep.subr.bf16.mxu0 %v3695_v52 }
  0xd0   : > { %3395 = vmatprep.subr.bf16.mxu1 %v3697_v53 }
  0xd2   : > { %3374 = vmatpush3.bf16.msra.mxu0 %v3696_v55 }
  0xd3   : > { %3396 = vmatpush3.bf16.msra.mxu1 %v3698_v58  ;;  %3375 = vmatprep.subr.bf16.mxu0 %v3699_v59 }
  0xd4   : > { %3397 = vmatprep.subr.bf16.mxu1 %v3701_v62 }
  0xd6   : > { %3376 = vmatpush3.bf16.msra.mxu0 %v3700_v1 }
  0xd7   : > { %3398 = vmatpush3.bf16.msra.mxu1 %v3702_v2  ;;  %3405 = vmatprep.subr.bf16.mxu0 %v3703_v4 }
  0xd8   : > { %3445 = vmatprep.subr.bf16.mxu1 %v3777_v9 }
  0xd9   : > { %2589 = vmatmul.mubr.bf16.vlgmr.msra.gmra.mrb[20].mxu0 %v421_v5 }
  0xda   : > { %2629 = vmatmul.mubr.bf16.vlgmr.msra.gmra.mrb[20].mxu1 %v423_v7  ;;  %3406 = vmatpush3.bf16.msra.mxu0 %v3705_v6 }
  0xdb   : > { %3446 = vmatpush3.bf16.msra.mxu1 %v3706_v8  ;;  %3407 = vmatprep.subr.bf16.mxu0 %v3707_v10 }
  0xdc   : > { %3447 = vmatprep.subr.bf16.mxu1 %v3777_v9  ;;  %3461 = vmatprep.mubr.msk.bf16.mxu1 %vm3778_vm0, %v3777_v9 }
  0xdd   : > { %2668 = vmatprep.mubr.bf16.mxu0 %v426_v26 }
  0xde   : > { %3408 = vmatpush3.bf16.msra.mxu0 %v3708_v11 }
  0xdf   : > { %3448 = vmatpush3.bf16.msra.mxu1 %v3709_v12  ;;  %3409 = vmatprep.subr.bf16.mxu0 %v3710_v13 }
  0xe0   : > { %3449 = vmatprep.subr.bf16.mxu1 %v3777_v9 }
  0xe2   : > { %3410 = vmatpush3.bf16.msra.mxu0 %v3711_v14 }
  0xe3   : > { %3450 = vmatpush3.bf16.msra.mxu1 %v3712_v15  ;;  %3411 = vmatprep.subr.bf16.mxu0 %v3713_v16 }
  0xe4   : > { %3451 = vmatprep.subr.bf16.mxu1 %v3777_v9 }
  0xe6   : > { %3412 = vmatpush3.bf16.msra.mxu0 %v3714_v17 }
  0xe7   : > { %3452 = vmatpush3.bf16.msra.mxu1 %v3715_v18  ;;  %3413 = vmatprep.subr.bf16.mxu0 %v3716_v19 }
  0xe8   : > { %3453 = vmatprep.subr.bf16.mxu1 %v3777_v9 }
  0xea   : > { %3414 = vmatpush3.bf16.msra.mxu0 %v3717_v22 }
  0xeb   : > { %3454 = vmatpush3.bf16.msra.mxu1 %v3718_v23  ;;  %3415 = vmatprep.subr.bf16.mxu0 %v3719_v24 }
  0xec   : > { %3455 = vmatprep.subr.bf16.mxu1 %v3777_v9 }
  0xee   : > { %3416 = vmatpush3.bf16.msra.mxu0 %v3720_v27 }
  0xef   : > { %3456 = vmatpush3.bf16.msra.mxu1 %v3721_v28  ;;  %3417 = vmatprep.subr.bf16.mxu0 %v3722_v29 }
  0xf0   : > { %3457 = vmatprep.subr.bf16.mxu1 %v3777_v9 }
  0xf2   : > { %3418 = vmatpush3.bf16.msra.mxu0 %v3723_v31 }
  0xf3   : > { %3458 = vmatpush3.bf16.msra.mxu1 %v3724_v32  ;;  %3419 = vmatprep.subr.bf16.mxu0 %v3725_v33 }
  0xf4   : > { %3459 = vmatprep.subr.bf16.mxu1 %v3777_v9 }
  0xf6   : > { %3420 = vmatpush3.bf16.msra.mxu0 %v3726_v35 }
  0xf7   : > { %3460 = vmatpush3.bf16.msra.mxu1 %v3728_v36 }
  0xf9   : > { %2669 = vmatmul.mubr.bf16.vlgmr.msra.gmra.mrb[24].mxu0 %v425_v37 }
  0xfa   : > { %3462 = vmatmul.mubr.bf16.vlgmr.msra.gmra.mrb[24].mxu1 %v427_v38 }
 0x10c   : > { %v3157_v39 = vpop.f32.mrb[0].mxu0 }
 0x10d   : > { %v3179_v40 = vpop.f32.mrb[0].mxu1  ;;  %v3158_v41 = vpop.f32.mrb[1].mxu0 }
 0x10e   : > { %v3180_v43 = vpop.f32.mrb[1].mxu1  ;;  %v3159_v44 = vadd.f32 %v3158_v41, %v3157_v39  ;;  %v3160_v46 = vpop.f32.mrb[2].mxu0 }
 0x10f   : > { %v3181_v45 = vadd.f32 %v3180_v43, %v3179_v40  ;;  %v3182_v42 = vpop.f32.mrb[2].mxu1  ;;  %v3161_v47 = vpop.f32.mrb[3].mxu0 }
 0x110   : > { %v3183_v48 = vpop.f32.mrb[3].mxu1 }
 0x111   : > { %v2231_v49 = vadd.f32 %v3181_v45, %v3159_v44 }
 0x12c   : > { %v3201_v50 = vpop.f32.mrb[4].mxu0 }
 0x12d   : > { %v3223_v51 = vpop.f32.mrb[4].mxu1  ;;  %v3202_v52 = vpop.f32.mrb[5].mxu0 }
 0x12e   : > { %v3224_v53 = vpop.f32.mrb[5].mxu1  ;;  %v3203_v54 = vadd.f32 %v3202_v52, %v3201_v50  ;;  %v3204_v55 = vpop.f32.mrb[6].mxu0 }
 0x12f   : > { %v3225_v56 = vadd.f32 %v3224_v53, %v3223_v51  ;;  %v3226_v57 = vpop.f32.mrb[6].mxu1  ;;  %v3205_v58 = vpop.f32.mrb[7].mxu0 }
 0x130   : > { %v3227_v59 = vpop.f32.mrb[7].mxu1  ;;  %v2271_v60 = vadd.f32 %v3203_v54, %v2231_v49 }
 0x131   : > { %v3729_v59 = vld [vmem:[%s4134_s3] sm:$0xff] (!%p3126_p6)  }
 0x132   : > { %v2311_v61 = vadd.f32 %v3225_v56, %v2271_v60  ;;  %v241_v56 = vld [vmem:[#allocation2] sm:$0x3]  ;;  %v3779_v60 = vmov (!%p3126_p6), 0.0  }
 0x133   : > { %3465 = vmatprep.subr.bf16.mxu0 (!%p3126_p6), %v3779_v60  ;;  %3481 = vmatprep.mubr.msk.bf16.mxu0 (!%p3126_p6), %vm3780_vm1, %v3779_v60 }
 0x134   : > { %3466 = vmatpush3.bf16.msra.mxu0 (!%p3126_p6), %v3729_v59 }
 0x135   : > { %3467 = vmatprep.subr.bf16.mxu0 (!%p3126_p6), %v3779_v60 }
 0x14c   : > { %v3245_v62 = vpop.f32.mrb[8].mxu0 }
 0x14d   : > { %v3267_v63 = vpop.f32.mrb[8].mxu1  ;;  %v3246_v0 = vpop.f32.mrb[9].mxu0 }
 0x14e   : > { %v3268_v1 = vpop.f32.mrb[9].mxu1  ;;  %v3247_v2 = vadd.f32 %v3246_v0, %v3245_v62  ;;  %v3248_v3 = vpop.f32.mrb[10].mxu0  ;;  %v3731_v62 = vld [vmem:[%s4134_s3 + $0x10] sm:$0xff] (!%p3126_p6)   ;;  %v3733_v0 = vld [vmem:[%s4134_s3 + $0x20] sm:$0xff] (!%p3126_p6)  }
 0x14f   : > { %v3269_v4 = vadd.f32 %v3268_v1, %v3267_v63  ;;  %v3270_v5 = vpop.f32.mrb[10].mxu1  ;;  %v3249_v6 = vpop.f32.mrb[11].mxu0  ;;  %v3732_v63 = vld [vmem:[%s4134_s3 + $0x18] sm:$0xff] (!%p3126_p6)   ;;  %v3734_v1 = vld [vmem:[%s4134_s3 + $0x28] sm:$0xff] (!%p3126_p6)   ;;  %v3127_v3 = vld [vmem:[%s4133_s2] ss:$0 sm:$0xff] (!%p3126_p6) }
 0x150   : > { %v3271_v7 = vpop.f32.mrb[11].mxu1  ;;  %v2351_v8 = vadd.f32 %v3247_v2, %v2311_v61  ;;  %v3730_v61 = vld [vmem:[%s4134_s3 + $0x8] sm:$0xff] (!%p3126_p6)   ;;  %v3735_v5 = vld [vmem:[%s4134_s3 + $0x30] sm:$0xff] (!%p3126_p6)  }
 0x151   : > { %3468 = vmatpush3.bf16.msra.mxu0 (!%p3126_p6), %v3730_v61  ;;  %v3736_v7 = vld [vmem:[%s4134_s3 + $0x38] sm:$0xff] (!%p3126_p6)  }
 0x152   : > { %v2391_v9 = vadd.f32 %v3269_v4, %v2351_v8  ;;  %3469 = vmatprep.subr.bf16.mxu0 (!%p3126_p6), %v3779_v60 }
 0x155   : > { %3470 = vmatpush3.bf16.msra.mxu0 (!%p3126_p6), %v3731_v62 }
 0x156   : > { %3471 = vmatprep.subr.bf16.mxu0 (!%p3126_p6), %v3779_v60 }
 0x159   : > { %3472 = vmatpush3.bf16.msra.mxu0 (!%p3126_p6), %v3732_v63 }
 0x15a   : > { %3473 = vmatprep.subr.bf16.mxu0 (!%p3126_p6), %v3779_v60 }
 0x15d   : > { %3474 = vmatpush3.bf16.msra.mxu0 (!%p3126_p6), %v3733_v0 }
 0x15e   : > { %3475 = vmatprep.subr.bf16.mxu0 (!%p3126_p6), %v3779_v60 }
 0x161   : > { %3476 = vmatpush3.bf16.msra.mxu0 (!%p3126_p6), %v3734_v1 }
 0x162   : > { %3477 = vmatprep.subr.bf16.mxu0 (!%p3126_p6), %v3779_v60 }
 0x165   : > { %3478 = vmatpush3.bf16.msra.mxu0 (!%p3126_p6), %v3735_v5 }
 0x166   : > { %3479 = vmatprep.subr.bf16.mxu0 (!%p3126_p6), %v3779_v60 }
 0x169   : > { %3480 = vmatpush3.bf16.msra.mxu0 (!%p3126_p6), %v3736_v7 }
 0x16c   : > { %v3289_v10 = vpop.f32.mrb[12].mxu0 }
 0x16d   : > { %v3311_v11 = vpop.f32.mrb[12].mxu1  ;;  %v3290_v12 = vpop.f32.mrb[13].mxu0 }
 0x16e   : > { %v3312_v13 = vpop.f32.mrb[13].mxu1  ;;  %v3291_v14 = vadd.f32 %v3290_v12, %v3289_v10  ;;  %v3292_v15 = vpop.f32.mrb[14].mxu0 }
 0x16f   : > { %v3313_v16 = vadd.f32 %v3312_v13, %v3311_v11  ;;  %v3314_v17 = vpop.f32.mrb[14].mxu1  ;;  %v3293_v18 = vpop.f32.mrb[15].mxu0 }
 0x170   : > { %v3315_v19 = vpop.f32.mrb[15].mxu1  ;;  %v2431_v20 = vadd.f32 %v3291_v14, %v2391_v9  ;;  %v3128_v9 = vld [vmem:[%s4135_s4] ss:$0 sm:$0xff] (!%p3126_p6) }
 0x172   : > { %v2471_v21 = vadd.f32 %v3313_v16, %v2431_v20 }
 0x18c   : > { %v3333_v22 = vpop.f32.mrb[16].mxu0 }
 0x18d   : > { %v3355_v23 = vpop.f32.mrb[16].mxu1  ;;  %v3334_v24 = vpop.f32.mrb[17].mxu0 }
 0x18e   : > { %v3356_v25 = vpop.f32.mrb[17].mxu1  ;;  %v3335_v26 = vadd.f32 %v3334_v24, %v3333_v22  ;;  %v3336_v27 = vpop.f32.mrb[18].mxu0 }
 0x18f   : > { %v3357_v28 = vadd.f32 %v3356_v25, %v3355_v23  ;;  %v3358_v29 = vpop.f32.mrb[18].mxu1  ;;  %v3337_v30 = vpop.f32.mrb[19].mxu0 }
 0x190   : > { %v3359_v31 = vpop.f32.mrb[19].mxu1  ;;  %v2511_v32 = vadd.f32 %v3335_v26, %v2471_v21 }
 0x192   : > { %v2551_v33 = vadd.f32 %v3357_v28, %v2511_v32 }
 0x1ac   : > { %v3377_v34 = vpop.f32.mrb[20].mxu0 }
 0x1ad   : > { %v3399_v35 = vpop.f32.mrb[20].mxu1  ;;  %v3378_v36 = vpop.f32.mrb[21].mxu0 }
 0x1ae   : > { %v3400_v37 = vpop.f32.mrb[21].mxu1  ;;  %v3379_v38 = vadd.f32 %v3378_v36, %v3377_v34  ;;  %v3380_v39 = vpop.f32.mrb[22].mxu0 }
 0x1af   : > { %v3401_v40 = vadd.f32 %v3400_v37, %v3399_v35  ;;  %v3402_v41 = vpop.f32.mrb[22].mxu1  ;;  %v3381_v43 = vpop.f32.mrb[23].mxu0 }
 0x1b0   : > { %v3403_v44 = vpop.f32.mrb[23].mxu1  ;;  %v2591_v45 = vadd.f32 %v3379_v38, %v2551_v33 }
 0x1b2   : > { %v2631_v46 = vadd.f32 %v3401_v40, %v2591_v45 }
 0x1cc   : > { %v3421_v42 = vpop.f32.mrb[24].mxu0 }
 0x1cd   : > { %v2710_v47 = vpop.f32.mrb[24].mxu1  ;;  %v3422_v48 = vpop.f32.mrb[25].mxu0 }
 0x1ce   : > { %v3463_v49 = vpop.f32.mrb[25].mxu1  ;;  %v3423_v50 = vadd.f32 %v3422_v48, %v3421_v42  ;;  %v3424_v51 = vpop.f32.mrb[26].mxu0 }
 0x1cf   : > { %v2713_v52 = vpop.f32.mrb[26].mxu1  ;;  %v3425_v53 = vpop.f32.mrb[27].mxu0 }
 0x1d0   : > { %v3464_v54 = vpop.f32.mrb[27].mxu1  ;;  %v2671_v55 = vadd.f32 %v3423_v50, %v2631_v46  ;;  %2721 = sbr.rel (%p3126_p6) target bundleno = 699 (0x2bb), region = 48 }
 0x1d2   : > { %v2711_v57 = vadd.f32 %v2710_v47, %v2671_v55 }
 0x1d4   : > { %v2716_v58 = vadd.f32 %v2711_v57, %v241_v56 }
 0x1d6   : > { %2717 = vst [vmem:[#allocation2] sm:$0x3] %v2716_v58 }
 0x1dd   : > { %v2722_v2 = vld [vmem:[#allocation2] sm:$0x3] }
 0x1de   : > { %v2730_v4 = vadd.f32 %v3127_v3, %v2722_v2 }
 0x1e0   : > { %v2731_v6 = vmax.f32 %v2730_v4, 0.0 }
 0x1e2   : > { %v2732_v8 = vpack.c.bf16 %v2731_v6, %v2731_v6 }
 0x1e4   : > { %3482 = vmatmul.mubr.bf16.vlgmr.msra.gmra.mrb[0].mxu0 %v2732_v8 }
 0x2b7   : > { %v2838_v10 = vpop.f32.mrb[0].mxu0 }
 0x2b8   : > { %v2839_v11 = vadd.f32 %v3128_v9, %v2838_v10  ;;  %v3483_v12 = vpop.f32.mrb[1].mxu0 }
 0x2b9   : > { %v2841_v13 = vpop.f32.mrb[2].mxu0 }
 0x2ba   : > { %2844 = vst [vmem:[#allocation2] sm:$0x3] %v2839_v11  ;;  %v3484_v14 = vpop.f32.mrb[3].mxu0 }
 0x2bb PF: > { %p3489_p7 = scmp.eq.s32.totalorder %s3818_s19, 5  ;;  %s3781_s27 = smov [#allocation2]  }
 0x2bc   : > { %s2852_s28 = sshll.u32 %s3781_s27, 4  ;;  %s2853_s28 = int_to_ptr.vmem [resolvable:$true] %s2852_s28 }
 0x2bd   : > { %s3737_s29 = scalar_lea.vmem %s2853_s28, 32  ;;  %p3744_p11 = scmp.lt.s32.totalorder %s2853_s28, %s2853_s28 }
 0x2be   : > { %p3738_p8 = scmp.ne.s32.totalorder %s2853_s28, %s3737_s29  ;;  %p3745_p12 = scmp.lt.s32.totalorder %s3737_s29, %s3737_s29 }
 0x2c0   : > { %p3739_p9 = pnand %p3738_p8, %p3489_p7  ;;  %p3746_p13 = por %p3745_p12, %p3744_p11 }
 0x2c2   : > { %p3740_p10 = pneg %p3739_p9 }
 0x2c4   : > { %p3747_p0 = pnand %p3746_p13, %p3740_p10 }
 0x2c6   : > { %3750 = shalt.err (!%p3747_p0)
}
 0x2c7   : > { %s3751_s7 = scalar_lea.hbm %s4136_s5, 32 }
 0x2c8   : > { %p3752_p1 = scmp.ne.s32.totalorder %s4136_s5, %s3751_s7  ;;  %p3757_p4 = scmp.lt.u32.totalorder %s3751_s7, %s4136_s5 }
 0x2ca   : > { %p3753_p2 = pnand %p3752_p1, %p3489_p7 }
 0x2cc   : > { %p3754_p3 = pneg %p3753_p2 }
 0x2ce   : > { %p3759_p5 = pnand %p3757_p4, %p3754_p3 }
 0x2d0   : > { %3762 = shalt.err (!%p3759_p5)
}
 0x2d1   : > { %3486 = dma.vmem_to_hbm [thread:$0]  (%p3489_p7), %s2853_s28, 32, %s4136_s5, [#allocation3]  }
 0x2d2   : > { %3768 = dma.done.wait (%p3489_p7), [#allocation3], 32  }
 0x2d3   : > { %3770 = vsyncadd (%p3489_p7), [#allocation3], 4294967264 }
 0x2d4 PF: > { %s16_s18 = sadd.s32 1, %s3773_s18  }
 0x2d5   : > { %p13_p6 = scmp.ge.s32.totalorder %s16_s18, 8  }
 0x2d7   :  { %15 = sbr.rel (!%p13_p6) target bundleno = 1 (0x1), region = 78 }
 0x2de   :  { %2865 = vsyncpa [#allocation3], 1 }
 0x2df   :  { %2867 = vsyncpa [#allocation3 + $0x1], 1 }

</bundles_post_ra>
